<compile_context>
chip_gen: v6e
topology: v6e:2x2x1
jax: 0.10.0
libtpu: 0.0.40
codegen_flags: <defaults>
</compile_context>

<pallas_src>
import jax
import jax.numpy as jnp
from jax import lax
from jax.experimental import pallas as pl
from jax.experimental.pallas import tpu as pltpu

# Fixed architecture constants (from the PyTorch module; input_size = 784).
IMG = 28                  # 28x28 input
N_SPATIAL = IMG * IMG     # 784
N_LANES = 896             # 784 padded up to a multiple of 128
C1, C2 = 6, 16            # conv1 / conv2 output channels
POOL_OUT = 11 * 11        # conv2 output positions per channel
CH_LANES = 128            # per-channel lane block in the flattened activation


def _round_up(n, m):
    return ((n + m - 1) // m) * m


# ----------------------------------------------------------------------------
# Fused kernel: conv1 -> relu -> maxpool -> conv2 -> relu -> flatten -> MLP
# ----------------------------------------------------------------------------
def fused_net_kernel(x_ref, w1m_ref, b1c_ref, w2m_ref, b2c_ref, sel_ref,
                     fw1_ref, fb1_ref, fw2_ref, fb2_ref, fw3_ref, fb3_ref,
                     o_ref, p1_s, p2_s, flat_s):
    bb = x_ref.shape[0]                 # images in this grid step
    x = x_ref[...]                      # (bb, 896) f32, lanes >= 784 are zero

    # ---- conv1 (3x3, 1->6) as ONE im2col MXU matmul ------------------------
    # p1 rows: tap*bb + b ;  p1[tap*bb+b, s] = x[b, s + dy*28 + dx]
    for t in range(9):
        dy, dx = t // 3, t % 3
        off = dy * IMG + dx
        piece = x if off == 0 else pltpu.roll(x, N_LANES - off, 1)
        p1_s[t * bb:(t + 1) * bb, :] = piece
    y1 = jnp.dot(w1m_ref[...], p1_s[...], preferred_element_type=jnp.float32)
    y1 = jnp.maximum(y1 + b1c_ref[...], 0.0)          # (6*bb, 896)

    # ---- exact maxpool(2,2): pooled value lives at lane 2*py*28 + 2*px -----
    m = jnp.maximum(y1, pltpu.roll(y1, N_LANES - 1, 1))
    m = jnp.maximum(m, pltpu.roll(y1, N_LANES - IMG, 1))
    m = jnp.maximum(m, pltpu.roll(y1, N_LANES - IMG - 1, 1))

    # ---- conv2 (3x3, 6->16) as ONE im2col MXU matmul -----------------------
    # p2 rows: tap*(6*bb) + ci*bb + b ; shift on the stride-2 pooled grid.
    cpb = C1 * bb
    for t in range(9):
        dy, dx = t // 3, t % 3
        off = dy * (2 * IMG) + 2 * dx
        piece = m if off == 0 else pltpu.roll(m, N_LANES - off, 1)
        p2_s[t * cpb:(t + 1) * cpb, :] = piece
    y2 = jnp.dot(w2m_ref[...], p2_s[...], preferred_element_type=jnp.float32)
    y2 = jnp.maximum(y2 + b2c_ref[...], 0.0)          # (16*bb, 896)

    # ---- compact valid conv2 lanes into flattened (oy*11+ox) lane order ----
    a2 = jnp.dot(y2, sel_ref[...], preferred_element_type=jnp.float32)  # (16*bb, 128)

    # ---- lane-dense flatten: flat[b, o*128 + k] = a2[o*bb + b, k] ----------
    for o in range(C2):
        flat_s[:, o * CH_LANES:(o + 1) * CH_LANES] = a2[o * bb:(o + 1) * bb, :]
    flat = flat_s[...].astype(jnp.bfloat16)           # (bb, 2048)

    # ---- fused MLP (bf16 weights, f32 accumulation, 128-padded dims) -------
    h = jnp.dot(flat, fw1_ref[...], preferred_element_type=jnp.float32)
    h = jnp.maximum(h + fb1_ref[...], 0.0)
    h = jnp.dot(h.astype(jnp.bfloat16), fw2_ref[...],
                preferred_element_type=jnp.float32)
    h = jnp.maximum(h + fb2_ref[...], 0.0)
    out = jnp.dot(h.astype(jnp.bfloat16), fw3_ref[...],
                  preferred_element_type=jnp.float32)
    o_ref[...] = out + fb3_ref[...]                   # (bb, 128) padded logits


# ----------------------------------------------------------------------------
# Host-side constant construction (pure layout plumbing)
# ----------------------------------------------------------------------------
def _conv_constants(w1, b1, w2, b2, bb):
    eye = jnp.eye(bb, dtype=jnp.float32)
    # W1M[(co*bb+b), (tap*bb+b')] = w1[co, 0, dy, dx] * delta(b, b')
    w1_taps = w1.reshape(C1, 9).astype(jnp.float32)
    w1m = jnp.einsum('ct,ab->catb', w1_taps, eye).reshape(C1 * bb, 9 * bb)
    b1c = jnp.repeat(b1.astype(jnp.float32), bb).reshape(C1 * bb, 1)
    # W2M[(o*bb+b), ((tap*6+ci)*bb+b')] = w2[o, ci, dy, dx] * delta(b, b')
    w2_taps = jnp.transpose(w2, (0, 2, 3, 1)).reshape(C2, 9 * C1).astype(jnp.float32)
    w2m = jnp.einsum('ok,ab->oakb', w2_taps, eye).reshape(C2 * bb, 9 * C1 * bb)
    b2c = jnp.repeat(b2.astype(jnp.float32), bb).reshape(C2 * bb, 1)
    # SEL gathers lane 2*oy*28+2*ox  ->  lane oy*11+ox  (zeros elsewhere).
    oy, ox = jnp.meshgrid(jnp.arange(11), jnp.arange(11), indexing='ij')
    src = (2 * oy * IMG + 2 * ox).reshape(-1)
    dst = (oy * 11 + ox).reshape(-1)
    sel = jnp.zeros((N_LANES, CH_LANES), jnp.float32).at[src, dst].set(1.0)
    return w1m, b1c, w2m, b2c, sel


def _fc_constants(fw1, fb1, fw2, fb2, fw3, fb3):
    h1, h2, nc = fw1.shape[1], fw2.shape[1], fw3.shape[1]
    h1p, h2p, ncp = _round_up(h1, 128), _round_up(h2, 128), _round_up(nc, 128)
    # fc1 rows rearranged to the kernel's (channel-block * 128 + oy*11+ox) order.
    fw1_blocks = fw1.reshape(C2, POOL_OUT, h1)
    fw1p = jnp.zeros((C2, CH_LANES, h1p), jnp.float32)
    fw1p = fw1p.at[:, :POOL_OUT, :h1].set(fw1_blocks).reshape(C2 * CH_LANES, h1p)
    fb1p = jnp.zeros((1, h1p), jnp.float32).at[0, :h1].set(fb1)
    fw2p = jnp.zeros((h1p, h2p), jnp.float32).at[:h1, :h2].set(fw2)
    fb2p = jnp.zeros((1, h2p), jnp.float32).at[0, :h2].set(fb2)
    fw3p = jnp.zeros((h2p, ncp), jnp.float32).at[:h2, :nc].set(fw3)
    fb3p = jnp.zeros((1, ncp), jnp.float32).at[0, :nc].set(fb3)
    return (fw1p.astype(jnp.bfloat16), fb1p, fw2p.astype(jnp.bfloat16), fb2p,
            fw3p.astype(jnp.bfloat16), fb3p)


# ----------------------------------------------------------------------------
# Wrapper
# ----------------------------------------------------------------------------
def neural_net_forward(x, params, block_b=None):
    (w1, b1, w2, b2, fw1, fb1, fw2, fb2, fw3, fb3) = params
    batch = x.shape[0]
    bb = min(batch, 8) if block_b is None else block_b
    bpad = _round_up(batch, bb)
    num_classes = fw3.shape[1]
    ncp = _round_up(num_classes, 128)

    x2 = x.reshape(batch, N_SPATIAL).astype(jnp.float32)
    x2 = jnp.pad(x2, ((0, bpad - batch), (0, N_LANES - N_SPATIAL)))

    w1m, b1c, w2m, b2c, sel = _conv_constants(w1, b1, w2, b2, bb)
    fw1p, fb1p, fw2p, fb2p, fw3p, fb3p = _fc_constants(fw1, fb1, fw2, fb2, fw3, fb3)

    def full(shape):
        return pl.BlockSpec(shape, lambda i: (0,) * len(shape))

    out = pl.pallas_call(
        fused_net_kernel,
        out_shape=jax.ShapeDtypeStruct((bpad, ncp), jnp.float32),
        grid_spec=pltpu.PrefetchScalarGridSpec(
            num_scalar_prefetch=0,
            grid=(bpad // bb,),
            in_specs=[
                pl.BlockSpec((bb, N_LANES), lambda i: (i, 0)),
                full(w1m.shape), full(b1c.shape),
                full(w2m.shape), full(b2c.shape),
                full(sel.shape),
                full(fw1p.shape), full(fb1p.shape),
                full(fw2p.shape), full(fb2p.shape),
                full(fw3p.shape), full(fb3p.shape),
            ],
            out_specs=pl.BlockSpec((bb, ncp), lambda i: (i, 0)),
            scratch_shapes=[
                pltpu.VMEM((9 * bb, N_LANES), jnp.float32),        # conv1 patches
                pltpu.VMEM((9 * C1 * bb, N_LANES), jnp.float32),   # conv2 patches
                pltpu.VMEM((bb, C2 * CH_LANES), jnp.float32),      # flat activation
            ],
        ),
        compiler_params=pltpu.CompilerParams(
            dimension_semantics=("parallel",)),
    )(x2, w1m, b1c, w2m, b2c, sel, fw1p, fb1p, fw2p, fb2p, fw3p, fb3p)

    return out[:batch, :num_classes]


# ----------------------------------------------------------------------------
# Pure-JAX reference (for correctness check)
# ----------------------------------------------------------------------------
def reference_forward(x, params):
    (w1, b1, w2, b2, fw1, fb1, fw2, fb2, fw3, fb3) = params
    dn = ("NCHW", "OIHW", "NCHW")
    y = lax.conv_general_dilated(x, w1, (1, 1), "VALID", dimension_numbers=dn)
    y = jnp.maximum(y + b1[None, :, None, None], 0.0)
    y = lax.reduce_window(y, -jnp.inf, lax.max, (1, 1, 2, 2), (1, 1, 2, 2), "VALID")
    y = lax.conv_general_dilated(y, w2, (1, 1), "VALID", dimension_numbers=dn)
    y = jnp.maximum(y + b2[None, :, None, None], 0.0)
    y = y.reshape(x.shape[0], -1)
    y = jnp.maximum(y @ fw1 + fb1, 0.0)
    y = jnp.maximum(y @ fw2 + fb2, 0.0)
    return y @ fw3 + fb3


if __name__ == "__main__":
    hidden1, hidden2, num_classes = 500, 500, 10
    B = 2

    key = jax.random.PRNGKey(0)
    ks = jax.random.split(key, 11)

    # Deterministic synthetic parameters (conv weights in torch OIHW layout,
    # fc weights stored as (in, out) -- equivalent to torch Linear with W.T).
    w1 = 0.20 * jax.random.normal(ks[0], (6, 1, 3, 3), jnp.float32)
    b1 = 0.10 * jax.random.normal(ks[1], (6,), jnp.float32)
    w2 = 0.08 * jax.random.normal(ks[2], (16, 6, 3, 3), jnp.float32)
    b2 = 0.10 * jax.random.normal(ks[3], (16,), jnp.float32)
    fw1 = 0.02 * jax.random.normal(ks[4], (16 * 11 * 11, hidden1), jnp.float32)
    fb1 = 0.05 * jax.random.normal(ks[5], (hidden1,), jnp.float32)
    fw2 = 0.04 * jax.random.normal(ks[6], (hidden1, hidden2), jnp.float32)
    fb2 = 0.05 * jax.random.normal(ks[7], (hidden2,), jnp.float32)
    fw3 = 0.04 * jax.random.normal(ks[8], (hidden2, num_classes), jnp.float32)
    fb3 = 0.05 * jax.random.normal(ks[9], (num_classes,), jnp.float32)

    # The kernel streams FC weights as bf16; round them once so the f32
    # reference uses the exact same (bf16-representable) parameter values.
    fw1 = fw1.astype(jnp.bfloat16).astype(jnp.float32)
    fw2 = fw2.astype(jnp.bfloat16).astype(jnp.float32)
    fw3 = fw3.astype(jnp.bfloat16).astype(jnp.float32)

    params = (w1, b1, w2, b2, fw1, fb1, fw2, fb2, fw3, fb3)

    # Input: NCHW, single-channel 28x28 (input_size = 784).
    x = jax.random.normal(ks[10], (B, 1, IMG, IMG), jnp.float32)

    fwd = jax.jit(neural_net_forward)
    out = jax.block_until_ready(fwd(x, params))
    ref = jax.block_until_ready(reference_forward(x, params))

    assert out.shape == (B, num_classes)
    max_err = float(jnp.max(jnp.abs(out - ref)))
    assert jnp.allclose(out, ref, atol=2e-2, rtol=2e-2), (
        f"mismatch: max abs err {max_err}")

    print("KERNEL_OK")
</pallas_src>

<mosaic_0001>
module attributes {stable_mosaic.version = 11 : i64} {
  func.func @fused_net_kernel(%arg0: i32, %arg1: memref<2x896xf32, #tpu.memory_space<vmem>>, %arg2: memref<12x18xf32, #tpu.memory_space<vmem>>, %arg3: memref<12x1xf32, #tpu.memory_space<vmem>>, %arg4: memref<32x108xf32, #tpu.memory_space<vmem>>, %arg5: memref<32x1xf32, #tpu.memory_space<vmem>>, %arg6: memref<896x128xf32, #tpu.memory_space<vmem>>, %arg7: memref<2048x512xbf16, #tpu.memory_space<vmem>>, %arg8: memref<1x512xf32, #tpu.memory_space<vmem>>, %arg9: memref<512x512xbf16, #tpu.memory_space<vmem>>, %arg10: memref<1x512xf32, #tpu.memory_space<vmem>>, %arg11: memref<512x128xbf16, #tpu.memory_space<vmem>>, %arg12: memref<1x128xf32, #tpu.memory_space<vmem>>, %arg13: memref<2x128xf32, #tpu.memory_space<vmem>>, %arg14: memref<18x896xf32, #tpu.memory_space<vmem>>, %arg15: memref<108x896xf32, #tpu.memory_space<vmem>>, %arg16: memref<2x2048xf32, #tpu.memory_space<vmem>>) attributes {dimension_semantics = [#tpu.dimension_semantics<parallel>], iteration_bounds = array<i64: 1>, scalar_prefetch = 0 : i64, scratch_operands = 3 : i64, tpu.core_type = #tpu.core_type<tc>, window_params = [{transform_indices = @transform_0, window_bounds = array<i64: 2, 896>}, {pipeline_mode = #tpu.pipeline_mode<synchronous>, transform_indices = @transform_1, window_bounds = array<i64: 12, 18>}, {pipeline_mode = #tpu.pipeline_mode<synchronous>, transform_indices = @transform_2, window_bounds = array<i64: 12, 1>}, {pipeline_mode = #tpu.pipeline_mode<synchronous>, transform_indices = @transform_3, window_bounds = array<i64: 32, 108>}, {pipeline_mode = #tpu.pipeline_mode<synchronous>, transform_indices = @transform_4, window_bounds = array<i64: 32, 1>}, {pipeline_mode = #tpu.pipeline_mode<synchronous>, transform_indices = @transform_5, window_bounds = array<i64: 896, 128>}, {pipeline_mode = #tpu.pipeline_mode<synchronous>, transform_indices = @transform_6, window_bounds = array<i64: 2048, 512>}, {pipeline_mode = #tpu.pipeline_mode<synchronous>, transform_indices = @transform_7, window_bounds = array<i64: 1, 512>}, {pipeline_mode = #tpu.pipeline_mode<synchronous>, transform_indices = @transform_8, window_bounds = array<i64: 512, 512>}, {pipeline_mode = #tpu.pipeline_mode<synchronous>, transform_indices = @transform_9, window_bounds = array<i64: 1, 512>}, {pipeline_mode = #tpu.pipeline_mode<synchronous>, transform_indices = @transform_10, window_bounds = array<i64: 512, 128>}, {pipeline_mode = #tpu.pipeline_mode<synchronous>, transform_indices = @transform_11, window_bounds = array<i64: 1, 128>}, {transform_indices = @transform_12, window_bounds = array<i64: 2, 128>}]} {
    %c0 = arith.constant 0 : index
    %c0_0 = arith.constant 0 : index
    %0 = vector.load %arg1[%c0, %c0_0] : memref<2x896xf32, #tpu.memory_space<vmem>>, vector<2x896xf32>
    %c0_1 = arith.constant 0 : index
    %c0_2 = arith.constant 0 : index
    %1 = vector.load %arg14[%c0_1, %c0_2] : memref<18x896xf32, #tpu.memory_space<vmem>>, vector<2x896xf32>
    tpu.vector_store %arg14[%c0_1, %c0_2], %0 {strides = array<i32>} : memref<18x896xf32, #tpu.memory_space<vmem>>, vector<2x896xf32>,
    %c895_i32 = arith.constant 895 : i32
    %2 = tpu.dynamic_rotate %0 by %c895_i32 dim 1 : vector<2x896xf32>, i32 -> vector<2x896xf32>
    %c2 = arith.constant 2 : index
    %c0_3 = arith.constant 0 : index
    %3 = vector.load %arg14[%c2, %c0_3] : memref<18x896xf32, #tpu.memory_space<vmem>>, vector<2x896xf32>
    tpu.vector_store %arg14[%c2, %c0_3], %2 {strides = array<i32>} : memref<18x896xf32, #tpu.memory_space<vmem>>, vector<2x896xf32>,
    %c894_i32 = arith.constant 894 : i32
    %4 = tpu.dynamic_rotate %0 by %c894_i32 dim 1 : vector<2x896xf32>, i32 -> vector<2x896xf32>
    %c4 = arith.constant 4 : index
    %c0_4 = arith.constant 0 : index
    %5 = vector.load %arg14[%c4, %c0_4] : memref<18x896xf32, #tpu.memory_space<vmem>>, vector<2x896xf32>
    tpu.vector_store %arg14[%c4, %c0_4], %4 {strides = array<i32>} : memref<18x896xf32, #tpu.memory_space<vmem>>, vector<2x896xf32>,
    %c868_i32 = arith.constant 868 : i32
    %6 = tpu.dynamic_rotate %0 by %c868_i32 dim 1 : vector<2x896xf32>, i32 -> vector<2x896xf32>
    %c6 = arith.constant 6 : index
    %c0_5 = arith.constant 0 : index
    %7 = vector.load %arg14[%c6, %c0_5] : memref<18x896xf32, #tpu.memory_space<vmem>>, vector<2x896xf32>
    tpu.vector_store %arg14[%c6, %c0_5], %6 {strides = array<i32>} : memref<18x896xf32, #tpu.memory_space<vmem>>, vector<2x896xf32>,
    %c867_i32 = arith.constant 867 : i32
    %8 = tpu.dynamic_rotate %0 by %c867_i32 dim 1 : vector<2x896xf32>, i32 -> vector<2x896xf32>
    %c8 = arith.constant 8 : index
    %c0_6 = arith.constant 0 : index
    %9 = vector.load %arg14[%c8, %c0_6] : memref<18x896xf32, #tpu.memory_space<vmem>>, vector<2x896xf32>
    tpu.vector_store %arg14[%c8, %c0_6], %8 {strides = array<i32>} : memref<18x896xf32, #tpu.memory_space<vmem>>, vector<2x896xf32>,
    %c866_i32 = arith.constant 866 : i32
    %10 = tpu.dynamic_rotate %0 by %c866_i32 dim 1 : vector<2x896xf32>, i32 -> vector<2x896xf32>
    %c10 = arith.constant 10 : index
    %c0_7 = arith.constant 0 : index
    %11 = vector.load %arg14[%c10, %c0_7] : memref<18x896xf32, #tpu.memory_space<vmem>>, vector<2x896xf32>
    tpu.vector_store %arg14[%c10, %c0_7], %10 {strides = array<i32>} : memref<18x896xf32, #tpu.memory_space<vmem>>, vector<2x896xf32>,
    %c840_i32 = arith.constant 840 : i32
    %12 = tpu.dynamic_rotate %0 by %c840_i32 dim 1 : vector<2x896xf32>, i32 -> vector<2x896xf32>
    %c12 = arith.constant 12 : index
    %c0_8 = arith.constant 0 : index
    %13 = vector.load %arg14[%c12, %c0_8] : memref<18x896xf32, #tpu.memory_space<vmem>>, vector<2x896xf32>
    tpu.vector_store %arg14[%c12, %c0_8], %12 {strides = array<i32>} : memref<18x896xf32, #tpu.memory_space<vmem>>, vector<2x896xf32>,
    %c839_i32 = arith.constant 839 : i32
    %14 = tpu.dynamic_rotate %0 by %c839_i32 dim 1 : vector<2x896xf32>, i32 -> vector<2x896xf32>
    %c14 = arith.constant 14 : index
    %c0_9 = arith.constant 0 : index
    %15 = vector.load %arg14[%c14, %c0_9] : memref<18x896xf32, #tpu.memory_space<vmem>>, vector<2x896xf32>
    tpu.vector_store %arg14[%c14, %c0_9], %14 {strides = array<i32>} : memref<18x896xf32, #tpu.memory_space<vmem>>, vector<2x896xf32>,
    %c838_i32 = arith.constant 838 : i32
    %16 = tpu.dynamic_rotate %0 by %c838_i32 dim 1 : vector<2x896xf32>, i32 -> vector<2x896xf32>
    %c16 = arith.constant 16 : index
    %c0_10 = arith.constant 0 : index
    %17 = vector.load %arg14[%c16, %c0_10] : memref<18x896xf32, #tpu.memory_space<vmem>>, vector<2x896xf32>
    tpu.vector_store %arg14[%c16, %c0_10], %16 {strides = array<i32>} : memref<18x896xf32, #tpu.memory_space<vmem>>, vector<2x896xf32>,
    %c0_11 = arith.constant 0 : index
    %c0_12 = arith.constant 0 : index
    %18 = vector.load %arg2[%c0_11, %c0_12] : memref<12x18xf32, #tpu.memory_space<vmem>>, vector<12x18xf32>
    %c0_13 = arith.constant 0 : index
    %c0_14 = arith.constant 0 : index
    %19 = vector.load %arg14[%c0_13, %c0_14] : memref<18x896xf32, #tpu.memory_space<vmem>>, vector<18x896xf32>
    %cst = arith.constant dense<0.000000e+00> : vector<12x896xf32>
    %20 = tpu.matmul %18, %19, %cst {dimension_numbers = #tpu.dot_dimension_numbers<[1], [0], [0], [1], [0, 0, 1, 1], [], []>} : vector<12x18xf32>, vector<18x896xf32>, vector<12x896xf32> -> vector<12x896xf32>
    %c0_15 = arith.constant 0 : index
    %c0_16 = arith.constant 0 : index
    %21 = vector.load %arg3[%c0_15, %c0_16] : memref<12x1xf32, #tpu.memory_space<vmem>>, vector<12x1xf32>
    %22 = vector.broadcast %21 : vector<12x1xf32> to vector<12x896xf32>
    %23 = arith.addf %20, %22 : vector<12x896xf32>
    %cst_17 = arith.constant 0.000000e+00 : f32
    %24 = vector.broadcast %cst_17 : f32 to vector<12x896xf32>
    %25 = arith.maximumf %23, %24 : vector<12x896xf32>
    %c895_i32_18 = arith.constant 895 : i32
    %26 = tpu.dynamic_rotate %25 by %c895_i32_18 dim 1 : vector<12x896xf32>, i32 -> vector<12x896xf32>
    %27 = arith.maximumf %25, %26 : vector<12x896xf32>
    %c868_i32_19 = arith.constant 868 : i32
    %28 = tpu.dynamic_rotate %25 by %c868_i32_19 dim 1 : vector<12x896xf32>, i32 -> vector<12x896xf32>
    %29 = arith.maximumf %27, %28 : vector<12x896xf32>
    %c867_i32_20 = arith.constant 867 : i32
    %30 = tpu.dynamic_rotate %25 by %c867_i32_20 dim 1 : vector<12x896xf32>, i32 -> vector<12x896xf32>
    %31 = arith.maximumf %29, %30 : vector<12x896xf32>
    %c0_21 = arith.constant 0 : index
    %c0_22 = arith.constant 0 : index
    %32 = vector.load %arg15[%c0_21, %c0_22] : memref<108x896xf32, #tpu.memory_space<vmem>>, vector<12x896xf32>
    tpu.vector_store %arg15[%c0_21, %c0_22], %31 {strides = array<i32>} : memref<108x896xf32, #tpu.memory_space<vmem>>, vector<12x896xf32>,
    %c894_i32_23 = arith.constant 894 : i32
    %33 = tpu.dynamic_rotate %31 by %c894_i32_23 dim 1 : vector<12x896xf32>, i32 -> vector<12x896xf32>
    %c12_24 = arith.constant 12 : index
    %c0_25 = arith.constant 0 : index
    %34 = vector.load %arg15[%c12_24, %c0_25] : memref<108x896xf32, #tpu.memory_space<vmem>>, vector<12x896xf32>
    tpu.vector_store %arg15[%c12_24, %c0_25], %33 {strides = array<i32>} : memref<108x896xf32, #tpu.memory_space<vmem>>, vector<12x896xf32>,
    %c892_i32 = arith.constant 892 : i32
    %35 = tpu.dynamic_rotate %31 by %c892_i32 dim 1 : vector<12x896xf32>, i32 -> vector<12x896xf32>
    %c24 = arith.constant 24 : index
    %c0_26 = arith.constant 0 : index
    %36 = vector.load %arg15[%c24, %c0_26] : memref<108x896xf32, #tpu.memory_space<vmem>>, vector<12x896xf32>
    tpu.vector_store %arg15[%c24, %c0_26], %35 {strides = array<i32>} : memref<108x896xf32, #tpu.memory_space<vmem>>, vector<12x896xf32>,
    %c840_i32_27 = arith.constant 840 : i32
    %37 = tpu.dynamic_rotate %31 by %c840_i32_27 dim 1 : vector<12x896xf32>, i32 -> vector<12x896xf32>
    %c36 = arith.constant 36 : index
    %c0_28 = arith.constant 0 : index
    %38 = vector.load %arg15[%c36, %c0_28] : memref<108x896xf32, #tpu.memory_space<vmem>>, vector<12x896xf32>
    tpu.vector_store %arg15[%c36, %c0_28], %37 {strides = array<i32>} : memref<108x896xf32, #tpu.memory_space<vmem>>, vector<12x896xf32>,
    %c838_i32_29 = arith.constant 838 : i32
    %39 = tpu.dynamic_rotate %31 by %c838_i32_29 dim 1 : vector<12x896xf32>, i32 -> vector<12x896xf32>
    %c48 = arith.constant 48 : index
    %c0_30 = arith.constant 0 : index
    %40 = vector.load %arg15[%c48, %c0_30] : memref<108x896xf32, #tpu.memory_space<vmem>>, vector<12x896xf32>
    tpu.vector_store %arg15[%c48, %c0_30], %39 {strides = array<i32>} : memref<108x896xf32, #tpu.memory_space<vmem>>, vector<12x896xf32>,
    %c836_i32 = arith.constant 836 : i32
    %41 = tpu.dynamic_rotate %31 by %c836_i32 dim 1 : vector<12x896xf32>, i32 -> vector<12x896xf32>
    %c60 = arith.constant 60 : index
    %c0_31 = arith.constant 0 : index
    %42 = vector.load %arg15[%c60, %c0_31] : memref<108x896xf32, #tpu.memory_space<vmem>>, vector<12x896xf32>
    tpu.vector_store %arg15[%c60, %c0_31], %41 {strides = array<i32>} : memref<108x896xf32, #tpu.memory_space<vmem>>, vector<12x896xf32>,
    %c784_i32 = arith.constant 784 : i32
    %43 = tpu.dynamic_rotate %31 by %c784_i32 dim 1 : vector<12x896xf32>, i32 -> vector<12x896xf32>
    %c72 = arith.constant 72 : index
    %c0_32 = arith.constant 0 : index
    %44 = vector.load %arg15[%c72, %c0_32] : memref<108x896xf32, #tpu.memory_space<vmem>>, vector<12x896xf32>
    tpu.vector_store %arg15[%c72, %c0_32], %43 {strides = array<i32>} : memref<108x896xf32, #tpu.memory_space<vmem>>, vector<12x896xf32>,
    %c782_i32 = arith.constant 782 : i32
    %45 = tpu.dynamic_rotate %31 by %c782_i32 dim 1 : vector<12x896xf32>, i32 -> vector<12x896xf32>
    %c84 = arith.constant 84 : index
    %c0_33 = arith.constant 0 : index
    %46 = vector.load %arg15[%c84, %c0_33] : memref<108x896xf32, #tpu.memory_space<vmem>>, vector<12x896xf32>
    tpu.vector_store %arg15[%c84, %c0_33], %45 {strides = array<i32>} : memref<108x896xf32, #tpu.memory_space<vmem>>, vector<12x896xf32>,
    %c780_i32 = arith.constant 780 : i32
    %47 = tpu.dynamic_rotate %31 by %c780_i32 dim 1 : vector<12x896xf32>, i32 -> vector<12x896xf32>
    %c96 = arith.constant 96 : index
    %c0_34 = arith.constant 0 : index
    %48 = vector.load %arg15[%c96, %c0_34] : memref<108x896xf32, #tpu.memory_space<vmem>>, vector<12x896xf32>
    tpu.vector_store %arg15[%c96, %c0_34], %47 {strides = array<i32>} : memref<108x896xf32, #tpu.memory_space<vmem>>, vector<12x896xf32>,
    %c0_35 = arith.constant 0 : index
    %c0_36 = arith.constant 0 : index
    %49 = vector.load %arg4[%c0_35, %c0_36] : memref<32x108xf32, #tpu.memory_space<vmem>>, vector<32x108xf32>
    %c0_37 = arith.constant 0 : index
    %c0_38 = arith.constant 0 : index
    %50 = vector.load %arg15[%c0_37, %c0_38] : memref<108x896xf32, #tpu.memory_space<vmem>>, vector<108x896xf32>
    %cst_39 = arith.constant dense<0.000000e+00> : vector<32x896xf32>
    %51 = tpu.matmul %49, %50, %cst_39 {dimension_numbers = #tpu.dot_dimension_numbers<[1], [0], [0], [1], [0, 0, 1, 1], [], []>} : vector<32x108xf32>, vector<108x896xf32>, vector<32x896xf32> -> vector<32x896xf32>
    %c0_40 = arith.constant 0 : index
    %c0_41 = arith.constant 0 : index
    %52 = vector.load %arg5[%c0_40, %c0_41] : memref<32x1xf32, #tpu.memory_space<vmem>>, vector<32x1xf32>
    %53 = vector.broadcast %52 : vector<32x1xf32> to vector<32x896xf32>
    %54 = arith.addf %51, %53 : vector<32x896xf32>
    %cst_42 = arith.constant 0.000000e+00 : f32
    %55 = vector.broadcast %cst_42 : f32 to vector<32x896xf32>
    %56 = arith.maximumf %54, %55 : vector<32x896xf32>
    %c0_43 = arith.constant 0 : index
    %c0_44 = arith.constant 0 : index
    %57 = vector.load %arg6[%c0_43, %c0_44] : memref<896x128xf32, #tpu.memory_space<vmem>>, vector<896x128xf32>
    %cst_45 = arith.constant dense<0.000000e+00> : vector<32x128xf32>
    %58 = tpu.matmul %56, %57, %cst_45 {dimension_numbers = #tpu.dot_dimension_numbers<[1], [0], [0], [1], [0, 0, 1, 1], [], []>} : vector<32x896xf32>, vector<896x128xf32>, vector<32x128xf32> -> vector<32x128xf32>
    %59 = vector.extract_strided_slice %58 {offsets = [0, 0], sizes = [2, 128], strides = [1, 1]} : vector<32x128xf32> to vector<2x128xf32>
    %c0_46 = arith.constant 0 : index
    %c0_47 = arith.constant 0 : index
    %60 = vector.load %arg16[%c0_46, %c0_47] : memref<2x2048xf32, #tpu.memory_space<vmem>>, vector<2x128xf32>
    tpu.vector_store %arg16[%c0_46, %c0_47], %59 {strides = array<i32>} : memref<2x2048xf32, #tpu.memory_space<vmem>>, vector<2x128xf32>,
    %61 = vector.extract_strided_slice %58 {offsets = [2, 0], sizes = [2, 128], strides = [1, 1]} : vector<32x128xf32> to vector<2x128xf32>
    %c0_48 = arith.constant 0 : index
    %c128 = arith.constant 128 : index
    %62 = vector.load %arg16[%c0_48, %c128] : memref<2x2048xf32, #tpu.memory_space<vmem>>, vector<2x128xf32>
    tpu.vector_store %arg16[%c0_48, %c128], %61 {strides = array<i32>} : memref<2x2048xf32, #tpu.memory_space<vmem>>, vector<2x128xf32>,
    %63 = vector.extract_strided_slice %58 {offsets = [4, 0], sizes = [2, 128], strides = [1, 1]} : vector<32x128xf32> to vector<2x128xf32>
    %c0_49 = arith.constant 0 : index
    %c256 = arith.constant 256 : index
    %64 = vector.load %arg16[%c0_49, %c256] : memref<2x2048xf32, #tpu.memory_space<vmem>>, vector<2x128xf32>
    tpu.vector_store %arg16[%c0_49, %c256], %63 {strides = array<i32>} : memref<2x2048xf32, #tpu.memory_space<vmem>>, vector<2x128xf32>,
    %65 = vector.extract_strided_slice %58 {offsets = [6, 0], sizes = [2, 128], strides = [1, 1]} : vector<32x128xf32> to vector<2x128xf32>
    %c0_50 = arith.constant 0 : index
    %c384 = arith.constant 384 : index
    %66 = vector.load %arg16[%c0_50, %c384] : memref<2x2048xf32, #tpu.memory_space<vmem>>, vector<2x128xf32>
    tpu.vector_store %arg16[%c0_50, %c384], %65 {strides = array<i32>} : memref<2x2048xf32, #tpu.memory_space<vmem>>, vector<2x128xf32>,
    %67 = vector.extract_strided_slice %58 {offsets = [8, 0], sizes = [2, 128], strides = [1, 1]} : vector<32x128xf32> to vector<2x128xf32>
    %c0_51 = arith.constant 0 : index
    %c512 = arith.constant 512 : index
    %68 = vector.load %arg16[%c0_51, %c512] : memref<2x2048xf32, #tpu.memory_space<vmem>>, vector<2x128xf32>
    tpu.vector_store %arg16[%c0_51, %c512], %67 {strides = array<i32>} : memref<2x2048xf32, #tpu.memory_space<vmem>>, vector<2x128xf32>,
    %69 = vector.extract_strided_slice %58 {offsets = [10, 0], sizes = [2, 128], strides = [1, 1]} : vector<32x128xf32> to vector<2x128xf32>
    %c0_52 = arith.constant 0 : index
    %c640 = arith.constant 640 : index
    %70 = vector.load %arg16[%c0_52, %c640] : memref<2x2048xf32, #tpu.memory_space<vmem>>, vector<2x128xf32>
    tpu.vector_store %arg16[%c0_52, %c640], %69 {strides = array<i32>} : memref<2x2048xf32, #tpu.memory_space<vmem>>, vector<2x128xf32>,
    %71 = vector.extract_strided_slice %58 {offsets = [12, 0], sizes = [2, 128], strides = [1, 1]} : vector<32x128xf32> to vector<2x128xf32>
    %c0_53 = arith.constant 0 : index
    %c768 = arith.constant 768 : index
    %72 = vector.load %arg16[%c0_53, %c768] : memref<2x2048xf32, #tpu.memory_space<vmem>>, vector<2x128xf32>
    tpu.vector_store %arg16[%c0_53, %c768], %71 {strides = array<i32>} : memref<2x2048xf32, #tpu.memory_space<vmem>>, vector<2x128xf32>,
    %73 = vector.extract_strided_slice %58 {offsets = [14, 0], sizes = [2, 128], strides = [1, 1]} : vector<32x128xf32> to vector<2x128xf32>
    %c0_54 = arith.constant 0 : index
    %c896 = arith.constant 896 : index
    %74 = vector.load %arg16[%c0_54, %c896] : memref<2x2048xf32, #tpu.memory_space<vmem>>, vector<2x128xf32>
    tpu.vector_store %arg16[%c0_54, %c896], %73 {strides = array<i32>} : memref<2x2048xf32, #tpu.memory_space<vmem>>, vector<2x128xf32>,
    %75 = vector.extract_strided_slice %58 {offsets = [16, 0], sizes = [2, 128], strides = [1, 1]} : vector<32x128xf32> to vector<2x128xf32>
    %c0_55 = arith.constant 0 : index
    %c1024 = arith.constant 1024 : index
    %76 = vector.load %arg16[%c0_55, %c1024] : memref<2x2048xf32, #tpu.memory_space<vmem>>, vector<2x128xf32>
    tpu.vector_store %arg16[%c0_55, %c1024], %75 {strides = array<i32>} : memref<2x2048xf32, #tpu.memory_space<vmem>>, vector<2x128xf32>,
    %77 = vector.extract_strided_slice %58 {offsets = [18, 0], sizes = [2, 128], strides = [1, 1]} : vector<32x128xf32> to vector<2x128xf32>
    %c0_56 = arith.constant 0 : index
    %c1152 = arith.constant 1152 : index
    %78 = vector.load %arg16[%c0_56, %c1152] : memref<2x2048xf32, #tpu.memory_space<vmem>>, vector<2x128xf32>
    tpu.vector_store %arg16[%c0_56, %c1152], %77 {strides = array<i32>} : memref<2x2048xf32, #tpu.memory_space<vmem>>, vector<2x128xf32>,
    %79 = vector.extract_strided_slice %58 {offsets = [20, 0], sizes = [2, 128], strides = [1, 1]} : vector<32x128xf32> to vector<2x128xf32>
    %c0_57 = arith.constant 0 : index
    %c1280 = arith.constant 1280 : index
    %80 = vector.load %arg16[%c0_57, %c1280] : memref<2x2048xf32, #tpu.memory_space<vmem>>, vector<2x128xf32>
    tpu.vector_store %arg16[%c0_57, %c1280], %79 {strides = array<i32>} : memref<2x2048xf32, #tpu.memory_space<vmem>>, vector<2x128xf32>,
    %81 = vector.extract_strided_slice %58 {offsets = [22, 0], sizes = [2, 128], strides = [1, 1]} : vector<32x128xf32> to vector<2x128xf32>
    %c0_58 = arith.constant 0 : index
    %c1408 = arith.constant 1408 : index
    %82 = vector.load %arg16[%c0_58, %c1408] : memref<2x2048xf32, #tpu.memory_space<vmem>>, vector<2x128xf32>
    tpu.vector_store %arg16[%c0_58, %c1408], %81 {strides = array<i32>} : memref<2x2048xf32, #tpu.memory_space<vmem>>, vector<2x128xf32>,
    %83 = vector.extract_strided_slice %58 {offsets = [24, 0], sizes = [2, 128], strides = [1, 1]} : vector<32x128xf32> to vector<2x128xf32>
    %c0_59 = arith.constant 0 : index
    %c1536 = arith.constant 1536 : index
    %84 = vector.load %arg16[%c0_59, %c1536] : memref<2x2048xf32, #tpu.memory_space<vmem>>, vector<2x128xf32>
    tpu.vector_store %arg16[%c0_59, %c1536], %83 {strides = array<i32>} : memref<2x2048xf32, #tpu.memory_space<vmem>>, vector<2x128xf32>,
    %85 = vector.extract_strided_slice %58 {offsets = [26, 0], sizes = [2, 128], strides = [1, 1]} : vector<32x128xf32> to vector<2x128xf32>
    %c0_60 = arith.constant 0 : index
    %c1664 = arith.constant 1664 : index
    %86 = vector.load %arg16[%c0_60, %c1664] : memref<2x2048xf32, #tpu.memory_space<vmem>>, vector<2x128xf32>
    tpu.vector_store %arg16[%c0_60, %c1664], %85 {strides = array<i32>} : memref<2x2048xf32, #tpu.memory_space<vmem>>, vector<2x128xf32>,
    %87 = vector.extract_strided_slice %58 {offsets = [28, 0], sizes = [2, 128], strides = [1, 1]} : vector<32x128xf32> to vector<2x128xf32>
    %c0_61 = arith.constant 0 : index
    %c1792 = arith.constant 1792 : index
    %88 = vector.load %arg16[%c0_61, %c1792] : memref<2x2048xf32, #tpu.memory_space<vmem>>, vector<2x128xf32>
    tpu.vector_store %arg16[%c0_61, %c1792], %87 {strides = array<i32>} : memref<2x2048xf32, #tpu.memory_space<vmem>>, vector<2x128xf32>,
    %89 = vector.extract_strided_slice %58 {offsets = [30, 0], sizes = [2, 128], strides = [1, 1]} : vector<32x128xf32> to vector<2x128xf32>
    %c0_62 = arith.constant 0 : index
    %c1920 = arith.constant 1920 : index
    %90 = vector.load %arg16[%c0_62, %c1920] : memref<2x2048xf32, #tpu.memory_space<vmem>>, vector<2x128xf32>
    tpu.vector_store %arg16[%c0_62, %c1920], %89 {strides = array<i32>} : memref<2x2048xf32, #tpu.memory_space<vmem>>, vector<2x128xf32>,
    %c0_63 = arith.constant 0 : index
    %c0_64 = arith.constant 0 : index
    %91 = vector.load %arg16[%c0_63, %c0_64] : memref<2x2048xf32, #tpu.memory_space<vmem>>, vector<2x2048xf32>
    %92 = arith.truncf %91 : vector<2x2048xf32> to vector<2x2048xbf16>
    %c0_65 = arith.constant 0 : index
    %c0_66 = arith.constant 0 : index
    %93 = vector.load %arg7[%c0_65, %c0_66] : memref<2048x512xbf16, #tpu.memory_space<vmem>>, vector<2048x512xbf16>
    %cst_67 = arith.constant dense<0.000000e+00> : vector<2x512xf32>
    %94 = tpu.matmul %92, %93, %cst_67 {dimension_numbers = #tpu.dot_dimension_numbers<[1], [0], [0], [1], [0, 0, 1, 1], [], []>} : vector<2x2048xbf16>, vector<2048x512xbf16>, vector<2x512xf32> -> vector<2x512xf32>
    %c0_68 = arith.constant 0 : index
    %c0_69 = arith.constant 0 : index
    %95 = vector.load %arg8[%c0_68, %c0_69] : memref<1x512xf32, #tpu.memory_space<vmem>>, vector<1x512xf32>
    %96 = vector.broadcast %95 : vector<1x512xf32> to vector<2x512xf32>
    %97 = arith.addf %94, %96 : vector<2x512xf32>
    %cst_70 = arith.constant 0.000000e+00 : f32
    %98 = vector.broadcast %cst_70 : f32 to vector<2x512xf32>
    %99 = arith.maximumf %97, %98 : vector<2x512xf32>
    %100 = arith.truncf %99 : vector<2x512xf32> to vector<2x512xbf16>
    %c0_71 = arith.constant 0 : index
    %c0_72 = arith.constant 0 : index
    %101 = vector.load %arg9[%c0_71, %c0_72] : memref<512x512xbf16, #tpu.memory_space<vmem>>, vector<512x512xbf16>
    %cst_73 = arith.constant dense<0.000000e+00> : vector<2x512xf32>
    %102 = tpu.matmul %100, %101, %cst_73 {dimension_numbers = #tpu.dot_dimension_numbers<[1], [0], [0], [1], [0, 0, 1, 1], [], []>} : vector<2x512xbf16>, vector<512x512xbf16>, vector<2x512xf32> -> vector<2x512xf32>
    %c0_74 = arith.constant 0 : index
    %c0_75 = arith.constant 0 : index
    %103 = vector.load %arg10[%c0_74, %c0_75] : memref<1x512xf32, #tpu.memory_space<vmem>>, vector<1x512xf32>
    %104 = vector.broadcast %103 : vector<1x512xf32> to vector<2x512xf32>
    %105 = arith.addf %102, %104 : vector<2x512xf32>
    %cst_76 = arith.constant 0.000000e+00 : f32
    %106 = vector.broadcast %cst_76 : f32 to vector<2x512xf32>
    %107 = arith.maximumf %105, %106 : vector<2x512xf32>
    %108 = arith.truncf %107 : vector<2x512xf32> to vector<2x512xbf16>
    %c0_77 = arith.constant 0 : index
    %c0_78 = arith.constant 0 : index
    %109 = vector.load %arg11[%c0_77, %c0_78] : memref<512x128xbf16, #tpu.memory_space<vmem>>, vector<512x128xbf16>
    %cst_79 = arith.constant dense<0.000000e+00> : vector<2x128xf32>
    %110 = tpu.matmul %108, %109, %cst_79 {dimension_numbers = #tpu.dot_dimension_numbers<[1], [0], [0], [1], [0, 0, 1, 1], [], []>} : vector<2x512xbf16>, vector<512x128xbf16>, vector<2x128xf32> -> vector<2x128xf32>
    %c0_80 = arith.constant 0 : index
    %c0_81 = arith.constant 0 : index
    %111 = vector.load %arg12[%c0_80, %c0_81] : memref<1x128xf32, #tpu.memory_space<vmem>>, vector<1x128xf32>
    %112 = vector.broadcast %111 : vector<1x128xf32> to vector<2x128xf32>
    %113 = arith.addf %110, %112 : vector<2x128xf32>
    %c0_82 = arith.constant 0 : index
    %c0_83 = arith.constant 0 : index
    %114 = vector.load %arg13[%c0_82, %c0_83] : memref<2x128xf32, #tpu.memory_space<vmem>>, vector<2x128xf32>
    tpu.vector_store %arg13[%c0_82, %c0_83], %113 {strides = array<i32>} : memref<2x128xf32, #tpu.memory_space<vmem>>, vector<2x128xf32>,
    return
  }
  func.func @transform_0(%arg0: i32) -> (i32, i32) {
    %c0_i32 = arith.constant 0 : i32
    %c0_i32_0 = arith.constant 0 : i32
    return %arg0, %c0_i32 : i32, i32
  }
  func.func @transform_1(%arg0: i32) -> (i32, i32) {
    %c0_i32 = arith.constant 0 : i32
    %c0_i32_0 = arith.constant 0 : i32
    %c0_i32_1 = arith.constant 0 : i32
    return %c0_i32, %c0_i32_0 : i32, i32
  }
  func.func @transform_2(%arg0: i32) -> (i32, i32) {
    %c0_i32 = arith.constant 0 : i32
    %c0_i32_0 = arith.constant 0 : i32
    %c0_i32_1 = arith.constant 0 : i32
    return %c0_i32, %c0_i32_0 : i32, i32
  }
  func.func @transform_3(%arg0: i32) -> (i32, i32) {
    %c0_i32 = arith.constant 0 : i32
    %c0_i32_0 = arith.constant 0 : i32
    %c0_i32_1 = arith.constant 0 : i32
    return %c0_i32, %c0_i32_0 : i32, i32
  }
  func.func @transform_4(%arg0: i32) -> (i32, i32) {
    %c0_i32 = arith.constant 0 : i32
    %c0_i32_0 = arith.constant 0 : i32
    %c0_i32_1 = arith.constant 0 : i32
    return %c0_i32, %c0_i32_0 : i32, i32
  }
  func.func @transform_5(%arg0: i32) -> (i32, i32) {
    %c0_i32 = arith.constant 0 : i32
    %c0_i32_0 = arith.constant 0 : i32
    %c0_i32_1 = arith.constant 0 : i32
    return %c0_i32, %c0_i32_0 : i32, i32
  }
  func.func @transform_6(%arg0: i32) -> (i32, i32) {
    %c0_i32 = arith.constant 0 : i32
    %c0_i32_0 = arith.constant 0 : i32
    %c0_i32_1 = arith.constant 0 : i32
    return %c0_i32, %c0_i32_0 : i32, i32
  }
  func.func @transform_7(%arg0: i32) -> (i32, i32) {
    %c0_i32 = arith.constant 0 : i32
    %c0_i32_0 = arith.constant 0 : i32
    %c0_i32_1 = arith.constant 0 : i32
    return %c0_i32, %c0_i32_0 : i32, i32
  }
  func.func @transform_8(%arg0: i32) -> (i32, i32) {
    %c0_i32 = arith.constant 0 : i32
    %c0_i32_0 = arith.constant 0 : i32
    %c0_i32_1 = arith.constant 0 : i32
    return %c0_i32, %c0_i32_0 : i32, i32
  }
  func.func @transform_9(%arg0: i32) -> (i32, i32) {
    %c0_i32 = arith.constant 0 : i32
    %c0_i32_0 = arith.constant 0 : i32
    %c0_i32_1 = arith.constant 0 : i32
    return %c0_i32, %c0_i32_0 : i32, i32
  }
  func.func @transform_10(%arg0: i32) -> (i32, i32) {
    %c0_i32 = arith.constant 0 : i32
    %c0_i32_0 = arith.constant 0 : i32
    %c0_i32_1 = arith.constant 0 : i32
    return %c0_i32, %c0_i32_0 : i32, i32
  }
  func.func @transform_11(%arg0: i32) -> (i32, i32) {
    %c0_i32 = arith.constant 0 : i32
    %c0_i32_0 = arith.constant 0 : i32
    %c0_i32_1 = arith.constant 0 : i32
    return %c0_i32, %c0_i32_0 : i32, i32
  }
  func.func @transform_12(%arg0: i32) -> (i32, i32) {
    %c0_i32 = arith.constant 0 : i32
    %c0_i32_0 = arith.constant 0 : i32
    return %arg0, %c0_i32 : i32, i32
  }
}

</mosaic_0001>

<bundles_post_ra>
// kernel: neural_net_forward.1
= control target key start
LH: loop header
LB: loop body
LE: loop exit
PB: predicated region body
PF: predicated region fallthrough
CT: control target
= control target key end

     0   :  { %v51_v1 = vlaneseq  ;;  %v10006_v3 = vmov 1983009808   ;;  %s10008_s25 = smov 98   ;;  %s10009_s26 = smov 71   ;;  %v14419_v16 = vmov 0.0   ;;  %v10016_v21 = vmov 0   ;;  %s14406_s0 = inlined_call_operand.vmem [shape: f32[2,896], index: 0, kind: input, shape index: {}]   ;;  %s14407_s1 = inlined_call_operand.vmem [shape: f32[12,18], index: 1, kind: input, shape index: {}]   ;;  %s14408_s2 = inlined_call_operand.vmem [shape: f32[12,1], index: 2, kind: input, shape index: {}]   ;;  %s14409_s3 = inlined_call_operand.vmem [shape: f32[32,108], index: 3, kind: input, shape index: {}]   ;;  %s14410_s4 = inlined_call_operand.vmem [shape: f32[32,1], index: 4, kind: input, shape index: {}]   ;;  %s14411_s5 = inlined_call_operand.vmem [shape: f32[896,128], index: 5, kind: input, shape index: {}]   ;;  %s14412_s6 = inlined_call_operand.vmem [shape: bf16[2048,512], index: 6, kind: input, shape index: {}]   ;;  %s14413_s7 = inlined_call_operand.vmem [shape: f32[1,512], index: 7, kind: input, shape index: {}]   ;;  %s14414_s8 = inlined_call_operand.vmem [shape: bf16[512,512], index: 8, kind: input, shape index: {}]   ;;  %s14415_s9 = inlined_call_operand.vmem [shape: f32[1,512], index: 9, kind: input, shape index: {}]   ;;  %s14416_s10 = inlined_call_operand.vmem [shape: bf16[512,128], index: 10, kind: input, shape index: {}]   ;;  %s14417_s11 = inlined_call_operand.vmem [shape: f32[1,128], index: 11, kind: input, shape index: {}]   ;;  %s14418_s12 = inlined_call_operand.hbm [shape: f32[2,128], index: 12, kind: output, shape index: {}]  }
   0x1   :  { %v43_v0 = vld [vmem:[%s14406_s0] sm:$0xff]  ;;  %v49_v4 = vunpack.c.l.s4 %v10006_v3  ;;  %v44_v5 = vld [vmem:[%s14406_s0 + $0x8] sm:$0x3f]  ;;  %s10007_s0 = smov 72   ;;  %s10010_s27 = smov 70   ;;  %582 = vmatprep.mubr.f32.mxu0 %v14419_v16  ;;  %659 = vmatprep.mubr.f32.mxu1 %v14419_v16  ;;  %vm496_vm4 = vcmask 1041408  }
   0x2   :  { %v47_v2 = vcombine.high %v43_v0, %v43_v0  ;;  %7948 = vst.sshfl [vmem:[#allocation2] sm:$0x3 pattern:$0x76325410] %v43_v0  ;;  %v10095_v6 = vshrl.u32 %v51_v1, 7  ;;  %v10097_v7 = vcombine.high %v44_v5, %v44_v5  ;;  %s10011_s28 = smov 127   ;;  %8985 = vset.pattern.permute.xlu1 %v10016_v21  ;;  %8984 = vset.pattern.permute.xlu0 %v10016_v21 }
   0x3   :  { %7950 = vst.sshfl [vmem:[#allocation2 + $0x20] sm:$0x3 pattern:$0x76325410] %v44_v5  ;;  %v50_v8 = vunpack.c.0.s8 %v49_v4  ;;  %s10012_s29 = smov 126   ;;  %s10013_s30 = smov 100  }
   0x4   :  { %14447 = vst [vmem:[#allocation8_spill] sm:$0xff] %v10095_v6  ;;  %7949 = vst.sshfl [vmem:[#allocation2 + $0x10] sm:$0x3 pattern:$0x76325410] %v47_v2  ;;  %s10014_s13 = smov 99  }
   0x5   :  { %7951 = vst.sshfl [vmem:[#allocation2 + $0x30] sm:$0x3 pattern:$0x76325410] %v10097_v7  ;;  %v10101_v9 = vsub.s32 %v50_v8, %v10095_v6  ;;  %v10178_v18 = vand.u32 127, %v51_v1  ;;  %v477_v19 = vld [vmem:[%s14408_s2] sm:$0xff] }
   0x6   :  { %v478_v20 = vld [vmem:[%s14408_s2 + $0x8] sm:$0xf]  ;;  %vm489_vm9 = vcmask 146432  }
   0x7   :  { %14448 = vst [vmem:[#allocation9_spill] sm:$0xff] %v10101_v9  ;;  %v54_v10 = vrot.slane %v43_v0, %v10101_v9  ;;  %v61_v11 = vrot.slane %v47_v2, %v10101_v9  ;;  %v71_v12 = vrot.slane %v44_v5, %v10101_v9  ;;  %v78_v17 = vrot.slane %v10097_v7, %v10101_v9 }
   0x8   :  { %vm289_vm0 = vcmp.lt.s32.totalorder %v10178_v18, 98  ;;  %vm339_vm1 = vcmp.lt.s32.totalorder %v10178_v18, 72  ;;  %vm389_vm2 = vcmp.lt.s32.totalorder %v10178_v18, 71  ;;  %vm439_vm3 = vcmp.lt.s32.totalorder %v10178_v18, 70 }
   0x9   :  { %329 = vrot.lane.b32.xlu1 %v61_v11, %s10007_s0  ;;  %279 = vrot.lane.b32.xlu0 %v61_v11, %s10008_s25  ;;  %v62_v13 = vcombine.high %v54_v10, %v54_v10  ;;  %v63_v14 = vcombine.high %v61_v11, %v61_v11  ;;  %v10108_v15 = vcombine.high %v71_v12, %v71_v12  ;;  %vm110_vm5 = vcmp.lt.s32.totalorder %v10178_v18, 127 }
   0xa   :  { %vm160_vm6 = vcmp.lt.s32.totalorder %v10178_v18, 126  ;;  %vm210_vm7 = vcmp.lt.s32.totalorder %v10178_v18, 100  ;;  %vm260_vm8 = vcmp.lt.s32.totalorder %v10178_v18, 99 }
   0xb   :  { %88 = vst [vmem:[#allocation2 + $0x8] sm:$0x3] %v62_v13  ;;  %90 = vst [vmem:[#allocation2 + $0x18] sm:$0x3] %v63_v14 }
   0xc   :  { %92 = vst [vmem:[#allocation2 + $0x28] sm:$0x3] %v10108_v15 }
   0xd   :  { %379 = vrot.lane.b32.xlu1 %v61_v11, %s10009_s26  ;;  %277 = vrot.lane.b32.xlu0 %v62_v13, %s10008_s25 }
  0x11   :  { %327 = vrot.lane.b32.xlu1 %v62_v13, %s10007_s0  ;;  %377 = vrot.lane.b32.xlu0 %v62_v13, %s10009_s26 }
  0x15   :  { %429 = vrot.lane.b32.xlu1 %v61_v11, %s10010_s27  ;;  %427 = vrot.lane.b32.xlu0 %v62_v13, %s10010_s27 }
  0x19   :  { %325 = vrot.lane.b32.xlu1 %v54_v10, %s10007_s0  ;;  %275 = vrot.lane.b32.xlu0 %v54_v10, %s10008_s25 }
  0x1d   :  { %425 = vrot.lane.b32.xlu1 %v54_v10, %s10010_s27  ;;  %375 = vrot.lane.b32.xlu0 %v54_v10, %s10009_s26 }
  0x21   :  { %98 = vrot.lane.b32.xlu1 %v61_v11, %s10011_s28  ;;  %96 = vrot.lane.b32.xlu0 %v62_v13, %s10011_s28 }
  0x25   :  { %150 = vrot.lane.b32.xlu1 %v61_v11, %s10012_s29  ;;  %148 = vrot.lane.b32.xlu0 %v62_v13, %s10012_s29 }
  0x29   :  { %200 = vrot.lane.b32.xlu1 %v61_v11, %s10013_s30  ;;  %198 = vrot.lane.b32.xlu0 %v62_v13, %s10013_s30 }
  0x2d   :  { %250 = vrot.lane.b32.xlu1 %v61_v11, %s10014_s13  ;;  %248 = vrot.lane.b32.xlu0 %v62_v13, %s10014_s13 }
  0x31   :  { %146 = vrot.lane.b32.xlu1 %v54_v10, %s10012_s29  ;;  %94 = vrot.lane.b32.xlu0 %v54_v10, %s10011_s28 }
  0x35   :  { %246 = vrot.lane.b32.xlu1 %v54_v10, %s10014_s13  ;;  %196 = vrot.lane.b32.xlu0 %v54_v10, %s10013_s30 }
  0x39   :  { %283 = vrot.lane.b32.xlu1 %v71_v12, %s10008_s25  ;;  %281 = vrot.lane.b32.xlu0 %v63_v14, %s10008_s25 }
  0x3d   :  { %333 = vrot.lane.b32.xlu1 %v71_v12, %s10007_s0  ;;  %331 = vrot.lane.b32.xlu0 %v63_v14, %s10007_s0 }
  0x41   :  { %383 = vrot.lane.b32.xlu1 %v71_v12, %s10009_s26  ;;  %381 = vrot.lane.b32.xlu0 %v63_v14, %s10009_s26 }
  0x45   :  { %433 = vrot.lane.b32.xlu1 %v71_v12, %s10010_s27  ;;  %431 = vrot.lane.b32.xlu0 %v63_v14, %s10010_s27 }
  0x49   :  { %102 = vrot.lane.b32.xlu1 %v71_v12, %s10011_s28  ;;  %100 = vrot.lane.b32.xlu0 %v63_v14, %s10011_s28 }
  0x4d   :  { %154 = vrot.lane.b32.xlu1 %v71_v12, %s10012_s29  ;;  %152 = vrot.lane.b32.xlu0 %v63_v14, %s10012_s29 }
  0x51   :  { %204 = vrot.lane.b32.xlu1 %v71_v12, %s10013_s30  ;;  %202 = vrot.lane.b32.xlu0 %v63_v14, %s10013_s30 }
  0x55   :  { %254 = vrot.lane.b32.xlu1 %v71_v12, %s10014_s13  ;;  %252 = vrot.lane.b32.xlu0 %v63_v14, %s10014_s13 }
  0x59   :  { %287 = vrot.lane.b32.xlu1 %v78_v17, %s10008_s25  ;;  %285 = vrot.lane.b32.xlu0 %v10108_v15, %s10008_s25 }
  0x5d   :  { %337 = vrot.lane.b32.xlu1 %v78_v17, %s10007_s0  ;;  %335 = vrot.lane.b32.xlu0 %v10108_v15, %s10007_s0 }
  0x61   :  { %387 = vrot.lane.b32.xlu1 %v78_v17, %s10009_s26  ;;  %385 = vrot.lane.b32.xlu0 %v10108_v15, %s10009_s26 }
  0x65   :  { %437 = vrot.lane.b32.xlu1 %v78_v17, %s10010_s27  ;;  %435 = vrot.lane.b32.xlu0 %v10108_v15, %s10010_s27 }
  0x69   :  { %106 = vrot.lane.b32.xlu1 %v78_v17, %s10011_s28  ;;  %104 = vrot.lane.b32.xlu0 %v10108_v15, %s10011_s28 }
  0x6d   :  { %158 = vrot.lane.b32.xlu1 %v78_v17, %s10012_s29  ;;  %156 = vrot.lane.b32.xlu0 %v10108_v15, %s10012_s29 }
  0x71   :  { %208 = vrot.lane.b32.xlu1 %v78_v17, %s10013_s30  ;;  %206 = vrot.lane.b32.xlu0 %v10108_v15, %s10013_s30 }
  0x75   :  { %258 = vrot.lane.b32.xlu1 %v78_v17, %s10014_s13  ;;  %256 = vrot.lane.b32.xlu0 %v10108_v15, %s10014_s13 }
  0x79   :  { %481 = vperm.xlu1 %8985, %v477_v19   ;;  %486 = vperm.xlu0 %8984, %v478_v20  }
  0x7b   :  { %v10186_v22 = vpop.permute.xlu1 %329  ;;  %v10188_v23 = vpop.permute.xlu0 %279 }
  0x7f   :  { %v10191_v24 = vpop.permute.xlu1 %379  ;;  %v278_v25 = vpop.permute.xlu0 %277 }
  0x80   :  { %v294_v26 = vsel %vm289_vm0, %v278_v25, %v10188_v23 }
  0x81   :  { %v305_v27 = vrot.slane %v294_v26, 6 }
  0x83   :  { %319 = vst [vmem:[#allocation2 + $0x40] sm:$0xc] %v305_v27  ;;  %v328_v28 = vpop.permute.xlu1 %327  ;;  %v378_v29 = vpop.permute.xlu0 %377 }
  0x84   :  { %v344_v30 = vsel %vm339_vm1, %v328_v28, %v10186_v22  ;;  %v394_v31 = vsel %vm389_vm2, %v378_v29, %v10191_v24 }
  0x85   :  { %v355_v32 = vrot.slane %v344_v30, 4  ;;  %v405_v33 = vrot.slane %v394_v31, 2 }
  0x87   :  { %369 = vst [vmem:[#allocation2 + $0x40] sm:$0x30] %v355_v32  ;;  %419 = vst [vmem:[#allocation2 + $0x40] sm:$0xc0] %v405_v33  ;;  %v10205_v34 = vpop.permute.xlu1 %429  ;;  %v428_v35 = vpop.permute.xlu0 %427 }
  0x88   :  { %v444_v36 = vsel %vm439_vm3, %v428_v35, %v10205_v34 }
  0x89   :  { %448 = vst [vmem:[#allocation2 + $0x78] sm:$0x3] %v444_v36 }
  0x8b   :  { %v10210_v37 = vpop.permute.xlu1 %325  ;;  %v10212_v38 = vpop.permute.xlu0 %275 }
  0x8c   :  { %v345_v39 = vsel %vm339_vm1, %v10210_v37, %v328_v28  ;;  %v295_v40 = vsel %vm289_vm0, %v10212_v38, %v278_v25 }
  0x8d   :  { %v354_v41 = vrot.slane %v345_v39, 4  ;;  %v304_v42 = vrot.slane %v295_v40, 6  ;;  %v10302_v40 = vld [vmem:[%s14407_s1 + $0x8] sm:$0xf] }
  0x8f   :  { %368 = vst [vmem:[#allocation2 + $0x38] sm:$0x30] %v354_v41  ;;  %318 = vst [vmem:[#allocation2 + $0x38] sm:$0xc] %v304_v42  ;;  %v10220_v43 = vpop.permute.xlu1 %425  ;;  %v10222_v44 = vpop.permute.xlu0 %375 }
  0x90   :  { %v445_v45 = vsel %vm439_vm3, %v10220_v43, %v428_v35  ;;  %v395_v46 = vsel %vm389_vm2, %v10222_v44, %v378_v29  ;;  %v471_v47 = vld [vmem:[#allocation2 + $0x78] sm:$0x3]  ;;  %v10289_v29 = vld [vmem:[%s14407_s1] sm:$0xff] }
  0x91   :  { %447 = vst [vmem:[#allocation2 + $0x70] sm:$0x3] %v445_v45  ;;  %v404_v48 = vrot.slane %v395_v46, 2  ;;  %7952 = vmatprep.subr.msk.mxu0 %vm496_vm4, %v471_v47 }
  0x93   :  { %418 = vst [vmem:[#allocation2 + $0x38] sm:$0xc0] %v404_v48  ;;  %v10232_v49 = vpop.permute.xlu1 %98  ;;  %v97_v50 = vpop.permute.xlu0 %96 }
  0x94   :  { %v115_v51 = vsel %vm110_vm5, %v97_v50, %v10232_v49 }
  0x95   :  { %v126_v52 = vrot.slane %v115_v51, 6 }
  0x97   :  { %140 = vst [vmem:[#allocation2 + $0x8] sm:$0xc] %v126_v52  ;;  %v10238_v53 = vpop.permute.xlu1 %150  ;;  %v149_v54 = vpop.permute.xlu0 %148 }
  0x98   :  { %v165_v55 = vsel %vm160_vm6, %v149_v54, %v10238_v53  ;;  %v470_v56 = vld [vmem:[#allocation2 + $0x70] sm:$0x3] }
  0x99   :  { %v176_v57 = vrot.slane %v165_v55, 4  ;;  %7953 = vmatpush1.msk.msra.mxu0 %vm496_vm4, %v470_v56 }
  0x9b   :  { %190 = vst [vmem:[#allocation2 + $0x8] sm:$0x30] %v176_v57  ;;  %v10245_v58 = vpop.permute.xlu1 %200  ;;  %v199_v59 = vpop.permute.xlu0 %198 }
  0x9c   :  { %v215_v60 = vsel %vm210_vm7, %v199_v59, %v10245_v58 }
  0x9d   :  { %v226_v61 = vrot.slane %v215_v60, 2 }
  0x9f   :  { %240 = vst [vmem:[#allocation2 + $0x8] sm:$0xc0] %v226_v61  ;;  %v10251_v62 = vpop.permute.xlu1 %250  ;;  %v249_v63 = vpop.permute.xlu0 %248 }
  0xa0   :  { %v265_v0 = vsel %vm260_vm8, %v249_v63, %v10251_v62 }
  0xa1   :  { %269 = vst [vmem:[#allocation2 + $0x40] sm:$0x3] %v265_v0 }
  0xa3   :  { %v10256_v1 = vpop.permute.xlu1 %146  ;;  %v10258_v2 = vpop.permute.xlu0 %94 }
  0xa4   :  { %v166_v3 = vsel %vm160_vm6, %v10256_v1, %v149_v54  ;;  %v116_v4 = vsel %vm110_vm5, %v10258_v2, %v97_v50 }
  0xa5   :  { %v175_v5 = vrot.slane %v166_v3, 4  ;;  %v125_v7 = vrot.slane %v116_v4, 6 }
  0xa6   :  { %v457_v28 = vld [vmem:[#allocation2 + $0x8] sm:$0xff] }
  0xa7   :  { %189 = vst [vmem:[#allocation2] sm:$0x30] %v175_v5  ;;  %139 = vst [vmem:[#allocation2] sm:$0xc] %v125_v7  ;;  %v10266_v8 = vpop.permute.xlu1 %246  ;;  %v10268_v10 = vpop.permute.xlu0 %196 }
  0xa8   :  { %v266_v11 = vsel %vm260_vm8, %v10266_v8, %v249_v63  ;;  %v216_v12 = vsel %vm210_vm7, %v10268_v10, %v199_v59  ;;  %v464_v13 = vld [vmem:[#allocation2 + $0x40] sm:$0xff] }
  0xa9   :  { %268 = vst [vmem:[#allocation2 + $0x38] sm:$0x3] %v266_v11  ;;  %v225_v14 = vrot.slane %v216_v12, 2  ;;  %546 = vmatprep.subr.mxu0 %v464_v13 }
  0xab   :  { %239 = vst [vmem:[#allocation2] sm:$0xc0] %v225_v14  ;;  %v10276_v15 = vpop.permute.xlu1 %283  ;;  %v282_v17 = vpop.permute.xlu0 %281 }
  0xac   :  { %v292_v19 = vsel %vm289_vm0, %v282_v17, %v10276_v15  ;;  %v293_v20 = vsel %vm289_vm0, %v10188_v23, %v282_v17 }
  0xad   :  { %v306_v21 = vrot.slane %v293_v20, 6  ;;  %v307_v25 = vrot.slane %v292_v19, 6 }
  0xaf   :  { %320 = vst [vmem:[#allocation2 + $0x48] sm:$0xc] %v306_v21  ;;  %321 = vst [vmem:[#allocation2 + $0x50] sm:$0xc] %v307_v25  ;;  %v10284_v26 = vpop.permute.xlu1 %333  ;;  %v332_v27 = vpop.permute.xlu0 %331 }
  0xb0   :  { %v342_v30 = vsel %vm339_vm1, %v332_v27, %v10284_v26  ;;  %v343_v23 = vsel %vm339_vm1, %v10186_v22, %v332_v27  ;;  %v463_v31 = vld [vmem:[#allocation2 + $0x38] sm:$0xff] }
  0xb1   :  { %v356_v32 = vrot.slane %v343_v23, 4  ;;  %v357_v33 = vrot.slane %v342_v30, 4  ;;  %547 = vmatpush1.msra.mxu0 %v463_v31 }
  0xb2   :  { %548 = vmatprep.subr.mxu0 %v457_v28  ;;  %v456_v35 = vld [vmem:[#allocation2] sm:$0xff] }
  0xb3   :  { %370 = vst [vmem:[#allocation2 + $0x48] sm:$0x30] %v356_v32  ;;  %371 = vst [vmem:[#allocation2 + $0x50] sm:$0x30] %v357_v33  ;;  %v10297_v36 = vpop.permute.xlu1 %383  ;;  %549 = vmatpush1.msra.mxu0 %v456_v35  ;;  %v382_v39 = vpop.permute.xlu0 %381 }
  0xb4   :  { %v392_v22 = vsel %vm389_vm2, %v382_v39, %v10297_v36  ;;  %v393_v41 = vsel %vm389_vm2, %v10191_v24, %v382_v39  ;;  %7954 = vmatmul.mubr.msk.f32.vlgmr.msra.gmra.mxu0 %vm489_vm9, %v10289_v29 }
  0xb5   :  { %v406_v42 = vrot.slane %v393_v41, 2  ;;  %v407_v45 = vrot.slane %v392_v22, 2  ;;  %588 = vmatprep.mubr.f32.mxu0 %v14419_v16 }
  0xb7   :  { %420 = vst [vmem:[#allocation2 + $0x48] sm:$0xc0] %v406_v42  ;;  %421 = vst [vmem:[#allocation2 + $0x50] sm:$0xc0] %v407_v45  ;;  %v10313_v46 = vpop.permute.xlu1 %433  ;;  %v432_v47 = vpop.permute.xlu0 %431 }
  0xb8   :  { %v442_v48 = vsel %vm439_vm3, %v432_v47, %v10313_v46  ;;  %v443_v24 = vsel %vm439_vm3, %v10205_v34, %v432_v47  ;;  %7955 = vmatmul.mubr.msk.f32.gmra.mxu0 %vm489_vm9, %v10302_v40 }
  0xb9   :  { %449 = vst [vmem:[#allocation2 + $0x80] sm:$0x3] %v443_v24  ;;  %450 = vst [vmem:[#allocation2 + $0x88] sm:$0x3] %v442_v48  ;;  %736 = vmatprep.mubr.f32.mxu0 %v14419_v16 }
  0xbb   :  { %v10324_v50 = vpop.permute.xlu1 %102  ;;  %v101_v51 = vpop.permute.xlu0 %100 }
  0xbc   :  { %v113_v52 = vsel %vm110_vm5, %v101_v51, %v10324_v50  ;;  %v114_v54 = vsel %vm110_vm5, %v10232_v49, %v101_v51 }
  0xbd   :  { %v127_v55 = vrot.slane %v114_v54, 6  ;;  %v128_v34 = vrot.slane %v113_v52, 6 }
  0xbf   :  { %141 = vst [vmem:[#allocation2 + $0x10] sm:$0xc] %v127_v55  ;;  %142 = vst [vmem:[#allocation2 + $0x18] sm:$0xc] %v128_v34  ;;  %v10332_v56 = vpop.permute.xlu1 %154  ;;  %v153_v57 = vpop.permute.xlu0 %152 }
  0xc0   :  { %v163_v59 = vsel %vm160_vm6, %v153_v57, %v10332_v56  ;;  %v164_v60 = vsel %vm160_vm6, %v10238_v53, %v153_v57  ;;  %v473_v61 = vld [vmem:[#allocation2 + $0x88] sm:$0x3]  ;;  %v472_v63 = vld [vmem:[#allocation2 + $0x80] sm:$0x3] }
  0xc1   :  { %v177_v0 = vrot.slane %v164_v60, 4  ;;  %v178_v3 = vrot.slane %v163_v59, 4  ;;  %7956 = vmatprep.subr.msk.mxu1 %vm496_vm4, %v473_v61 }
  0xc2   :  { %7957 = vmatpush1.msk.msra.mxu1 %vm496_vm4, %v472_v63 }
  0xc3   :  { %191 = vst [vmem:[#allocation2 + $0x10] sm:$0x30] %v177_v0  ;;  %192 = vst [vmem:[#allocation2 + $0x18] sm:$0x30] %v178_v3  ;;  %v10342_v49 = vpop.permute.xlu1 %204  ;;  %v203_v4 = vpop.permute.xlu0 %202 }
  0xc4   :  { %v213_v5 = vsel %vm210_vm7, %v203_v4, %v10342_v49  ;;  %v214_v53 = vsel %vm210_vm7, %v10245_v58, %v203_v4 }
  0xc5   :  { %v227_v7 = vrot.slane %v214_v53, 2  ;;  %v228_v11 = vrot.slane %v213_v5, 2 }
  0xc7   :  { %241 = vst [vmem:[#allocation2 + $0x10] sm:$0xc0] %v227_v7  ;;  %242 = vst [vmem:[#allocation2 + $0x18] sm:$0xc0] %v228_v11  ;;  %v10350_v12 = vpop.permute.xlu1 %254  ;;  %v253_v13 = vpop.permute.xlu0 %252 }
  0xc8   :  { %v263_v14 = vsel %vm260_vm8, %v253_v13, %v10350_v12  ;;  %v264_v17 = vsel %vm260_vm8, %v10251_v62, %v253_v13 }
  0xc9   :  { %270 = vst [vmem:[#allocation2 + $0x48] sm:$0x3] %v264_v17  ;;  %271 = vst [vmem:[#allocation2 + $0x50] sm:$0x3] %v263_v14 }
  0xcb   :  { %v288_v19 = vpop.permute.xlu1 %287  ;;  %v286_v20 = vpop.permute.xlu0 %285 }
  0xcc   :  { %v296_v58 = vsel %vm289_vm0, %v288_v19, %v10212_v38  ;;  %v290_v21 = vsel %vm289_vm0, %v286_v20, %v288_v19  ;;  %v291_v25 = vsel %vm289_vm0, %v10276_v15, %v286_v20 }
  0xcd   :  { %v310_v27 = vrot.slane %v296_v58, 6  ;;  %v308_v28 = vrot.slane %v291_v25, 6  ;;  %v309_v30 = vrot.slane %v290_v21, 6 }
  0xce   :  { %v459_v35 = vld [vmem:[#allocation2 + $0x18] sm:$0xff]  ;;  %v458_v42 = vld [vmem:[#allocation2 + $0x10] sm:$0xff] }
  0xcf   :  { %324 = vst [vmem:[#allocation2 + $0x68] sm:$0xc] %v310_v27  ;;  %322 = vst [vmem:[#allocation2 + $0x58] sm:$0xc] %v308_v28  ;;  %v338_v62 = vpop.permute.xlu1 %337  ;;  %v336_v23 = vpop.permute.xlu0 %335 }
  0xd0   :  { %323 = vst [vmem:[#allocation2 + $0x60] sm:$0xc] %v309_v30  ;;  %v346_v31 = vsel %vm339_vm1, %v338_v62, %v10210_v37  ;;  %v340_v38 = vsel %vm339_vm1, %v336_v23, %v338_v62  ;;  %v341_v32 = vsel %vm339_vm1, %v10284_v26, %v336_v23  ;;  %v466_v15 = vld [vmem:[#allocation2 + $0x50] sm:$0xff]  ;;  %v465_v33 = vld [vmem:[#allocation2 + $0x48] sm:$0xff] }
  0xd1   :  { %v360_v39 = vrot.slane %v346_v31, 4  ;;  %v358_v22 = vrot.slane %v341_v32, 4  ;;  %v359_v41 = vrot.slane %v340_v38, 4  ;;  %623 = vmatprep.subr.mxu1 %v466_v15 }
  0xd2   :  { %624 = vmatpush1.msra.mxu1 %v465_v33 }
  0xd3   :  { %374 = vst [vmem:[#allocation2 + $0x68] sm:$0x30] %v360_v39  ;;  %372 = vst [vmem:[#allocation2 + $0x58] sm:$0x30] %v358_v22  ;;  %v388_v37 = vpop.permute.xlu1 %387  ;;  %v386_v45 = vpop.permute.xlu0 %385  ;;  %625 = vmatprep.subr.mxu1 %v459_v35 }
  0xd4   :  { %373 = vst [vmem:[#allocation2 + $0x60] sm:$0x30] %v359_v41  ;;  %v396_v47 = vsel %vm389_vm2, %v388_v37, %v10222_v44  ;;  %v390_v26 = vsel %vm389_vm2, %v386_v45, %v388_v37  ;;  %v391_v48 = vsel %vm389_vm2, %v10297_v36, %v386_v45  ;;  %626 = vmatpush1.msra.mxu1 %v458_v42 }
  0xd5   :  { %v410_v24 = vrot.slane %v396_v47, 2  ;;  %v408_v51 = vrot.slane %v391_v48, 2  ;;  %v409_v52 = vrot.slane %v390_v26, 2  ;;  %7958 = vmatmul.mubr.msk.f32.vlgmr.msra.gmra.mxu1 %vm489_vm9, %v10289_v29 }
  0xd6   :  { %665 = vmatprep.mubr.f32.mxu1 %v14419_v16 }
  0xd7   :  { %424 = vst [vmem:[#allocation2 + $0x68] sm:$0xc0] %v410_v24  ;;  %422 = vst [vmem:[#allocation2 + $0x58] sm:$0xc0] %v408_v51  ;;  %v438_v44 = vpop.permute.xlu1 %437  ;;  %v436_v54 = vpop.permute.xlu0 %435 }
  0xd8   :  { %423 = vst [vmem:[#allocation2 + $0x60] sm:$0xc0] %v409_v52  ;;  %v446_v55 = vsel %vm439_vm3, %v438_v44, %v10220_v43  ;;  %v440_v36 = vsel %vm439_vm3, %v436_v54, %v438_v44  ;;  %v441_v34 = vsel %vm439_vm3, %v10313_v46, %v436_v54 }
  0xd9   :  { %453 = vst [vmem:[#allocation2 + $0xa0] sm:$0x3] %v446_v55  ;;  %451 = vst [vmem:[#allocation2 + $0x90] sm:$0x3] %v441_v34  ;;  %7959 = vmatmul.mubr.msk.f32.gmra.mxu1 %vm489_vm9, %v10302_v40 }
  0xda   :  { %452 = vst [vmem:[#allocation2 + $0x98] sm:$0x3] %v440_v36  ;;  %8892 = vmatprep.mubr.msk.f32.mxu1 %vm489_vm9, %v10289_v29 }
  0xdb   :  { %v107_v57 = vpop.permute.xlu1 %106  ;;  %v105_v59 = vpop.permute.xlu0 %104 }
  0xdc   :  { %v117_v43 = vsel %vm110_vm5, %v107_v57, %v10258_v2  ;;  %v111_v60 = vsel %vm110_vm5, %v105_v59, %v107_v57  ;;  %v112_v46 = vsel %vm110_vm5, %v10324_v50, %v105_v59 }
  0xdd   :  { %v131_v61 = vrot.slane %v117_v43, 6  ;;  %v129_v63 = vrot.slane %v112_v46, 6  ;;  %v130_v0 = vrot.slane %v111_v60, 6 }
  0xdf   :  { %145 = vst [vmem:[#allocation2 + $0x30] sm:$0xc] %v131_v61  ;;  %143 = vst [vmem:[#allocation2 + $0x20] sm:$0xc] %v129_v63  ;;  %v159_v3 = vpop.permute.xlu1 %158  ;;  %v157_v4 = vpop.permute.xlu0 %156 }
  0xe0   :  { %144 = vst [vmem:[#allocation2 + $0x28] sm:$0xc] %v130_v0  ;;  %v167_v5 = vsel %vm160_vm6, %v159_v3, %v10256_v1  ;;  %v161_v2 = vsel %vm160_vm6, %v157_v4, %v159_v3  ;;  %v162_v53 = vsel %vm160_vm6, %v10332_v56, %v157_v4  ;;  %v476_v7 = vld [vmem:[#allocation2 + $0xa0] sm:$0x3]  ;;  %v474_v11 = vld [vmem:[#allocation2 + $0x90] sm:$0x3] }
  0xe1   :  { %v475_v50 = vld [vmem:[#allocation2 + $0x98] sm:$0x3]  ;;  %v181_v13 = vrot.slane %v167_v5, 4  ;;  %v179_v14 = vrot.slane %v162_v53, 4  ;;  %v180_v17 = vrot.slane %v161_v2, 4  ;;  %8886 = vmatprep.subr.msk.mxu1 %vm496_vm4, %v476_v7 }
  0xe2   :  { %7960 = vmatprep.subr.msk.mxu0 %vm496_vm4, %v475_v50  ;;  %8887 = vmatpush3.msk.msra.mxu1 %vm496_vm4, %v476_v7 }
  0xe3   :  { %7961 = vmatpush1.msk.msra.mxu0 %vm496_vm4, %v474_v11  ;;  %195 = vst [vmem:[#allocation2 + $0x30] sm:$0x30] %v181_v13  ;;  %193 = vst [vmem:[#allocation2 + $0x20] sm:$0x30] %v179_v14  ;;  %v209_v1 = vpop.permute.xlu1 %208  ;;  %v207_v19 = vpop.permute.xlu0 %206 }
  0xe4   :  { %194 = vst [vmem:[#allocation2 + $0x28] sm:$0x30] %v180_v17  ;;  %v217_v56 = vsel %vm210_vm7, %v209_v1, %v10268_v10  ;;  %v211_v20 = vsel %vm210_vm7, %v207_v19, %v209_v1  ;;  %v212_v58 = vsel %vm210_vm7, %v10342_v49, %v207_v19 }
  0xe5   :  { %v231_v21 = vrot.slane %v217_v56, 2  ;;  %v229_v25 = vrot.slane %v212_v58, 2  ;;  %v230_v27 = vrot.slane %v211_v20, 2 }
  0xe7   :  { %245 = vst [vmem:[#allocation2 + $0x30] sm:$0xc0] %v231_v21  ;;  %243 = vst [vmem:[#allocation2 + $0x20] sm:$0xc0] %v229_v25  ;;  %v259_v28 = vpop.permute.xlu1 %258  ;;  %v257_v30 = vpop.permute.xlu0 %256 }
  0xe8   :  { %244 = vst [vmem:[#allocation2 + $0x28] sm:$0xc0] %v230_v27  ;;  %v267_v62 = vsel %vm260_vm8, %v259_v28, %v10266_v8  ;;  %v261_v10 = vsel %vm260_vm8, %v257_v30, %v259_v28  ;;  %v262_v23 = vsel %vm260_vm8, %v10350_v12, %v257_v30 }
  0xe9   :  { %274 = vst [vmem:[#allocation2 + $0x68] sm:$0x3] %v267_v62  ;;  %272 = vst [vmem:[#allocation2 + $0x58] sm:$0x3] %v262_v23 }
  0xea   :  { %273 = vst [vmem:[#allocation2 + $0x60] sm:$0x3] %v261_v10 }
  0xee   :  { %v462_v15 = vld [vmem:[#allocation2 + $0x30] sm:$0xff]  ;;  %v460_v33 = vld [vmem:[#allocation2 + $0x20] sm:$0xff] }
  0xef   :  { %v461_v49 = vld [vmem:[#allocation2 + $0x28] sm:$0xff] }
  0xf0   :  { %v469_v38 = vld [vmem:[#allocation2 + $0x68] sm:$0xff]  ;;  %v467_v32 = vld [vmem:[#allocation2 + $0x58] sm:$0xff] }
  0xf1   :  { %v468_v31 = vld [vmem:[#allocation2 + $0x60] sm:$0xff]  ;;  %8888 = vmatprep.subr.mxu1 %v469_v38 }
  0xf2   :  { %700 = vmatprep.subr.mxu0 %v468_v31  ;;  %8889 = vmatpush3.msra.mxu1 %v469_v38 }
  0xf3   :  { %701 = vmatpush1.msra.mxu0 %v467_v32  ;;  %8890 = vmatprep.subr.mxu1 %v462_v15 }
  0xf4   :  { %702 = vmatprep.subr.mxu0 %v461_v49  ;;  %8891 = vmatpush3.msra.mxu1 %v462_v15 }
  0xf5   :  { %703 = vmatpush1.msra.mxu0 %v460_v33  ;;  %8893 = vmatmul.mubr.msk.f32.vlgmr.msra.gmra.mxu1 %vm489_vm9, %v10302_v40 }
  0xf6   :  { %7962 = vmatmul.mubr.msk.f32.vlgmr.msra.gmra.mxu0 %vm489_vm9, %v10289_v29  ;;  %1983 = vmatprep.mubr.f32.mxu1 %v14419_v16 }
  0xf7   :  { %742 = vmatprep.mubr.f32.mxu0 %v14419_v16 }
  0xfa   :  { %7963 = vmatmul.mubr.msk.f32.gmra.mxu0 %vm489_vm9, %v10302_v40 }
  0xfb   :  { %1894 = vmatprep.mubr.f32.mxu0 %v14419_v16 }
  0xfc   :  { %17 = vsyncpa [#allocation6], 0  ;;  %v10442_v12 = vpop.permute.xlu1 %481  ;;  %v487_v24 = vpop.permute.xlu0 %486  ;;  %s10017_s1 = smov 14   ;;  %s10018_s21 = smov 12   ;;  %vm1535_vm10 = vcmp.lt.s32.totalorder %v10178_v18, 14  ;;  %vm1641_vm11 = vcmp.lt.s32.totalorder %v10178_v18, 12 }
  0xfd   :  { %s10019_s22 = smov 68   ;;  %s10020_s23 = smov 16   ;;  %vm1372_vm12 = vcmp.lt.s32.totalorder %v10178_v18, 68  ;;  %vm1478_vm13 = vcmp.lt.s32.totalorder %v10178_v18, 16  ;;  %vm1154_vm14 = vcmp.lt.s32.totalorder %v10178_v18, 124  ;;  %vm1076_vm15 = vcmask 1043456  }
  0xfe   :  { %s10021_s24 = smov 124   ;;  %vm1796_vm0 = vcmask 883712   ;;  %s10022_s2 = smov [#allocation5]  }
  0xff   :  { %s7940_s18 = sshll.u32 %s10022_s2, 4  ;;  %s7941_s18 = int_to_ptr.vmem [resolvable:$true] %s7940_s18 }
 0x100   :  { %s9984_s19 = scalar_lea.vmem %s7941_s18, 32  ;;  %p9989_p1 = scmp.lt.s32.totalorder %s7941_s18, %s7941_s18 }
 0x101   :  { %p9985_p0 = scmp.ne.s32.totalorder %s7941_s18, %s9984_s19  ;;  %p9990_p2 = scmp.lt.s32.totalorder %s9984_s19, %s9984_s19 }
 0x103   :  { %p9991_p3 = por %p9990_p2, %p9989_p1 }
 0x105   :  { %p9992_p4 = pnand %p9991_p3, %p9985_p0 }
 0x174   :  { %v584_v8 = vpop.f32.mrf.mxu0 }
 0x175   :  { %v585_v45 = vadd.f32 %v584_v8, %v10442_v12 }
 0x176   :  { %v586_v35 = vpop.f32.mrf.mxu0 }
 0x177   :  { %v587_v39 = vadd.f32 %v586_v35, %v10442_v12  ;;  %v10460_v26 = vmax.f32 %v585_v45, 0.0 }
 0x178   :  { %v590_v48 = vpop.f32.mrf.mxu0 }
 0x179   :  { %v10445_v29 = vmax.f32 %v587_v39, 0.0  ;;  %v591_v59 = vadd.f32 %v590_v48, %v487_v24 }
 0x17a   :  { %v592_v51 = vpop.f32.mrf.mxu0 }
 0x17b   :  { %842 = vrot.lane.b32.xlu1 %v10445_v29, %s10011_s28  ;;  %v593_v44 = vadd.f32 %v592_v51, %v487_v24  ;;  %v10490_v60 = vmax.f32 %v591_v59, 0.0 }
 0x17d   :  { %v10478_v34 = vmax.f32 %v593_v44, 0.0 }
 0x195   :  { %v661_v22 = vpop.f32.mrf.mxu1 }
 0x196   :  { %v662_v41 = vadd.f32 %v661_v22, %v10442_v12 }
 0x197   :  { %v663_v42 = vpop.f32.mrf.mxu1 }
 0x198   :  { %v10450_v37 = vmax.f32 %v662_v41, 0.0  ;;  %v664_v40 = vadd.f32 %v663_v42, %v10442_v12 }
 0x199   :  { %v667_v52 = vpop.f32.mrf.mxu1 }
 0x19a   :  { %v10454_v47 = vmax.f32 %v664_v40, 0.0  ;;  %846 = vrot.lane.b32.xlu0 %v10450_v37, %s10011_s28  ;;  %v668_v55 = vadd.f32 %v667_v52, %v487_v24 }
 0x19b   :  { %v669_v54 = vpop.f32.mrf.mxu1 }
 0x19c   :  { %850 = vrot.lane.b32.xlu1 %v10454_v47, %s10011_s28  ;;  %v670_v36 = vadd.f32 %v669_v54, %v487_v24  ;;  %v10480_v57 = vmax.f32 %v668_v55, 0.0 }
 0x19e   :  { %838 = vrot.lane.b32.xlu0 %v10460_v26, %s10011_s28  ;;  %v10484_v43 = vmax.f32 %v670_v36, 0.0 }
 0x1a0   :  { %898 = vrot.lane.b32.xlu1 %v10445_v29, %s10013_s30 }
 0x1a2   :  { %902 = vrot.lane.b32.xlu0 %v10450_v37, %s10013_s30 }
 0x1a4   :  { %906 = vrot.lane.b32.xlu1 %v10454_v47, %s10013_s30 }
 0x1a6   :  { %894 = vrot.lane.b32.xlu0 %v10460_v26, %s10013_s30 }
 0x1a8   :  { %954 = vrot.lane.b32.xlu1 %v10445_v29, %s10014_s13 }
 0x1aa   :  { %958 = vrot.lane.b32.xlu0 %v10450_v37, %s10014_s13 }
 0x1ac   :  { %962 = vrot.lane.b32.xlu1 %v10454_v47, %s10014_s13 }
 0x1ae   :  { %950 = vrot.lane.b32.xlu0 %v10460_v26, %s10014_s13 }
 0x1b0   :  { %844 = vrot.lane.b32.xlu1 %v10478_v34, %s10011_s28 }
 0x1b2   :  { %848 = vrot.lane.b32.xlu0 %v10480_v57, %s10011_s28 }
 0x1b4   :  { %852 = vrot.lane.b32.xlu1 %v10484_v43, %s10011_s28 }
 0x1b5   :  { %v8894_v4 = vpop.f32.mrf.mxu1 }
 0x1b6   :  { %840 = vrot.lane.b32.xlu0 %v10490_v60, %s10011_s28  ;;  %v738_v46 = vpop.f32.mrf.mxu0  ;;  %v821_v5 = vadd.f32 %v8894_v4, %v487_v24 }
 0x1b7   :  { %v739_v61 = vadd.f32 %v738_v46, %v10442_v12  ;;  %v815_v53 = vpop.f32.mrf.mxu1 }
 0x1b8   :  { %900 = vrot.lane.b32.xlu1 %v10478_v34, %s10013_s30  ;;  %v740_v63 = vpop.f32.mrf.mxu0  ;;  %v10524_v50 = vmax.f32 %v821_v5, 0.0  ;;  %v816_v7 = vadd.f32 %v815_v53, %v10442_v12 }
 0x1b9   :  { %v10511_v0 = vmax.f32 %v739_v61, 0.0  ;;  %v741_v3 = vadd.f32 %v740_v63, %v10442_v12 }
 0x1ba   :  { %904 = vrot.lane.b32.xlu0 %v10480_v57, %s10013_s30  ;;  %v10533_v11 = vmax.f32 %v816_v7, 0.0  ;;  %v744_v13 = vpop.f32.mrf.mxu0 }
 0x1bb   :  { %v10520_v2 = vmax.f32 %v741_v3, 0.0  ;;  %v745_v14 = vadd.f32 %v744_v13, %v487_v24 }
 0x1bc   :  { %908 = vrot.lane.b32.xlu1 %v10484_v43, %s10013_s30  ;;  %v746_v17 = vpop.f32.mrf.mxu0 }
 0x1bd   :  { %v10545_v1 = vmax.f32 %v745_v14, 0.0  ;;  %v747_v19 = vadd.f32 %v746_v17, %v487_v24 }
 0x1be   :  { %896 = vrot.lane.b32.xlu0 %v10490_v60, %s10013_s30 }
 0x1bf   :  { %v10551_v56 = vmax.f32 %v747_v19, 0.0 }
 0x1c0   :  { %956 = vrot.lane.b32.xlu1 %v10478_v34, %s10014_s13 }
 0x1c2   :  { %960 = vrot.lane.b32.xlu0 %v10480_v57, %s10014_s13 }
 0x1c4   :  { %964 = vrot.lane.b32.xlu1 %v10484_v43, %s10014_s13 }
 0x1c6   :  { %952 = vrot.lane.b32.xlu0 %v10490_v60, %s10014_s13 }
 0x1c8   :  { %910 = vrot.lane.b32.xlu1 %v10511_v0, %s10013_s30 }
 0x1ca   :  { %854 = vrot.lane.b32.xlu0 %v10511_v0, %s10011_s28 }
 0x1cc   :  { %966 = vrot.lane.b32.xlu1 %v10511_v0, %s10014_s13 }
 0x1ce   :  { %914 = vrot.lane.b32.xlu0 %v10520_v2, %s10013_s30 }
 0x1d0   :  { %864 = vrot.lane.b32.xlu1 %v10524_v50, %s10011_s28 }
 0x1d2   :  { %970 = vrot.lane.b32.xlu0 %v10520_v2, %s10014_s13 }
 0x1d4   :  { %920 = vrot.lane.b32.xlu1 %v10524_v50, %s10013_s30 }
 0x1d6   :  { %862 = vrot.lane.b32.xlu0 %v10533_v11, %s10011_s28 }
 0x1d8   :  { %976 = vrot.lane.b32.xlu1 %v10524_v50, %s10014_s13 }
 0x1da   :  { %918 = vrot.lane.b32.xlu0 %v10533_v11, %s10013_s30 }
 0x1dc   :  { %858 = vrot.lane.b32.xlu1 %v10520_v2, %s10011_s28 }
 0x1de   :  { %974 = vrot.lane.b32.xlu0 %v10533_v11, %s10014_s13 }
 0x1e0   :  { %968 = vrot.lane.b32.xlu1 %v10545_v1, %s10014_s13 }
 0x1e2   :  { %856 = vrot.lane.b32.xlu0 %v10545_v1, %s10011_s28 }
 0x1e4   :  { %860 = vrot.lane.b32.xlu1 %v10551_v56, %s10011_s28 }
 0x1e6   :  { %912 = vrot.lane.b32.xlu0 %v10545_v1, %s10013_s30 }
 0x1e8   :  { %916 = vrot.lane.b32.xlu1 %v10551_v56, %s10013_s30 }
 0x1ea   :  { %972 = vrot.lane.b32.xlu0 %v10551_v56, %s10014_s13 }
 0x1ed   :  { %v843_v20 = vpop.permute.xlu1 %842 }
 0x20c   :  { %v847_v58 = vpop.permute.xlu0 %846 }
 0x20d   :  { %v874_v62 = vsel %vm110_vm5, %v843_v20, %v847_v58 }
 0x20e   :  { %v10563_v21 = vpop.permute.xlu1 %850  ;;  %v881_v31 = vmax.f32 %v10445_v29, %v874_v62 }
 0x20f   :  { %v872_v23 = vsel %vm110_vm5, %v847_v58, %v10563_v21 }
 0x210   :  { %v10565_v25 = vpop.permute.xlu0 %838  ;;  %v882_v33 = vmax.f32 %v10450_v37, %v872_v23 }
 0x211   :  { %v876_v32 = vsel %vm110_vm5, %v10565_v25, %v843_v20 }
 0x212   :  { %v899_v27 = vpop.permute.xlu1 %898  ;;  %v880_v29 = vmax.f32 %v10460_v26, %v876_v32 }
 0x214   :  { %v903_v28 = vpop.permute.xlu0 %902 }
 0x215   :  { %v930_v49 = vsel %vm210_vm7, %v899_v27, %v903_v28 }
 0x216   :  { %v10567_v30 = vpop.permute.xlu1 %906  ;;  %v937_v8 = vmax.f32 %v881_v31, %v930_v49 }
 0x217   :  { %v928_v15 = vsel %vm210_vm7, %v903_v28, %v10567_v30 }
 0x218   :  { %v10571_v10 = vpop.permute.xlu0 %894  ;;  %v938_v22 = vmax.f32 %v882_v33, %v928_v15 }
 0x219   :  { %v932_v35 = vsel %vm210_vm7, %v10571_v10, %v899_v27 }
 0x21a   :  { %v955_v38 = vpop.permute.xlu1 %954  ;;  %v936_v40 = vmax.f32 %v880_v29, %v932_v35 }
 0x21c   :  { %v959_v12 = vpop.permute.xlu0 %958 }
 0x21d   :  { %v986_v39 = vsel %vm260_vm8, %v955_v38, %v959_v12 }
 0x21e   :  { %v10592_v41 = vmax.f32 %v937_v8, %v986_v39  ;;  %v10594_v42 = vpop.permute.xlu1 %962 }
 0x21f   :  { %v984_v37 = vsel %vm260_vm8, %v959_v12, %v10594_v42 }
 0x220   :  { %v10599_v45 = vmax.f32 %v938_v22, %v984_v37  ;;  %1511 = vrot.lane.b32.xlu1 %v10592_v41, %s10017_s1  ;;  %v10603_v48 = vpop.permute.xlu0 %950 }
 0x221   :  { %v988_v26 = vsel %vm260_vm8, %v10603_v48, %v955_v38 }
 0x222   :  { %1008 = vst [vmem:[#allocation3 + $0x10] sm:$0xff] %v10599_v45  ;;  %v10609_v24 = vmax.f32 %v936_v40, %v988_v26  ;;  %v845_v51 = vpop.permute.xlu1 %844 }
 0x224   :  { %1515 = vrot.lane.b32.xlu1 %v10599_v45, %s10017_s1  ;;  %1507 = vrot.lane.b32.xlu0 %v10609_v24, %s10017_s1  ;;  %v849_v52 = vpop.permute.xlu0 %848 }
 0x225   :  { %v875_v46 = vsel %vm110_vm5, %v845_v51, %v849_v52 }
 0x226   :  { %v10615_v44 = vpop.permute.xlu1 %852  ;;  %v888_v4 = vmax.f32 %v10478_v34, %v875_v46 }
 0x227   :  { %v873_v63 = vsel %vm110_vm5, %v849_v52, %v10615_v44 }
 0x228   :  { %1621 = vrot.lane.b32.xlu1 %v10599_v45, %s10018_s21  ;;  %1617 = vrot.lane.b32.xlu0 %v10592_v41, %s10018_s21  ;;  %v841_v54 = vpop.permute.xlu0 %840  ;;  %v889_v13 = vmax.f32 %v10480_v57, %v873_v63 }
 0x229   :  { %v877_v53 = vsel %vm110_vm5, %v841_v54, %v845_v51 }
 0x22a   :  { %v901_v55 = vpop.permute.xlu1 %900  ;;  %v887_v20 = vmax.f32 %v10490_v60, %v877_v53 }
 0x22c   :  { %1348 = vrot.lane.b32.xlu1 %v10592_v41, %s10019_s22  ;;  %1613 = vrot.lane.b32.xlu0 %v10609_v24, %s10018_s21  ;;  %v905_v36 = vpop.permute.xlu0 %904 }
 0x22d   :  { %v931_v3 = vsel %vm210_vm7, %v901_v55, %v905_v36 }
 0x22e   :  { %v10625_v59 = vpop.permute.xlu1 %908  ;;  %v944_v14 = vmax.f32 %v888_v4, %v931_v3 }
 0x22f   :  { %v929_v7 = vsel %vm210_vm7, %v905_v36, %v10625_v59 }
 0x230   :  { %1352 = vrot.lane.b32.xlu1 %v10599_v45, %s10019_s22  ;;  %1344 = vrot.lane.b32.xlu0 %v10609_v24, %s10019_s22  ;;  %v897_v61 = vpop.permute.xlu0 %896  ;;  %v945_v58 = vmax.f32 %v889_v13, %v929_v7 }
 0x231   :  { %v933_v34 = vsel %vm210_vm7, %v897_v61, %v901_v55 }
 0x232   :  { %v957_v5 = vpop.permute.xlu1 %956  ;;  %v943_v62 = vmax.f32 %v887_v20, %v933_v34 }
 0x234   :  { %1458 = vrot.lane.b32.xlu1 %v10599_v45, %s10020_s23  ;;  %1454 = vrot.lane.b32.xlu0 %v10592_v41, %s10020_s23  ;;  %v961_v17 = vpop.permute.xlu0 %960 }
 0x235   :  { %v987_v19 = vsel %vm260_vm8, %v957_v5, %v961_v17 }
 0x236   :  { %v10654_v27 = vmax.f32 %v944_v14, %v987_v19  ;;  %v10656_v57 = vpop.permute.xlu1 %964 }
 0x237   :  { %v985_v28 = vsel %vm260_vm8, %v961_v17, %v10656_v57 }
 0x238   :  { %1014 = vst [vmem:[#allocation3 + $0x300] sm:$0xf] %v10654_v27  ;;  %v10662_v23 = vmax.f32 %v945_v58, %v985_v28  ;;  %1187 = vrot.lane.b32.xlu1 %v10592_v41, %s10007_s0  ;;  %1450 = vrot.lane.b32.xlu0 %v10609_v24, %s10020_s23  ;;  %v953_v60 = vpop.permute.xlu0 %952 }
 0x239   :  { %v989_v49 = vsel %vm260_vm8, %v953_v60, %v957_v5 }
 0x23a   :  { %1015 = vst [vmem:[#allocation3 + $0x130] sm:$0xf] %v10662_v23  ;;  %v10671_v31 = vmax.f32 %v943_v62, %v989_v49  ;;  %v911_v38 = vpop.permute.xlu1 %910 }
 0x23b   :  { %v926_v12 = vsel %vm210_vm7, %v10567_v30, %v911_v38 }
 0x23c   :  { %1013 = vst [vmem:[#allocation3 + $0x78] sm:$0xf] %v10671_v31  ;;  %1191 = vrot.lane.b32.xlu1 %v10599_v45, %s10007_s0  ;;  %1183 = vrot.lane.b32.xlu0 %v10609_v24, %s10007_s0  ;;  %v855_v32 = vpop.permute.xlu0 %854 }
 0x23d   :  { %v870_v15 = vsel %vm110_vm5, %v10563_v21, %v855_v32 }
 0x23e   :  { %v883_v33 = vmax.f32 %v10454_v47, %v870_v15  ;;  %v967_v8 = vpop.permute.xlu1 %966 }
 0x23f   :  { %v982_v29 = vsel %vm260_vm8, %v10594_v42, %v967_v8 }
 0x240   :  { %v939_v35 = vmax.f32 %v883_v33, %v926_v12  ;;  %1296 = vrot.lane.b32.xlu1 %v10599_v45, %s10010_s27  ;;  %1292 = vrot.lane.b32.xlu0 %v10592_v41, %s10010_s27  ;;  %v915_v39 = vpop.permute.xlu0 %914 }
 0x242   :  { %v10692_v21 = vmax.f32 %v939_v35, %v982_v29  ;;  %v865_v47 = vpop.permute.xlu1 %864 }
 0x243   :  { %v879_v22 = vsel %vm110_vm5, %v865_v47, %v841_v54 }
 0x244   :  { %1009 = vst [vmem:[#allocation3 + $0x48] sm:$0xff] %v10692_v21  ;;  %1024 = vrot.lane.b32.xlu1 %v10592_v41, %s10012_s29  ;;  %1288 = vrot.lane.b32.xlu0 %v10609_v24, %s10010_s27  ;;  %v971_v30 = vpop.permute.xlu0 %970  ;;  %v893_v42 = vmax.f32 %v10524_v50, %v879_v22 }
 0x245   :  { %v980_v17 = vsel %vm260_vm8, %v967_v8, %v971_v30 }
 0x246   :  { %v921_v37 = vpop.permute.xlu1 %920 }
 0x247   :  { %v935_v40 = vsel %vm210_vm7, %v921_v37, %v897_v61 }
 0x248   :  { %1028 = vrot.lane.b32.xlu1 %v10599_v45, %s10012_s29  ;;  %1020 = vrot.lane.b32.xlu0 %v10609_v24, %s10012_s29  ;;  %v863_v26 = vpop.permute.xlu0 %862  ;;  %v949_v51 = vmax.f32 %v893_v42, %v935_v40 }
 0x249   :  { %v878_v55 = vsel %vm110_vm5, %v863_v26, %v10565_v25 }
 0x24a   :  { %v977_v52 = vpop.permute.xlu1 %976  ;;  %v886_v61 = vmax.f32 %v10533_v11, %v878_v55 }
 0x24b   :  { %v991_v54 = vsel %vm260_vm8, %v977_v52, %v953_v60 }
 0x24c   :  { %v10713_v36 = vmax.f32 %v949_v51, %v991_v54  ;;  %1134 = vrot.lane.b32.xlu1 %v10599_v45, %s10021_s24  ;;  %1130 = vrot.lane.b32.xlu0 %v10592_v41, %s10021_s24  ;;  %v919_v50 = vpop.permute.xlu0 %918 }
 0x24d   :  { %v934_v46 = vsel %vm210_vm7, %v919_v50, %v10571_v10  ;;  %v924_v10 = vsel %vm210_vm7, %v911_v38, %v915_v39  ;;  %v922_v53 = vsel %vm210_vm7, %v915_v39, %v919_v50 }
 0x24e   :  { %1019 = vst [vmem:[#allocation3 + $0x2a8] sm:$0xf] %v10713_v36  ;;  %v859_v25 = vpop.permute.xlu1 %858  ;;  %v942_v45 = vmax.f32 %v886_v61, %v934_v46 }
 0x24f   :  { %v866_v63 = vsel %vm110_vm5, %v859_v25, %v863_v26  ;;  %v868_v3 = vsel %vm110_vm5, %v855_v32, %v859_v25 }
 0x250   :  { %v884_v4 = vmax.f32 %v10511_v0, %v868_v3  ;;  %v885_v5 = vmax.f32 %v10520_v2, %v866_v63  ;;  %1126 = vrot.lane.b32.xlu0 %v10609_v24, %s10021_s24  ;;  %1619 = vrot.lane.b32.xlu1 %v10654_v27, %s10018_s21  ;;  %v975_v11 = vpop.permute.xlu0 %974 }
 0x251   :  { %v990_v7 = vsel %vm260_vm8, %v975_v11, %v10603_v48  ;;  %v978_v34 = vsel %vm260_vm8, %v971_v30, %v975_v11 }
 0x252   :  { %v940_v0 = vmax.f32 %v884_v4, %v924_v10  ;;  %v941_v13 = vmax.f32 %v885_v5, %v922_v53  ;;  %v10741_v2 = vmax.f32 %v942_v45, %v990_v7  ;;  %v969_v14 = vpop.permute.xlu1 %968 }
 0x254   :  { %v10747_v19 = vmax.f32 %v940_v0, %v980_v17  ;;  %v10749_v20 = vmax.f32 %v941_v13, %v978_v34  ;;  %1012 = vst [vmem:[#allocation3 + $0xf8] sm:$0xff] %v10741_v2  ;;  %1623 = vrot.lane.b32.xlu0 %v10662_v23, %s10018_s21  ;;  %1615 = vrot.lane.b32.xlu1 %v10671_v31, %s10018_s21  ;;  %v857_v48 = vpop.permute.xlu0 %856 }
 0x255   :  { %v871_v58 = vsel %vm110_vm5, %v10615_v44, %v857_v48 }
 0x256   :  { %1010 = vst [vmem:[#allocation3 + $0x30] sm:$0xff] %v10747_v19  ;;  %1011 = vst [vmem:[#allocation3 + $0xf0] sm:$0xff] %v10749_v20  ;;  %v861_v28 = vpop.permute.xlu1 %860  ;;  %v890_v49 = vmax.f32 %v10484_v43, %v871_v58  ;;  %v983_v43 = vsel %vm260_vm8, %v10656_v57, %v969_v14 }
 0x257   :  { %v867_v62 = vsel %vm110_vm5, %v861_v28, %v865_v47  ;;  %v869_v60 = vsel %vm110_vm5, %v857_v48, %v861_v28 }
 0x258   :  { %1513 = vrot.lane.b32.xlu0 %v10654_v27, %s10017_s1  ;;  %1509 = vrot.lane.b32.xlu1 %v10671_v31, %s10017_s1  ;;  %v913_v44 = vpop.permute.xlu0 %912  ;;  %v891_v32 = vmax.f32 %v10545_v1, %v869_v60  ;;  %v892_v15 = vmax.f32 %v10551_v56, %v867_v62 }
 0x259   :  { %v927_v38 = vsel %vm210_vm7, %v10625_v59, %v913_v44 }
 0x25a   :  { %v946_v33 = vmax.f32 %v890_v49, %v927_v38  ;;  %v917_v8 = vpop.permute.xlu1 %916 }
 0x25b   :  { %v923_v12 = vsel %vm210_vm7, %v917_v8, %v921_v37  ;;  %v925_v35 = vsel %vm210_vm7, %v913_v44, %v917_v8 }
 0x25c   :  { %v10782_v39 = vmax.f32 %v946_v33, %v983_v43  ;;  %v947_v29 = vmax.f32 %v891_v32, %v925_v35  ;;  %v948_v59 = vmax.f32 %v892_v15, %v923_v12  ;;  %1517 = vrot.lane.b32.xlu0 %v10662_v23, %s10017_s1  ;;  %1456 = vrot.lane.b32.xlu1 %v10654_v27, %s10020_s23  ;;  %v973_v1 = vpop.permute.xlu0 %972 }
 0x25d   :  { %v979_v56 = vsel %vm260_vm8, %v973_v1, %v977_v52  ;;  %v981_v57 = vsel %vm260_vm8, %v969_v14, %v973_v1 }
 0x25e   :  { %1016 = vst [vmem:[#allocation3 + $0xe8] sm:$0xf] %v10782_v39  ;;  %v10793_v47 = vmax.f32 %v947_v29, %v981_v57  ;;  %v10795_v30 = vmax.f32 %v948_v59, %v979_v56 }
 0x260   :  { %1017 = vst [vmem:[#allocation3 + $0x40] sm:$0xf] %v10793_v47  ;;  %1018 = vst [vmem:[#allocation3 + $0x2c0] sm:$0xf] %v10795_v30  ;;  %1460 = vrot.lane.b32.xlu0 %v10662_v23, %s10020_s23  ;;  %1452 = vrot.lane.b32.xlu1 %v10671_v31, %s10020_s23 }
 0x264   :  { %1350 = vrot.lane.b32.xlu0 %v10654_v27, %s10019_s22  ;;  %1346 = vrot.lane.b32.xlu1 %v10671_v31, %s10019_s22 }
 0x268   :  { %1354 = vrot.lane.b32.xlu0 %v10662_v23, %s10019_s22  ;;  %1294 = vrot.lane.b32.xlu1 %v10654_v27, %s10010_s27 }
 0x26c   :  { %1298 = vrot.lane.b32.xlu0 %v10662_v23, %s10010_s27  ;;  %1290 = vrot.lane.b32.xlu1 %v10671_v31, %s10010_s27 }
 0x270   :  { %1189 = vrot.lane.b32.xlu0 %v10654_v27, %s10007_s0  ;;  %1185 = vrot.lane.b32.xlu1 %v10671_v31, %s10007_s0 }
 0x274   :  { %1193 = vrot.lane.b32.xlu0 %v10662_v23, %s10007_s0  ;;  %1132 = vrot.lane.b32.xlu1 %v10654_v27, %s10021_s24 }
 0x278   :  { %1136 = vrot.lane.b32.xlu0 %v10662_v23, %s10021_s24  ;;  %1128 = vrot.lane.b32.xlu1 %v10671_v31, %s10021_s24 }
 0x27c   :  { %1026 = vrot.lane.b32.xlu0 %v10654_v27, %s10012_s29  ;;  %1022 = vrot.lane.b32.xlu1 %v10671_v31, %s10012_s29 }
 0x280   :  { %1030 = vrot.lane.b32.xlu0 %v10662_v23, %s10012_s29  ;;  %1519 = vrot.lane.b32.xlu1 %v10692_v21, %s10017_s1 }
 0x284   :  { %1639 = vrot.lane.b32.xlu0 %v10713_v36, %s10018_s21  ;;  %1625 = vrot.lane.b32.xlu1 %v10692_v21, %s10018_s21 }
 0x288   :  { %1533 = vrot.lane.b32.xlu0 %v10713_v36, %s10017_s1  ;;  %1356 = vrot.lane.b32.xlu1 %v10692_v21, %s10019_s22 }
 0x28c   :  { %1476 = vrot.lane.b32.xlu0 %v10713_v36, %s10020_s23  ;;  %1462 = vrot.lane.b32.xlu1 %v10692_v21, %s10020_s23 }
 0x290   :  { %1370 = vrot.lane.b32.xlu0 %v10713_v36, %s10019_s22  ;;  %1195 = vrot.lane.b32.xlu1 %v10692_v21, %s10007_s0 }
 0x292   :  { %v1512_v27 = vpop.permute.xlu1 %1511 }
 0x294   :  { %1314 = vrot.lane.b32.xlu0 %v10713_v36, %s10010_s27  ;;  %1300 = vrot.lane.b32.xlu1 %v10692_v21, %s10010_s27 }
 0x296   :  { %v10856_v23 = vpop.permute.xlu1 %1515  ;;  %v10858_v31 = vpop.permute.xlu0 %1507 }
 0x297   :  { %v10863_v22 = vsel %vm1535_vm10, %v1512_v27, %v10856_v23  ;;  %v10868_v37 = vsel %vm1535_vm10, %v10858_v31, %v1512_v27 }
 0x298   :  { %v1565_v40 = vrot.slane %v10863_v22, 4  ;;  %v1564_v42 = vrot.slane %v10868_v37, 4  ;;  %1032 = vrot.lane.b32.xlu1 %v10692_v21, %s10012_s29  ;;  %1629 = vrot.lane.b32.xlu0 %v10747_v19, %s10018_s21 }
 0x29a   :  { %1600 = vst [vmem:[#allocation3 + $0x2a0] sm:$0xf0] %v1565_v40  ;;  %1599 = vst [vmem:[#allocation3 + $0x280] sm:$0xf0] %v1564_v42  ;;  %v10881_v26 = vpop.permute.xlu1 %1621  ;;  %v1618_v51 = vpop.permute.xlu0 %1617 }
 0x29b   :  { %v10886_v52 = vsel %vm1641_vm11, %v1618_v51, %v10881_v26 }
 0x29c   :  { %1138 = vrot.lane.b32.xlu1 %v10692_v21, %s10021_s24  ;;  %1466 = vrot.lane.b32.xlu0 %v10747_v19, %s10020_s23 }
 0x29e   :  { %v1349_v55 = vpop.permute.xlu1 %1348  ;;  %v10892_v54 = vpop.permute.xlu0 %1613 }
 0x29f   :  { %v10897_v50 = vsel %vm1641_vm11, %v10892_v54, %v1618_v51 }
 0x2a0   :  { %1304 = vrot.lane.b32.xlu0 %v10747_v19, %s10010_s27  ;;  %1523 = vrot.lane.b32.xlu1 %v10747_v19, %s10017_s1 }
 0x2a2   :  { %v10904_v21 = vpop.permute.xlu1 %1352  ;;  %v10906_v46 = vpop.permute.xlu0 %1344 }
 0x2a3   :  { %v10911_v61 = vsel %vm1372_vm12, %v1349_v55, %v10904_v21  ;;  %v10916_v25 = vsel %vm1372_vm12, %v10906_v46, %v1349_v55 }
 0x2a4   :  { %v1402_v63 = vrot.slane %v10911_v61, 4  ;;  %v1401_v3 = vrot.slane %v10916_v25, 4  ;;  %1142 = vrot.lane.b32.xlu0 %v10747_v19, %s10021_s24  ;;  %1360 = vrot.lane.b32.xlu1 %v10747_v19, %s10019_s22 }
 0x2a6   :  { %1437 = vst [vmem:[#allocation3 + $0x1f8] sm:$0xf0] %v1402_v63  ;;  %1436 = vst [vmem:[#allocation3 + $0x98] sm:$0xf0] %v1401_v3  ;;  %v10929_v45 = vpop.permute.xlu1 %1458  ;;  %v1455_v4 = vpop.permute.xlu0 %1454 }
 0x2a7   :  { %v10934_v5 = vsel %vm1478_vm13, %v1455_v4, %v10929_v45 }
 0x2a8   :  { %1199 = vrot.lane.b32.xlu1 %v10747_v19, %s10007_s0  ;;  %1637 = vrot.lane.b32.xlu0 %v10741_v2, %s10018_s21 }
 0x2aa   :  { %v1188_v11 = vpop.permute.xlu1 %1187  ;;  %v10940_v10 = vpop.permute.xlu0 %1450 }
 0x2ab   :  { %v10945_v53 = vsel %vm1478_vm13, %v10940_v10, %v1455_v4 }
 0x2ac   :  { %1036 = vrot.lane.b32.xlu1 %v10747_v19, %s10012_s29  ;;  %1474 = vrot.lane.b32.xlu0 %v10741_v2, %s10020_s23 }
 0x2ae   :  { %v10951_v7 = vpop.permute.xlu1 %1191  ;;  %v10953_v0 = vpop.permute.xlu0 %1183 }
 0x2af   :  { %v10958_v13 = vsel %vm339_vm1, %v1188_v11, %v10951_v7  ;;  %v10963_v14 = vsel %vm339_vm1, %v10953_v0, %v1188_v11 }
 0x2b0   :  { %v1240_v17 = vrot.slane %v10958_v13, 4  ;;  %v1239_v34 = vrot.slane %v10963_v14, 4  ;;  %1527 = vrot.lane.b32.xlu1 %v10749_v20, %s10017_s1  ;;  %1521 = vrot.lane.b32.xlu0 %v10782_v39, %s10017_s1 }
 0x2b2   :  { %1275 = vst [vmem:[#allocation3 + $0x160] sm:$0xf0] %v1240_v17  ;;  %1274 = vst [vmem:[#allocation3 + $0x138] sm:$0xf0] %v1239_v34  ;;  %v10975_v19 = vpop.permute.xlu1 %1296  ;;  %v1293_v48 = vpop.permute.xlu0 %1292 }
 0x2b3   :  { %v10980_v58 = vsel %vm439_vm3, %v1293_v48, %v10975_v19 }
 0x2b4   :  { %1531 = vrot.lane.b32.xlu1 %v10741_v2, %s10017_s1  ;;  %1209 = vrot.lane.b32.xlu0 %v10713_v36, %s10007_s0 }
 0x2b6   :  { %v1025_v28 = vpop.permute.xlu1 %1024  ;;  %v10986_v62 = vpop.permute.xlu0 %1288 }
 0x2b7   :  { %v10991_v60 = vsel %vm439_vm3, %v10986_v62, %v1293_v48 }
 0x2b8   :  { %1633 = vrot.lane.b32.xlu1 %v10749_v20, %s10018_s21  ;;  %1358 = vrot.lane.b32.xlu0 %v10782_v39, %s10019_s22 }
 0x2ba   :  { %v10997_v49 = vpop.permute.xlu1 %1028  ;;  %v10999_v44 = vpop.permute.xlu0 %1020 }
 0x2bb   :  { %v11004_v38 = vsel %vm160_vm6, %v1025_v28, %v10997_v49  ;;  %v11009_v32 = vsel %vm160_vm6, %v10999_v44, %v1025_v28 }
 0x2bc   :  { %v1078_v15 = vrot.slane %v11004_v38, 4  ;;  %v1077_v33 = vrot.slane %v11009_v32, 4  ;;  %1364 = vrot.lane.b32.xlu1 %v10749_v20, %s10019_s22  ;;  %1197 = vrot.lane.b32.xlu0 %v10782_v39, %s10007_s0 }
 0x2be   :  { %1113 = vst [vmem:[#allocation3 + $0x300] sm:$0xf0] %v1078_v15  ;;  %1112 = vst [vmem:[#allocation3 + $0x78] sm:$0xf0] %v1077_v33  ;;  %v11022_v8 = vpop.permute.xlu1 %1134  ;;  %v1131_v43 = vpop.permute.xlu0 %1130 }
 0x2bf   :  { %v11027_v12 = vsel %vm1154_vm14, %v1131_v43, %v11022_v8 }
 0x2c0   :  { %1368 = vrot.lane.b32.xlu1 %v10741_v2, %s10019_s22  ;;  %1312 = vrot.lane.b32.xlu0 %v10741_v2, %s10010_s27 }
 0x2c2   :  { %v1620_v35 = vpop.permute.xlu1 %1619  ;;  %v11033_v29 = vpop.permute.xlu0 %1126 }
 0x2c3   :  { %14449 = vst [vmem:[#allocation10_spill] sm:$0xff] %v11033_v29  ;;  %v11038_v59 = vsel %vm1154_vm14, %v11033_v29, %v1131_v43 }
 0x2c4   :  { %1470 = vrot.lane.b32.xlu1 %v10749_v20, %s10020_s23  ;;  %1034 = vrot.lane.b32.xlu0 %v10782_v39, %s10012_s29 }
 0x2c5   :  { %v1682_v38 = vld [vmem:[#allocation3 + $0x300] sm:$0xff] }
 0x2c6   :  { %v11044_v1 = vpop.permute.xlu1 %1615  ;;  %v11046_v56 = vpop.permute.xlu0 %1623 }
 0x2c7   :  { %v1653_v57 = vsel %vm1641_vm11, %v11044_v1, %v1620_v35  ;;  %v1651_v27 = vsel %vm1641_vm11, %v1620_v35, %v11046_v56 }
 0x2c8   :  { %1663 = vst [vmem:[#allocation3 + $0x278] sm:$0xf] %v1653_v57  ;;  %1664 = vst [vmem:[#allocation3 + $0x140] sm:$0xf] %v1651_v27  ;;  %1203 = vrot.lane.b32.xlu1 %v10749_v20, %s10007_s0  ;;  %1631 = vrot.lane.b32.xlu0 %v10793_v47, %s10018_s21 }
 0x2ca   :  { %v11058_v51 = vpop.permute.xlu1 %1509  ;;  %v1514_v55 = vpop.permute.xlu0 %1513 }
 0x2cb   :  { %v1547_v4 = vsel %vm1535_vm10, %v11058_v51, %v1514_v55 }
 0x2cc   :  { %v1571_v11 = vrot.slane %v1547_v4, 4  ;;  %1627 = vrot.lane.b32.xlu1 %v10782_v39, %s10018_s21  ;;  %1525 = vrot.lane.b32.xlu0 %v10793_v47, %s10017_s1 }
 0x2ce   :  { %v1572_v48 = vsel %vm1076_vm15, %v1564_v42, %v1571_v11  ;;  %v1457_v28 = vpop.permute.xlu1 %1456  ;;  %v11070_v43 = vpop.permute.xlu0 %1517 }
 0x2cf   :  { %v1545_v35 = vsel %vm1535_vm10, %v1514_v55, %v11070_v43  ;;  %v1766_v57 = vld [vmem:[#allocation3 + $0x140] sm:$0xf]  ;;  %v1765_v27 = vld [vmem:[#allocation3 + $0x278] sm:$0xf] }
 0x2d0   :  { %v1573_v4 = vrot.slane %v1545_v35, 4  ;;  %1464 = vrot.lane.b32.xlu1 %v10782_v39, %s10020_s23  ;;  %1468 = vrot.lane.b32.xlu0 %v10793_v47, %s10020_s23 }
 0x2d1   :  { %7967 = vmatprep.subr.msk.mxu0 %vm1076_vm15, %v1766_v57 }
 0x2d2   :  { %v1574_v37 = vsel %vm1076_vm15, %v1565_v40, %v1573_v4  ;;  %7968 = vmatpush1.msk.msra.mxu0 %vm1076_vm15, %v1765_v27  ;;  %v11084_v42 = vpop.permute.xlu1 %1452  ;;  %v11086_v55 = vpop.permute.xlu0 %1460 }
 0x2d3   :  { %v1490_v11 = vsel %vm1478_vm13, %v11084_v42, %v1457_v28  ;;  %1836 = vmatprep.subr.mxu0 %v10886_v52  ;;  %v1488_v35 = vsel %vm1478_vm13, %v1457_v28, %v11086_v55 }
 0x2d4   :  { %1500 = vst [vmem:[#allocation3 + $0x280] sm:$0xf] %v1490_v11  ;;  %1501 = vst [vmem:[#allocation3 + $0x2a0] sm:$0xf] %v1488_v35  ;;  %1837 = vmatpush1.msra.mxu0 %v10897_v50  ;;  %1207 = vrot.lane.b32.xlu1 %v10741_v2, %s10007_s0 }
 0x2d5   :  { %1362 = vrot.lane.b32.xlu0 %v10793_v47, %s10019_s22  ;;  %1838 = vmatprep.subr.mxu0 %v1574_v37 }
 0x2d6   :  { %v11100_v22 = vpop.permute.xlu1 %1346  ;;  %v1351_v40 = vpop.permute.xlu0 %1350  ;;  %1839 = vmatpush1.msra.mxu0 %v1572_v48 }
 0x2d7   :  { %v1384_v52 = vsel %vm1372_vm12, %v11100_v22, %v1351_v40 }
 0x2d8   :  { %v1408_v28 = vrot.slane %v1384_v52, 4  ;;  %1302 = vrot.lane.b32.xlu1 %v10782_v39, %s10010_s27 }
 0x2d9   :  { %1306 = vrot.lane.b32.xlu0 %v10793_v47, %s10010_s27 }
 0x2da   :  { %v1409_v50 = vsel %vm1076_vm15, %v1401_v3, %v1408_v28  ;;  %v1295_v57 = vpop.permute.xlu1 %1294  ;;  %v11112_v27 = vpop.permute.xlu0 %1354 }
 0x2db   :  { %v1382_v48 = vsel %vm1372_vm12, %v1351_v40, %v11112_v27  ;;  %v1745_v4 = vld [vmem:[#allocation3 + $0x2a0] sm:$0xff] }
 0x2dc   :  { %v1744_v37 = vld [vmem:[#allocation3 + $0x280] sm:$0xff]  ;;  %v1410_v11 = vrot.slane %v1382_v48, 4  ;;  %1140 = vrot.lane.b32.xlu1 %v10782_v39, %s10021_s24  ;;  %1840 = vmatprep.subr.mxu0 %v1745_v4 }
 0x2dd   :  { %1201 = vrot.lane.b32.xlu0 %v10793_v47, %s10007_s0  ;;  %1841 = vmatpush1.msra.mxu0 %v1744_v37 }
 0x2de   :  { %v1411_v25 = vsel %vm1076_vm15, %v1402_v63, %v1410_v11  ;;  %v11124_v3 = vpop.permute.xlu1 %1290  ;;  %v11126_v35 = vpop.permute.xlu0 %1298  ;;  %1842 = vmatprep.subr.mxu0 %v10934_v5 }
 0x2df   :  { %v1327_v40 = vsel %vm439_vm3, %v11124_v3, %v1295_v57  ;;  %v1325_v39 = vsel %vm439_vm3, %v1295_v57, %v11126_v35  ;;  %1843 = vmatpush1.msra.mxu0 %v10945_v53 }
 0x2e0   :  { %1337 = vst [vmem:[#allocation3 + $0x98] sm:$0xf] %v1327_v40  ;;  %1338 = vst [vmem:[#allocation3 + $0x1f8] sm:$0xf] %v1325_v39  ;;  %1308 = vrot.lane.b32.xlu1 %v10749_v20, %s10010_s27  ;;  %1844 = vmatprep.subr.mxu0 %v1411_v25 }
 0x2e1   :  { %1144 = vrot.lane.b32.xlu0 %v10793_v47, %s10021_s24  ;;  %1845 = vmatpush1.msra.mxu0 %v1409_v50 }
 0x2e2   :  { %v11140_v61 = vpop.permute.xlu1 %1185  ;;  %v1190_v63 = vpop.permute.xlu0 %1189 }
 0x2e3   :  { %v1222_v5 = vsel %vm339_vm1, %v11140_v61, %v1190_v63 }
 0x2e4   :  { %v1246_v52 = vrot.slane %v1222_v5, 4  ;;  %1040 = vrot.lane.b32.xlu1 %v10749_v20, %s10012_s29 }
 0x2e5   :  { %1038 = vrot.lane.b32.xlu0 %v10793_v47, %s10012_s29 }
 0x2e6   :  { %v1247_v53 = vsel %vm1076_vm15, %v1239_v34, %v1246_v52  ;;  %v1133_v28 = vpop.permute.xlu1 %1132  ;;  %v11152_v50 = vpop.permute.xlu0 %1193 }
 0x2e7   :  { %v1220_v57 = vsel %vm339_vm1, %v1190_v63, %v11152_v50  ;;  %v1724_v48 = vld [vmem:[#allocation3 + $0x1f8] sm:$0xff] }
 0x2e8   :  { %v1723_v4 = vld [vmem:[#allocation3 + $0x98] sm:$0xff]  ;;  %v1248_v37 = vrot.slane %v1220_v57, 4  ;;  %1635 = vrot.lane.b32.xlu1 %v10795_v30, %s10018_s21  ;;  %1846 = vmatprep.subr.mxu0 %v1724_v48 }
 0x2e9   :  { %1152 = vrot.lane.b32.xlu0 %v10713_v36, %s10021_s24  ;;  %1847 = vmatpush1.msra.mxu0 %v1723_v4 }
 0x2ea   :  { %v1249_v47 = vsel %vm1076_vm15, %v1240_v17, %v1248_v37  ;;  %v11164_v14 = vpop.permute.xlu1 %1128  ;;  %v11166_v34 = vpop.permute.xlu0 %1136  ;;  %1848 = vmatprep.subr.mxu0 %v10980_v58 }
 0x2eb   :  { %v1166_v11 = vsel %vm1154_vm14, %v11164_v14, %v1133_v28  ;;  %v1164_v25 = vsel %vm1154_vm14, %v1133_v28, %v11166_v34  ;;  %1849 = vmatpush1.msra.mxu0 %v10991_v60 }
 0x2ec   :  { %1176 = vst [vmem:[#allocation3 + $0x138] sm:$0xf] %v1166_v11  ;;  %1177 = vst [vmem:[#allocation3 + $0x160] sm:$0xf] %v1164_v25  ;;  %1472 = vrot.lane.b32.xlu1 %v10795_v30, %s10020_s23  ;;  %1850 = vmatprep.subr.mxu0 %v1249_v47 }
 0x2ed   :  { %1529 = vrot.lane.b32.xlu0 %v10795_v30, %s10017_s1  ;;  %1851 = vmatpush1.msra.mxu0 %v1247_v53 }
 0x2ee   :  { %v11180_v13 = vpop.permute.xlu1 %1022  ;;  %v1027_v17 = vpop.permute.xlu0 %1026 }
 0x2ef   :  { %v1059_v58 = vsel %vm160_vm6, %v11180_v13, %v1027_v17 }
 0x2f0   :  { %v1084_v40 = vrot.slane %v1059_v58, 4  ;;  %1044 = vrot.lane.b32.xlu1 %v10741_v2, %s10012_s29 }
 0x2f1   :  { %1366 = vrot.lane.b32.xlu0 %v10795_v30, %s10019_s22 }
 0x2f2   :  { %v1085_v60 = vsel %vm1076_vm15, %v1077_v33, %v1084_v40  ;;  %v11192_v39 = vpop.permute.xlu1 %1519  ;;  %v11194_v63 = vpop.permute.xlu0 %1030 }
 0x2f3   :  { %v11200_v5 = vsel %vm1535_vm10, %v10856_v23, %v11192_v39  ;;  %v1057_v52 = vsel %vm160_vm6, %v1027_v17, %v11194_v63  ;;  %v1703_v53 = vld [vmem:[#allocation3 + $0x160] sm:$0xff]  ;;  %v1702_v28 = vld [vmem:[#allocation3 + $0x138] sm:$0xff] }
 0x2f4   :  { %v14426_v32 = vrot.slane %v11200_v5, 4  ;;  %v1086_v57 = vrot.slane %v1057_v52, 4  ;;  %1310 = vrot.lane.b32.xlu1 %v10795_v30, %s10010_s27  ;;  %1852 = vmatprep.subr.mxu0 %v1703_v53 }
 0x2f5   :  { %1046 = vrot.lane.b32.xlu0 %v10713_v36, %s10012_s29  ;;  %1853 = vmatpush1.msra.mxu0 %v1702_v28  ;;  %v11327_v28 = vld [vmem:[%s14409_s3 + $0x18] sm:$0xff] }
 0x2f6   :  { %1601 = vst [vmem:[#allocation3 + $0x110] sm:$0xf0] %v14426_v32  ;;  %v1087_v23 = vsel %vm1076_vm15, %v1078_v15, %v1086_v57  ;;  %v11215_v33 = vpop.permute.xlu1 %1625  ;;  %v11217_v48 = vpop.permute.xlu0 %1639  ;;  %1854 = vmatprep.subr.mxu0 %v11027_v12  ;;  %v1681_v12 = vld [vmem:[#allocation3 + $0x78] sm:$0xff]  ;;  %14451 = vst [vmem:[#allocation12_spill] sm:$0xff] %v11327_v28 }
 0x2f7   :  { %v11224_v4 = vsel %vm1641_vm11, %v10881_v26, %v11215_v33  ;;  %v1655_v36 = vsel %vm1641_vm11, %v11217_v48, %v11044_v1  ;;  %1855 = vmatpush1.msra.mxu0 %v11038_v59  ;;  %v11248_v1 = vld [vmem:[%s14409_s3] sm:$0xff] }
 0x2f8   :  { %1669 = vst [vmem:[#allocation3 + $0x218] sm:$0xf] %v1655_v36  ;;  %1148 = vrot.lane.b32.xlu1 %v10795_v30, %s10021_s24  ;;  %1856 = vmatprep.subr.mxu0 %v1087_v23 }
 0x2f9   :  { %1205 = vrot.lane.b32.xlu0 %v10795_v30, %s10007_s0  ;;  %1857 = vmatpush1.msra.mxu0 %v1085_v60 }
 0x2fa   :  { %v11235_v15 = vpop.permute.xlu1 %1356  ;;  %v11237_v26 = vpop.permute.xlu0 %1533  ;;  %1858 = vmatprep.subr.mxu0 %v1682_v38 }
 0x2fb   :  { %v11243_v59 = vsel %vm1372_vm12, %v10904_v21, %v11235_v15  ;;  %1859 = vmatpush1.msra.mxu0 %v1681_v12  ;;  %v1772_v21 = vld [vmem:[%s14410_s4] sm:$0xff] }
 0x2fc   :  { %v14425_v37 = vrot.slane %v11243_v59, 4  ;;  %1146 = vrot.lane.b32.xlu1 %v10749_v20, %s10021_s24  ;;  %1860 = vmatprep.subr.mxu0 %v10592_v41 }
 0x2fd   :  { %1042 = vrot.lane.b32.xlu0 %v10795_v30, %s10012_s29  ;;  %1861 = vmatpush1.msra.mxu0 %v10609_v24  ;;  %v11279_v24 = vld [vmem:[%s14409_s3 + $0x8] sm:$0xff]  ;;  %v1774_v30 = vld [vmem:[%s14410_s4 + $0x10] sm:$0xff] }
 0x2fe   :  { %1438 = vst [vmem:[#allocation3 + $0x2e0] sm:$0xf0] %v14425_v37  ;;  %v1463_v47 = vpop.permute.xlu1 %1462  ;;  %v11262_v11 = vpop.permute.xlu0 %1476  ;;  %7969 = vmatmul.mubr.msk.f32.vlgmr.msra.gmra.mxu0 %vm1796_vm0, %v11248_v1 }
 0x2ff   :  { %v11269_v41 = vsel %vm1478_vm13, %v10929_v45, %v1463_v47  ;;  %v1492_v20 = vsel %vm1478_vm13, %v11262_v11, %v11084_v42  ;;  %1900 = vmatprep.mubr.f32.mxu0 %v14419_v16  ;;  %v1773_v42 = vld [vmem:[%s14410_s4 + $0x8] sm:$0xff] }
 0x300   :  { %1506 = vst [vmem:[#allocation3 + $0x2d8] sm:$0xf] %v1492_v20  ;;  %1778 = vperm.xlu1 %8985, %v1772_v21  }
 0x301   :  { %1150 = vrot.lane.b32.xlu0 %v10741_v2, %s10021_s24  ;;  %v11302_v2 = vld [vmem:[%s14409_s3 + $0x10] sm:$0xff] }
 0x302   :  { %v1196_v45 = vpop.permute.xlu1 %1195  ;;  %v11286_v25 = vpop.permute.xlu0 %1370  ;;  %7970 = vmatmul.mubr.msk.f32.gmra.mxu0 %vm1796_vm0, %v11279_v24  ;;  %14450 = vst [vmem:[#allocation11_spill] sm:$0xff] %v11302_v2 }
 0x303   :  { %v11296_v17 = vsel %vm339_vm1, %v10951_v7, %v1196_v45  ;;  %1906 = vmatprep.mubr.f32.mxu0 %v14419_v16  ;;  %v1775_v7 = vld [vmem:[%s14410_s4 + $0x18] sm:$0xff] }
 0x304   :  { %v14423_v58 = vrot.slane %v11296_v17, 4  ;;  %1788 = vperm.xlu1 %8985, %v1774_v30  }
 0x305   :  { %1783 = vperm.xlu0 %8984, %v1773_v42  }
 0x306   :  { %1276 = vst [vmem:[#allocation3 + $0xa0] sm:$0xf0] %v14423_v58  ;;  %v1301_v40 = vpop.permute.xlu1 %1300  ;;  %v11307_v60 = vpop.permute.xlu0 %1314  ;;  %7971 = vmatmul.mubr.msk.f32.gmra.mxu0 %vm1796_vm0, %v11302_v2 }
 0x307   :  { %v11317_v52 = vsel %vm439_vm3, %v10975_v19, %v1301_v40  ;;  %v1329_v53 = vsel %vm439_vm3, %v11307_v60, %v11124_v3  ;;  %1912 = vmatprep.mubr.f32.mxu0 %v14419_v16 }
 0x308   :  { %1343 = vst [vmem:[#allocation3 + $0x268] sm:$0xf] %v1329_v53 }
 0x309   :  { %1793 = vperm.xlu0 %8984, %v1775_v7  }
 0x30a   :  { %v1033_v57 = vpop.permute.xlu1 %1032  ;;  %v1630_v23 = vpop.permute.xlu0 %1629  ;;  %7972 = vmatmul.mubr.msk.f32.gmra.mxu0 %vm1796_vm0, %v11327_v28 }
 0x30b   :  { %v11334_v19 = vsel %vm160_vm6, %v10997_v49, %v1033_v57  ;;  %v11339_v3 = vsel %vm1641_vm11, %v11215_v33, %v1630_v23  ;;  %2072 = vmatprep.mubr.f32.mxu0 %v14419_v16 }
 0x30c   :  { %v14422_v36 = vrot.slane %v11334_v19, 4 }
 0x30e   :  { %1114 = vst [vmem:[#allocation3 + $0x130] sm:$0xf0] %v14422_v36  ;;  %v1139_v38 = vpop.permute.xlu1 %1138  ;;  %v11345_v12 = vpop.permute.xlu0 %1466 }
 0x30f   :  { %v11350_v49 = vsel %vm1154_vm14, %v11022_v8, %v1139_v38  ;;  %v11355_v33 = vsel %vm1478_vm13, %v1463_v47, %v11345_v12 }
 0x312   :  { %v1524_v21 = vpop.permute.xlu1 %1523  ;;  %v11357_v20 = vpop.permute.xlu0 %1304 }
 0x313   :  { %v11362_v30 = vsel %vm1535_vm10, %v11192_v39, %v1524_v21  ;;  %v11367_v42 = vsel %vm439_vm3, %v1301_v40, %v11357_v20 }
 0x314   :  { %v14421_v8 = vrot.slane %v11362_v30, 4 }
 0x316   :  { %1602 = vst [vmem:[#allocation3 + $0x58] sm:$0xf0] %v14421_v8  ;;  %v1361_v47 = vpop.permute.xlu1 %1360  ;;  %v11372_v7 = vpop.permute.xlu0 %1142 }
 0x317   :  { %14452 = vst [vmem:[#allocation13_spill] sm:$0xff] %v11372_v7  ;;  %v11377_v53 = vsel %vm1372_vm12, %v11235_v15, %v1361_v47  ;;  %v11382_v39 = vsel %vm1154_vm14, %v1139_v38, %v11372_v7 }
 0x318   :  { %v14424_v40 = vrot.slane %v11377_v53, 4 }
 0x31a   :  { %1439 = vst [vmem:[#allocation3 + $0x200] sm:$0xf0] %v14424_v40  ;;  %v11387_v16 = vpop.permute.xlu1 %1199  ;;  %v1638_v8 = vpop.permute.xlu0 %1637 }
 0x31b   :  { %v11392_v36 = vsel %vm339_vm1, %v1196_v45, %v11387_v16  ;;  %v11397_v15 = vsel %vm1641_vm11, %v1638_v8, %v10892_v54 }
 0x31c   :  { %v14427_v38 = vrot.slane %v11392_v36, 4 }
 0x31e   :  { %1277 = vst [vmem:[#allocation3 + $0x2e8] sm:$0xf0] %v14427_v38  ;;  %v11402_v58 = vpop.permute.xlu1 %1036  ;;  %v1475_v40 = vpop.permute.xlu0 %1474 }
 0x31f   :  { %v11407_v37 = vsel %vm160_vm6, %v1033_v57, %v11402_v58  ;;  %v11412_v45 = vsel %vm1478_vm13, %v1475_v40, %v10940_v10  ;;  %v1549_v10 = vsel %vm1535_vm10, %v11237_v26, %v11058_v51 }
 0x320   :  { %14453 = vst [vmem:[#allocation14_spill] sm:$0xff] %v11412_v45  ;;  %v14434_v54 = vrot.slane %v11407_v37, 4  ;;  %v1583_v51 = vrot.slane %v1549_v10, 4 }
 0x322   :  { %1115 = vst [vmem:[#allocation3 + $0xe8] sm:$0xf0] %v14434_v54  ;;  %v1528_v32 = vpop.permute.xlu1 %1527  ;;  %v1522_v38 = vpop.permute.xlu0 %1521  ;;  %v14454_v54 = vrot.slane %v11200_v5, 4 }
 0x323   :  { %v11419_v6 = vsel %vm1535_vm10, %v1524_v21, %v1528_v32  ;;  %v1543_v57 = vsel %vm1535_vm10, %v11070_v43, %v1522_v38 }
 0x324   :  { %v14439_v9 = vrot.slane %v11419_v6, 4  ;;  %v1575_v28 = vrot.slane %v1543_v57, 4 }
 0x326   :  { %1603 = vst [vmem:[#allocation3 + $0x1f0] sm:$0xf0] %v14439_v9  ;;  %v11434_v21 = vsel %vm1076_vm15, %v14454_v54, %v1575_v28  ;;  %v1532_v29 = vpop.permute.xlu1 %1531  ;;  %v11436_v45 = vpop.permute.xlu0 %1209 }
 0x327   :  { %v11440_v43 = vsel %vm1535_vm10, %v1528_v32, %v1532_v29  ;;  %v1548_v57 = vsel %vm1535_vm10, %v1532_v29, %v10858_v31 }
 0x328   :  { %v14440_v2 = vrot.slane %v11440_v43, 4  ;;  %v1570_v9 = vrot.slane %v1548_v57, 4  ;;  %v14455_v57 = vrot.slane %v11243_v59, 4  ;;  %v1386_v59 = vsel %vm1372_vm12, %v11286_v25, %v11100_v22 }
 0x32a   :  { %v11447_v5 = vsel %vm1076_vm15, %v1570_v9, %v1583_v51  ;;  %1604 = vst [vmem:[#allocation3 + $0x1c8] sm:$0xf0] %v14440_v2  ;;  %1605 = vst [vmem:[#allocation3 + $0x2d8] sm:$0xf0] %v1570_v9  ;;  %v1634_v28 = vpop.permute.xlu1 %1633  ;;  %v11451_v54 = vpop.permute.xlu0 %1358 }
 0x32b   :  { %v11455_v32 = vsel %vm1641_vm11, %v1634_v28, %v1638_v8  ;;  %v11459_v31 = vsel %vm1641_vm11, %v1630_v23, %v1634_v28  ;;  %v1380_v29 = vsel %vm1372_vm12, %v11112_v27, %v11451_v54 }
 0x32c   :  { %v1412_v10 = vrot.slane %v1380_v29, 4  ;;  %v14456_v29 = vrot.slane %v11296_v17, 4  ;;  %v1420_v17 = vrot.slane %v1386_v59, 4 }
 0x32e   :  { %v11468_v9 = vsel %vm1076_vm15, %v14455_v57, %v1412_v10  ;;  %v1365_v51 = vpop.permute.xlu1 %1364  ;;  %v11470_v2 = vpop.permute.xlu0 %1197 }
 0x32f   :  { %v11474_v8 = vsel %vm1372_vm12, %v1361_v47, %v1365_v51  ;;  %v1218_v23 = vsel %vm339_vm1, %v11152_v50, %v11470_v2 }
 0x330   :  { %v14441_v27 = vrot.slane %v11474_v8, 4  ;;  %v1250_v28 = vrot.slane %v1218_v23, 4 }
 0x332   :  { %1440 = vst [vmem:[#allocation3 + $0x2f0] sm:$0xf0] %v14441_v27  ;;  %v11490_v47 = vsel %vm1076_vm15, %v14456_v29, %v1250_v28  ;;  %v1369_v10 = vpop.permute.xlu1 %1368  ;;  %v11492_v57 = vpop.permute.xlu0 %1312 }
 0x333   :  { %v11496_v50 = vsel %vm1372_vm12, %v1365_v51, %v1369_v10  ;;  %v1385_v23 = vsel %vm1372_vm12, %v1369_v10, %v10906_v46  ;;  %v11505_v22 = vsel %vm439_vm3, %v11492_v57, %v10986_v62 }
 0x334   :  { %14457 = vst [vmem:[#allocation15_spill] sm:$0xff] %v11505_v22  ;;  %v14443_v28 = vrot.slane %v11496_v50, 4  ;;  %v1407_v29 = vrot.slane %v1385_v23, 4  ;;  %v14460_v23 = vrot.slane %v11334_v19, 4 }
 0x336   :  { %v11509_v27 = vsel %vm1076_vm15, %v1407_v29, %v1420_v17  ;;  %1441 = vst [vmem:[#allocation3 + $0x8] sm:$0xf0] %v14443_v28  ;;  %1442 = vst [vmem:[#allocation3 + $0x268] sm:$0xf0] %v1407_v29  ;;  %v1471_v51 = vpop.permute.xlu1 %1470  ;;  %v11513_v7 = vpop.permute.xlu0 %1034 }
 0x337   :  { %14458 = vst [vmem:[#allocation16_spill] sm:$0xff] %v11509_v27  ;;  %v11517_v46 = vsel %vm1478_vm13, %v1471_v51, %v1475_v40  ;;  %v11522_v62 = vsel %vm1478_vm13, %v11345_v12, %v1471_v51  ;;  %v1055_v59 = vsel %vm160_vm6, %v11194_v63, %v11513_v7 }
 0x338   :  { %14459 = vst [vmem:[#allocation17_spill] sm:$0xff] %v11522_v62  ;;  %v1088_v10 = vrot.slane %v1055_v59, 4 }
 0x33a   :  { %v11531_v17 = vsel %vm1076_vm15, %v14460_v23, %v1088_v10  ;;  %v1204_v29 = vpop.permute.xlu1 %1203  ;;  %v11533_v28 = vpop.permute.xlu0 %1631  ;;  %v14461_v23 = vrot.slane %v11362_v30, 4  ;;  %v1224_v30 = vsel %vm339_vm1, %v11436_v45, %v11140_v61 }
 0x33b   :  { %v11538_v40 = vsel %vm339_vm1, %v11387_v16, %v1204_v29  ;;  %v14478_v18 = vld [vmem:[#allocation15_spill] sm:$0xff] }
 0x33c   :  { %v14444_v12 = vrot.slane %v11538_v40, 4 }
 0x33e   :  { %1278 = vst [vmem:[#allocation3 + $0x1b0] sm:$0xf0] %v14444_v12  ;;  %v1628_v63 = vpop.permute.xlu1 %1627  ;;  %v11543_v51 = vpop.permute.xlu0 %1525 }
 0x33f   :  { %v1647_v19 = vsel %vm1641_vm11, %v1628_v63, %v11533_v28  ;;  %v1649_v59 = vsel %vm1641_vm11, %v11046_v56, %v1628_v63  ;;  %v1541_v16 = vsel %vm1535_vm10, %v1522_v38, %v11543_v51 }
 0x340   :  { %1665 = vst [vmem:[#allocation3 + $0x128] sm:$0xf] %v1649_v59  ;;  %1666 = vst [vmem:[#allocation3 + $0x60] sm:$0xf] %v1647_v19  ;;  %v1577_v10 = vrot.slane %v1541_v16, 4 }
 0x342   :  { %v1578_v12 = vsel %vm1076_vm15, %v14461_v23, %v1577_v10  ;;  %v1465_v22 = vpop.permute.xlu1 %1464  ;;  %v11557_v27 = vpop.permute.xlu0 %1468 }
 0x343   :  { %v1486_v62 = vsel %vm1478_vm13, %v11086_v55, %v1465_v22  ;;  %v1484_v56 = vsel %vm1478_vm13, %v1465_v22, %v11557_v27 }
 0x344   :  { %1502 = vst [vmem:[#allocation3 + $0x110] sm:$0xf] %v1486_v62  ;;  %1503 = vst [vmem:[#allocation3 + $0x58] sm:$0xf] %v1484_v56  ;;  %v1258_v62 = vrot.slane %v1224_v30, 4  ;;  %v14462_v56 = vrot.slane %v11377_v53, 4 }
 0x346   :  { %v1208_v38 = vpop.permute.xlu1 %1207 }
 0x347   :  { %v11571_v63 = vsel %vm339_vm1, %v1204_v29, %v1208_v38  ;;  %v1223_v55 = vsel %vm339_vm1, %v1208_v38, %v10953_v0  ;;  %v11576_v19 = vpop.permute.xlu0 %1362  ;;  %v1768_v59 = vld [vmem:[#allocation3 + $0x60] sm:$0xf]  ;;  %v1767_v22 = vld [vmem:[#allocation3 + $0x128] sm:$0xf] }
 0x348   :  { %v1244_v16 = vrot.slane %v11571_v63, 4  ;;  %v1245_v10 = vrot.slane %v1223_v55, 4  ;;  %v1378_v61 = vsel %vm1372_vm12, %v11451_v54, %v11576_v19  ;;  %7973 = vmatprep.subr.msk.mxu1 %vm1076_vm15, %v1768_v59 }
 0x349   :  { %v1414_v29 = vrot.slane %v1378_v61, 4  ;;  %7974 = vmatpush1.msk.msra.mxu1 %vm1076_vm15, %v1767_v22 }
 0x34a   :  { %v11586_v0 = vsel %vm1076_vm15, %v1245_v10, %v1258_v62  ;;  %1279 = vst [vmem:[#allocation3 + $0x1c0] sm:$0xf0] %v1244_v16  ;;  %1280 = vst [vmem:[#allocation3 + $0x88] sm:$0xf0] %v1245_v10  ;;  %v1303_v23 = vpop.permute.xlu1 %1302  ;;  %1925 = vmatprep.subr.mxu1 %v11339_v3  ;;  %v14463_v62 = vrot.slane %v11392_v36, 4 }
 0x34b   :  { %v1415_v30 = vsel %vm1076_vm15, %v14462_v56, %v1414_v29  ;;  %v1323_v54 = vsel %vm439_vm3, %v11126_v35, %v1303_v23  ;;  %v11597_v38 = vpop.permute.xlu0 %1306  ;;  %1926 = vmatpush1.msra.mxu1 %v11224_v4  ;;  %v1747_v3 = vld [vmem:[#allocation3 + $0x58] sm:$0xff]  ;;  %v1746_v59 = vld [vmem:[#allocation3 + $0x110] sm:$0xff] }
 0x34c   :  { %1339 = vst [vmem:[#allocation3 + $0x2e0] sm:$0xf] %v1323_v54  ;;  %v1321_v55 = vsel %vm439_vm3, %v1303_v23, %v11597_v38  ;;  %1927 = vmatprep.subr.mxu1 %v1578_v12 }
 0x34d   :  { %1340 = vst [vmem:[#allocation3 + $0x200] sm:$0xf] %v1321_v55  ;;  %1928 = vmatpush1.msra.mxu1 %v11434_v21 }
 0x34e   :  { %v1141_v53 = vpop.permute.xlu1 %1140  ;;  %1929 = vmatprep.subr.mxu1 %v1747_v3 }
 0x34f   :  { %v1162_v35 = vsel %vm1154_vm14, %v11166_v34, %v1141_v53  ;;  %v11607_v22 = vpop.permute.xlu0 %1201  ;;  %1930 = vmatpush1.msra.mxu1 %v1746_v59 }
 0x350   :  { %1178 = vst [vmem:[#allocation3 + $0xa0] sm:$0xf] %v1162_v35  ;;  %v1216_v4 = vsel %vm339_vm1, %v11470_v2, %v11607_v22  ;;  %1931 = vmatprep.subr.mxu1 %v11355_v33 }
 0x351   :  { %v1252_v21 = vrot.slane %v1216_v4, 4  ;;  %1932 = vmatpush1.msra.mxu1 %v11269_v41 }
 0x352   :  { %v1309_v12 = vpop.permute.xlu1 %1308  ;;  %1933 = vmatprep.subr.mxu1 %v1415_v30  ;;  %v14464_v30 = vrot.slane %v11407_v37, 4 }
 0x353   :  { %v1253_v34 = vsel %vm1076_vm15, %v14463_v62, %v1252_v21  ;;  %v11621_v10 = vsel %vm439_vm3, %v1309_v12, %v11492_v57  ;;  %v11626_v2 = vsel %vm439_vm3, %v11357_v20, %v1309_v12  ;;  %v11628_v33 = vpop.permute.xlu0 %1144  ;;  %1934 = vmatpush1.msra.mxu1 %v11468_v9  ;;  %v1725_v41 = vld [vmem:[#allocation3 + $0x2e0] sm:$0xff]  ;;  %v14466_v12 = vrot.slane %v11440_v43, 4 }
 0x354   :  { %v1160_v36 = vsel %vm1154_vm14, %v1141_v53, %v11628_v33  ;;  %v1726_v61 = vld [vmem:[#allocation3 + $0x200] sm:$0xff] }
 0x355   :  { %1179 = vst [vmem:[#allocation3 + $0x2e8] sm:$0xf] %v1160_v36  ;;  %1935 = vmatprep.subr.mxu1 %v1726_v61 }
 0x356   :  { %v1041_v29 = vpop.permute.xlu1 %1040  ;;  %1936 = vmatpush1.msra.mxu1 %v1725_v41  ;;  %v1683_v41 = vld [vmem:[#allocation3 + $0x130] sm:$0xff] }
 0x357   :  { %v11637_v57 = vsel %vm160_vm6, %v11402_v58, %v1041_v29  ;;  %v11639_v20 = vpop.permute.xlu0 %1038  ;;  %1937 = vmatprep.subr.mxu1 %v11367_v42  ;;  %v1704_v55 = vld [vmem:[#allocation3 + $0xa0] sm:$0xff] }
 0x358   :  { %v1081_v9 = vrot.slane %v11637_v57, 4  ;;  %v1053_v23 = vsel %vm160_vm6, %v11513_v7, %v11639_v20  ;;  %1938 = vmatpush1.msra.mxu1 %v11317_v52  ;;  %v14477_v57 = vld [vmem:[#allocation12_spill] sm:$0xff] }
 0x359   :  { %v1090_v56 = vrot.slane %v1053_v23, 4  ;;  %1939 = vmatprep.subr.mxu1 %v1253_v34 }
 0x35a   :  { %1116 = vst [vmem:[#allocation3 + $0x40] sm:$0xf0] %v1081_v9  ;;  %v1636_v58 = vpop.permute.xlu1 %1635  ;;  %1940 = vmatpush1.msra.mxu1 %v11490_v47 }
 0x35b   :  { %v1091_v42 = vsel %vm1076_vm15, %v14464_v30, %v1090_v56  ;;  %v1643_v54 = vsel %vm1641_vm11, %v1636_v58, %v11217_v48  ;;  %v1645_v52 = vsel %vm1641_vm11, %v11533_v28, %v1636_v58  ;;  %v11660_v7 = vpop.permute.xlu0 %1152  ;;  %v1676_v56 = vld [vmem:[#allocation3 + $0x10] sm:$0xff]  ;;  %v14468_v30 = vrot.slane %v11496_v50, 4 }
 0x35c   :  { %1667 = vst [vmem:[#allocation3 + $0x1a8] sm:$0xf] %v1645_v52  ;;  %1668 = vst [vmem:[#allocation3 + $0x168] sm:$0xf] %v1643_v54  ;;  %v1168_v47 = vsel %vm1154_vm14, %v11660_v7, %v11164_v14  ;;  %v1705_v37 = vld [vmem:[#allocation3 + $0x2e8] sm:$0xff] }
 0x35d   :  { %1182 = vst [vmem:[#allocation3 + $0x88] sm:$0xf] %v1168_v47  ;;  %1941 = vmatprep.subr.mxu1 %v1705_v37 }
 0x35e   :  { %v1473_v3 = vpop.permute.xlu1 %1472  ;;  %1942 = vmatpush1.msra.mxu1 %v1704_v55 }
 0x35f   :  { %v1480_v48 = vsel %vm1478_vm13, %v1473_v3, %v11262_v11  ;;  %v1482_v28 = vsel %vm1478_vm13, %v11557_v27, %v1473_v3  ;;  %v1530_v53 = vpop.permute.xlu0 %1529  ;;  %1943 = vmatprep.subr.mxu1 %v11382_v39  ;;  %v1684_v27 = vld [vmem:[#allocation3 + $0xe8] sm:$0xff]  ;;  %v14465_v39 = vrot.slane %v11419_v6, 4 }
 0x360   :  { %1504 = vst [vmem:[#allocation3 + $0x1f0] sm:$0xf] %v1482_v28  ;;  %1505 = vst [vmem:[#allocation3 + $0x1c8] sm:$0xf] %v1480_v48  ;;  %v1537_v14 = vsel %vm1535_vm10, %v1530_v53, %v11237_v26  ;;  %v1539_v59 = vsel %vm1535_vm10, %v11543_v51, %v1530_v53  ;;  %1944 = vmatpush1.msra.mxu1 %v11350_v49 }
 0x361   :  { %v1579_v11 = vrot.slane %v1539_v59, 4  ;;  %v1581_v35 = vrot.slane %v1537_v14, 4  ;;  %1945 = vmatprep.subr.mxu1 %v1091_v42  ;;  %v14470_v14 = vrot.slane %v11538_v40, 4  ;;  %v14472_v40 = vld [vmem:[#allocation17_spill] sm:$0xff] }
 0x362   :  { %v1045_v4 = vpop.permute.xlu1 %1044  ;;  %1946 = vmatpush1.msra.mxu1 %v11531_v17 }
 0x363   :  { %v1580_v21 = vsel %vm1076_vm15, %v14465_v39, %v1579_v11  ;;  %v1582_v26 = vsel %vm1076_vm15, %v14466_v12, %v1581_v35  ;;  %v11689_v51 = vsel %vm160_vm6, %v1041_v29, %v1045_v4  ;;  %v1060_v49 = vsel %vm160_vm6, %v1045_v4, %v10999_v44  ;;  %v1367_v62 = vpop.permute.xlu0 %1366  ;;  %v1770_v34 = vld [vmem:[#allocation3 + $0x168] sm:$0xf]  ;;  %1947 = vmatprep.subr.mxu1 %v1684_v27  ;;  %v14471_v11 = vld [vmem:[#allocation13_spill] sm:$0xff] }
 0x364   :  { %v1769_v17 = vld [vmem:[#allocation3 + $0x1a8] sm:$0xf]  ;;  %v1082_v6 = vrot.slane %v11689_v51, 4  ;;  %v1083_v36 = vrot.slane %v1060_v49, 4  ;;  %v1374_v43 = vsel %vm1372_vm12, %v1367_v62, %v11286_v25  ;;  %v1376_v61 = vsel %vm1372_vm12, %v11576_v19, %v1367_v62  ;;  %7979 = vmatprep.subr.msk.mxu0 %vm1076_vm15, %v1770_v34  ;;  %1948 = vmatpush1.msra.mxu1 %v1683_v41  ;;  %v14476_v41 = vld [vmem:[#allocation16_spill] sm:$0xff] }
 0x365   :  { %v1677_v44 = vld [vmem:[#allocation3 + $0x48] sm:$0xff]  ;;  %v1416_v29 = vrot.slane %v1376_v61, 4  ;;  %v1418_v23 = vrot.slane %v1374_v43, 4  ;;  %7980 = vmatpush1.msk.msra.mxu0 %vm1076_vm15, %v1769_v17  ;;  %v14467_v25 = vrot.slane %v11474_v8, 4  ;;  %v1679_v43 = vld [vmem:[#allocation3 + $0xf0] sm:$0xff] }
 0x366   :  { %1949 = vmatprep.subr.mxu1 %v1677_v44  ;;  %1117 = vst [vmem:[#allocation3 + $0x2c0] sm:$0xf0] %v1082_v6  ;;  %1118 = vst [vmem:[#allocation3 + $0x2a8] sm:$0xf0] %v1083_v36  ;;  %v1311_v58 = vpop.permute.xlu1 %1310  ;;  %2014 = vmatprep.subr.mxu0 %v11455_v32  ;;  %v1771_v32 = vld [vmem:[#allocation3 + $0x218] sm:$0xf] }
 0x367   :  { %1950 = vmatpush1.msra.mxu1 %v1676_v56  ;;  %v1417_v19 = vsel %vm1076_vm15, %v14467_v25, %v1416_v29  ;;  %v1419_v42 = vsel %vm1076_vm15, %v14468_v30, %v1418_v23  ;;  %v1317_v54 = vsel %vm439_vm3, %v1311_v58, %v11307_v60  ;;  %v1319_v52 = vsel %vm439_vm3, %v11597_v38, %v1311_v58  ;;  %v1047_v47 = vpop.permute.xlu0 %1046  ;;  %v1749_v3 = vld [vmem:[#allocation3 + $0x1c8] sm:$0xff]  ;;  %v1680_v44 = vld [vmem:[#allocation3 + $0xf8] sm:$0xff]  ;;  %v2241_v29 = vld [vmem:[%s14411_s5 + $0xf8] sm:$0xff] }
 0x368   :  { %2015 = vmatpush1.msra.mxu0 %v11459_v31  ;;  %1341 = vst [vmem:[#allocation3 + $0x2f0] sm:$0xf] %v1319_v52  ;;  %1342 = vst [vmem:[#allocation3 + $0x8] sm:$0xf] %v1317_v54  ;;  %v1061_v8 = vsel %vm160_vm6, %v1047_v47, %v11180_v13  ;;  %7975 = vmatmul.mubr.msk.f32.vlgmr.msra.gmra.mxu1 %vm1796_vm0, %v11248_v1  ;;  %v14469_v31 = vmov 0.0   ;;  %v14473_v39 = vld [vmem:[#allocation11_spill] sm:$0xff] }
 0x369   :  { %8895 = vmatprep.subr.msk.mxu1 %vm1076_vm15, %v1771_v32  ;;  %v1096_v60 = vrot.slane %v1061_v8, 4  ;;  %2016 = vmatprep.subr.mxu0 %v1582_v26  ;;  %v14475_v34 = vld [vmem:[#allocation10_spill] sm:$0xff]  ;;  %v2225_v23 = vld [vmem:[%s14411_s5 + $0x78] sm:$0xff] }
 0x36a   :  { %8896 = vmatpush3.msk.msra.mxu1 %vm1076_vm15, %v1771_v32  ;;  %v1149_v50 = vpop.permute.xlu1 %1148  ;;  %1989 = vmatprep.mubr.f32.mxu1 %v14469_v31  ;;  %v2240_v56 = vld [vmem:[%s14411_s5 + $0xf0] sm:$0xff]  ;;  %v2273_v58 = vld [vmem:[%s14411_s5 + $0x1f8] sm:$0xff]  ;;  %v2239_v25 = vld [vmem:[%s14411_s5 + $0xe8] sm:$0xff] }
 0x36b   :  { %8897 = vmatprep.subr.mxu1 %v11397_v15  ;;  %v11729_v38 = vsel %vm1076_vm15, %v1083_v36, %v1096_v60  ;;  %v1156_v13 = vsel %vm1154_vm14, %v1149_v50, %v11660_v7  ;;  %v1158_v37 = vsel %vm1154_vm14, %v11628_v33, %v1149_v50  ;;  %v1206_v55 = vpop.permute.xlu0 %1205  ;;  %2017 = vmatpush1.msra.mxu0 %v1580_v21  ;;  %v1748_v33 = vld [vmem:[#allocation3 + $0x1f0] sm:$0xff]  ;;  %v14474_v21 = vld [vmem:[#allocation14_spill] sm:$0xff] }
 0x36c   :  { %8898 = vmatpush3.msra.mxu1 %v11397_v15  ;;  %1180 = vst [vmem:[#allocation3 + $0x1b0] sm:$0xf] %v1158_v37  ;;  %1181 = vst [vmem:[#allocation3 + $0x1c0] sm:$0xf] %v1156_v13  ;;  %v1212_v48 = vsel %vm339_vm1, %v1206_v55, %v11436_v45  ;;  %v1214_v28 = vsel %vm339_vm1, %v11607_v22, %v1206_v55  ;;  %2018 = vmatprep.subr.mxu0 %v1749_v3  ;;  %v1750_v45 = vld [vmem:[#allocation3 + $0x2d8] sm:$0xff]  ;;  %v1685_v36 = vld [vmem:[#allocation3 + $0x40] sm:$0xff] }
 0x36d   :  { %7976 = vmatmul.mubr.msk.f32.gmra.mxu1 %vm1796_vm0, %v11279_v24  ;;  %v1254_v7 = vrot.slane %v1214_v28, 4  ;;  %v1256_v53 = vrot.slane %v1212_v48, 4  ;;  %8899 = vmatprep.subr.mxu1 %v11447_v5  ;;  %v1687_v61 = vld [vmem:[#allocation3 + $0x2a8] sm:$0xff]  ;;  %v2257_v30 = vld [vmem:[%s14411_s5 + $0x178] sm:$0xff]  ;;  %v2271_v60 = vld [vmem:[%s14411_s5 + $0x1e8] sm:$0xff] }
 0x36e   :  { %2019 = vmatpush1.msra.mxu0 %v1748_v33  ;;  %v1147_v15 = vpop.permute.xlu1 %1146  ;;  %8900 = vmatpush3.msra.mxu1 %v11447_v5  ;;  %v2272_v54 = vld [vmem:[%s14411_s5 + $0x1f0] sm:$0xff]  ;;  %v2237_v52 = vld [vmem:[%s14411_s5 + $0xd8] sm:$0xff]  ;;  %v2270_v13 = vld [vmem:[%s14411_s5 + $0x1e0] sm:$0xff] }
 0x36f   :  { %2020 = vmatprep.subr.mxu0 %v11517_v46  ;;  %v1255_v22 = vsel %vm1076_vm15, %v14470_v14, %v1254_v7  ;;  %v1257_v59 = vsel %vm1076_vm15, %v1244_v16, %v1256_v53  ;;  %v1157_v35 = vsel %vm1154_vm14, %v14471_v11, %v1147_v15  ;;  %v1043_v4 = vpop.permute.xlu0 %1042  ;;  %8901 = vmatprep.subr.mxu1 %v1750_v45  ;;  %v1728_v63 = vld [vmem:[#allocation3 + $0x8] sm:$0xff]  ;;  %v1727_v12 = vld [vmem:[#allocation3 + $0x2f0] sm:$0xff]  ;;  %v2219_v37 = vld [vmem:[%s14411_s5 + $0x48] sm:$0xff] }
 0x370   :  { %1995 = vmatprep.mubr.f32.mxu1 %v14469_v31  ;;  %v1049_v5 = vsel %vm160_vm6, %v1043_v4, %v1047_v47  ;;  %v1051_v46 = vsel %vm160_vm6, %v11639_v20, %v1043_v4  ;;  %2021 = vmatpush1.msra.mxu0 %v14472_v40  ;;  %v2221_v47 = vld [vmem:[%s14411_s5 + $0x58] sm:$0xff]  ;;  %v2256_v32 = vld [vmem:[%s14411_s5 + $0x170] sm:$0xff]  ;;  %v2254_v55 = vld [vmem:[%s14411_s5 + $0x160] sm:$0xff] }
 0x371   :  { %8902 = vmatpush3.msra.mxu1 %v1750_v45  ;;  %v1092_v16 = vrot.slane %v1051_v46, 4  ;;  %v1094_v27 = vrot.slane %v1049_v5, 4  ;;  %2022 = vmatprep.subr.mxu0 %v1419_v42  ;;  %v2222_v42 = vld [vmem:[%s14411_s5 + $0x60] sm:$0xff]  ;;  %v2236_v8 = vld [vmem:[%s14411_s5 + $0xd0] sm:$0xff]  ;;  %v2269_v48 = vld [vmem:[%s14411_s5 + $0x1d8] sm:$0xff] }
 0x372   :  { %7977 = vmatmul.mubr.msk.f32.gmra.mxu1 %vm1796_vm0, %v14473_v39  ;;  %8903 = vmatprep.subr.mxu1 %v14474_v21  ;;  %v2220_v50 = vld [vmem:[%s14411_s5 + $0x50] sm:$0xff]  ;;  %v2234_v3 = vld [vmem:[%s14411_s5 + $0xc0] sm:$0xff]  ;;  %v2253_v33 = vld [vmem:[%s14411_s5 + $0x158] sm:$0xff] }
 0x373   :  { %2023 = vmatpush1.msra.mxu0 %v1417_v19  ;;  %v1093_v26 = vsel %vm1076_vm15, %v1081_v9, %v1092_v16  ;;  %v1095_v20 = vsel %vm1076_vm15, %v1082_v6, %v1094_v27  ;;  %8904 = vmatpush3.msra.mxu1 %v14474_v21  ;;  %v1151_v49 = vpop.permute.xlu0 %1150  ;;  %v1729_v9 = vld [vmem:[#allocation3 + $0x268] sm:$0xff]  ;;  %v1707_v51 = vld [vmem:[#allocation3 + $0x1c0] sm:$0xff]  ;;  %v1706_v6 = vld [vmem:[#allocation3 + $0x1b0] sm:$0xff] }
 0x374   :  { %2024 = vmatprep.subr.mxu0 %v1728_v63  ;;  %v1155_v62 = vsel %vm1154_vm14, %v1147_v15, %v1151_v49  ;;  %v1167_v17 = vsel %vm1154_vm14, %v1151_v49, %v14475_v34  ;;  %8905 = vmatprep.subr.mxu1 %v14476_v41  ;;  %v2223_v19 = vld [vmem:[%s14411_s5 + $0x68] sm:$0xff]  ;;  %v2218_v28 = vld [vmem:[%s14411_s5 + $0x40] sm:$0xff]  ;;  %v2233_v7 = vld [vmem:[%s14411_s5 + $0xb8] sm:$0xff] }
 0x375   :  { %2001 = vmatprep.mubr.f32.mxu1 %v14469_v31  ;;  %2025 = vmatpush1.msra.mxu0 %v1727_v12  ;;  %v2268_v53 = vld [vmem:[%s14411_s5 + $0x1d0] sm:$0xff]  ;;  %v2217_v15 = vld [vmem:[%s14411_s5 + $0x38] sm:$0xff]  ;;  %v2251_v11 = vld [vmem:[%s14411_s5 + $0x148] sm:$0xff] }
 0x376   :  { %8906 = vmatpush3.msra.mxu1 %v14476_v41  ;;  %2026 = vmatprep.subr.mxu0 %v11621_v10  ;;  %v1708_v10 = vld [vmem:[#allocation3 + $0x88] sm:$0xff]  ;;  %v2266_v4 = vld [vmem:[%s14411_s5 + $0x1c0] sm:$0xff]  ;;  %v2215_v5 = vld [vmem:[%s14411_s5 + $0x28] sm:$0xff] }
 0x377   :  { %7978 = vmatmul.mubr.msk.f32.gmra.mxu1 %vm1796_vm0, %v14477_v57  ;;  %8907 = vmatprep.subr.mxu1 %v1729_v9  ;;  %v2252_v45 = vld [vmem:[%s14411_s5 + $0x150] sm:$0xff]  ;;  %v2250_v46 = vld [vmem:[%s14411_s5 + $0x140] sm:$0xff]  ;;  %v2265_v63 = vld [vmem:[%s14411_s5 + $0x1b8] sm:$0xff] }
 0x378   :  { %2027 = vmatpush1.msra.mxu0 %v11626_v2  ;;  %8908 = vmatpush3.msra.mxu1 %v1729_v9  ;;  %v1686_v2 = vld [vmem:[#allocation3 + $0x2c0] sm:$0xff]  ;;  %v2232_v14 = vld [vmem:[%s14411_s5 + $0xb0] sm:$0xff]  ;;  %v2230_v40 = vld [vmem:[%s14411_s5 + $0xa0] sm:$0xff] }
 0x379   :  { %2028 = vmatprep.subr.mxu0 %v1257_v59  ;;  %8909 = vmatprep.subr.mxu1 %v14478_v18  ;;  %v2216_v59 = vld [vmem:[%s14411_s5 + $0x30] sm:$0xff]  ;;  %v2214_v16 = vld [vmem:[%s14411_s5 + $0x20] sm:$0xff]  ;;  %v2249_v27 = vld [vmem:[%s14411_s5 + $0x138] sm:$0xff] }
 0x37a   :  { %2029 = vmatpush1.msra.mxu0 %v1255_v22  ;;  %8910 = vmatpush3.msra.mxu1 %v14478_v18  ;;  %v2267_v22 = vld [vmem:[%s14411_s5 + $0x1c8] sm:$0xff]  ;;  %v2264_v21 = vld [vmem:[%s14411_s5 + $0x1b0] sm:$0xff]  ;;  %v2213_v12 = vld [vmem:[%s14411_s5 + $0x18] sm:$0xff] }
 0x37b   :  { %2030 = vmatprep.subr.mxu0 %v1707_v51  ;;  %8911 = vmatprep.subr.mxu1 %v11586_v0  ;;  %v2263_v49 = vld [vmem:[%s14411_s5 + $0x1a8] sm:$0xff]  ;;  %v2262_v41 = vld [vmem:[%s14411_s5 + $0x1a0] sm:$0xff]  ;;  %v2261_v51 = vld [vmem:[%s14411_s5 + $0x198] sm:$0xff] }
 0x37c   :  { %2031 = vmatpush1.msra.mxu0 %v1706_v6  ;;  %8912 = vmatpush3.msra.mxu1 %v11586_v0  ;;  %v1678_v0 = vld [vmem:[#allocation3 + $0x30] sm:$0xff]  ;;  %v2247_v34 = vld [vmem:[%s14411_s5 + $0x128] sm:$0xff]  ;;  %v2246_v9 = vld [vmem:[%s14411_s5 + $0x120] sm:$0xff] }
 0x37d   :  { %2032 = vmatprep.subr.mxu0 %v1155_v62  ;;  %8913 = vmatprep.subr.mxu1 %v1708_v10  ;;  %v2212_v62 = vld [vmem:[%s14411_s5 + $0x10] sm:$0xff]  ;;  %v2226_v18 = vld [vmem:[%s14411_s5 + $0x80] sm:$0xff] }
 0x37e   :  { %2033 = vmatpush1.msra.mxu0 %v1157_v35  ;;  %8914 = vmatpush3.msra.mxu1 %v1708_v10  ;;  %v2231_v35 = vld [vmem:[%s14411_s5 + $0xa8] sm:$0xff]  ;;  %v2210_v6 = vld [vmem:[%s14411_s5] sm:$0xff]  ;;  %v2245_v10 = vld [vmem:[%s14411_s5 + $0x118] sm:$0xff] }
 0x37f   :  { %2034 = vmatprep.subr.mxu0 %v1095_v20  ;;  %8915 = vmatprep.subr.mxu1 %v1167_v17  ;;  %v2228_v20 = vld [vmem:[%s14411_s5 + $0x90] sm:$0xff] }
 0x380   :  { %2035 = vmatpush1.msra.mxu0 %v1093_v26  ;;  %8916 = vmatpush3.msra.mxu1 %v1167_v17  ;;  %v2248_v26 = vld [vmem:[%s14411_s5 + $0x130] sm:$0xff]  ;;  %v2227_v17 = vld [vmem:[%s14411_s5 + $0x88] sm:$0xff] }
 0x381   :  { %2036 = vmatprep.subr.mxu0 %v1686_v2  ;;  %8917 = vmatprep.subr.mxu1 %v11729_v38  ;;  %v2260_v2 = vld [vmem:[%s14411_s5 + $0x190] sm:$0xff] }
 0x382   :  { %2037 = vmatpush1.msra.mxu0 %v1685_v36  ;;  %8918 = vmatpush3.msra.mxu1 %v11729_v38  ;;  %v2235_v38 = vld [vmem:[%s14411_s5 + $0xc8] sm:$0xff]  ;;  %v2244_v36 = vld [vmem:[%s14411_s5 + $0x110] sm:$0xff] }
 0x383   :  { %2038 = vmatprep.subr.mxu0 %v1679_v43  ;;  %8919 = vmatprep.subr.mxu1 %v1687_v61  ;;  %v2305_v43 = vld [vmem:[%s14411_s5 + $0x2f8] sm:$0xff] }
 0x384   :  { %2039 = vmatpush1.msra.mxu0 %v1678_v0  ;;  %8920 = vmatpush3.msra.mxu1 %v1687_v61  ;;  %v2259_v61 = vld [vmem:[%s14411_s5 + $0x188] sm:$0xff] }
 0x385   :  { %7981 = vmatmul.mubr.msk.f32.vlgmr.msra.gmra.mxu0 %vm1796_vm0, %v11248_v1  ;;  %8921 = vmatprep.subr.mxu1 %v1680_v44  ;;  %v2243_v0 = vld [vmem:[%s14411_s5 + $0x108] sm:$0xff] }
 0x386   :  { %8923 = vmatprep.mubr.msk.f32.mxu1 %vm1796_vm0, %v11248_v1  ;;  %8922 = vmatpush3.msra.mxu1 %v1680_v44  ;;  %v2224_v1 = vld [vmem:[%s14411_s5 + $0x70] sm:$0xff]  ;;  %v2258_v44 = vld [vmem:[%s14411_s5 + $0x180] sm:$0xff] }
 0x387   :  { %2078 = vmatprep.mubr.f32.mxu0 %v14469_v31  ;;  %8924 = vmatmul.mubr.msk.f32.vlgmr.msra.gmra.mxu1 %vm1796_vm0, %v11279_v24 }
 0x388   :  { %8690 = vmatprep.subr.mxu0 %v2241_v29  ;;  %8926 = vmatprep.mubr.msk.f32.mxu1 %vm1796_vm0, %v14473_v39  ;;  %v2242_v29 = vld [vmem:[%s14411_s5 + $0x100] sm:$0xff] }
 0x389   :  { %7982 = vmatmul.mubr.msk.f32.gmra.mxu0 %vm1796_vm0, %v11279_v24  ;;  %8734 = vmatprep.subr.mxu1 %v2273_v58  ;;  %v2238_v24 = vld [vmem:[%s14411_s5 + $0xe0] sm:$0xff]  ;;  %v12013_v58 = vpop.permute.xlu1 %1778 }
 0x38a   :  { %2084 = vmatprep.mubr.f32.mxu0 %v14469_v31  ;;  %8691 = vmatpush3.msra.mxu0 %v2225_v23  ;;  %v12010_v23 = vld [vmem:[%s14411_s5 + $0x378] sm:$0xff] }
 0x38b   :  { %8692 = vmatprep.subr.mxu0 %v2240_v56  ;;  %8927 = vmatmul.mubr.msk.f32.gmra.mxu1 %vm1796_vm0, %v14477_v57 }
 0x38c   :  { %8693 = vmatpush3.msra.mxu0 %v2224_v1  ;;  %8735 = vmatpush3.msra.mxu1 %v2257_v30  ;;  %v12017_v30 = vpop.permute.xlu0 %1783 }
 0x38d   :  { %7983 = vmatmul.mubr.msk.f32.gmra.mxu0 %vm1796_vm0, %v14473_v39  ;;  %8694 = vmatprep.subr.mxu0 %v2239_v25  ;;  %v2229_v39 = vld [vmem:[%s14411_s5 + $0x98] sm:$0xff] }
 0x38e   :  { %2090 = vmatprep.mubr.f32.mxu0 %v14469_v31  ;;  %8695 = vmatpush3.msra.mxu0 %v2223_v19  ;;  %v2255_v31 = vld [vmem:[%s14411_s5 + $0x168] sm:$0xff] }
 0x38f   :  { %8696 = vmatprep.subr.mxu0 %v2238_v24  ;;  %8736 = vmatprep.subr.mxu1 %v2272_v54 }
 0x390   :  { %8697 = vmatpush3.msra.mxu0 %v2222_v42  ;;  %8737 = vmatpush3.msra.mxu1 %v2256_v32  ;;  %v2289_v32 = vld [vmem:[%s14411_s5 + $0x278] sm:$0xff] }
 0x391   :  { %7984 = vmatmul.mubr.msk.f32.gmra.mxu0 %vm1796_vm0, %v14477_v57  ;;  %8698 = vmatprep.subr.mxu0 %v2237_v52  ;;  %v2211_v57 = vld [vmem:[%s14411_s5 + $0x8] sm:$0xff] }
 0x392   :  { %8699 = vmatpush3.msra.mxu0 %v2221_v47  ;;  %8738 = vmatprep.subr.mxu1 %v2271_v60  ;;  %v2304_v60 = vld [vmem:[%s14411_s5 + $0x2f0] sm:$0xff] }
 0x393   :  { %8700 = vmatprep.subr.mxu0 %v2236_v8  ;;  %8739 = vmatpush3.msra.mxu1 %v2255_v31  ;;  %v2288_v31 = vld [vmem:[%s14411_s5 + $0x270] sm:$0xff] }
 0x394   :  { %8701 = vmatpush3.msra.mxu0 %v2220_v50  ;;  %8740 = vmatprep.subr.mxu1 %v2270_v13 }
 0x395   :  { %8702 = vmatprep.subr.mxu0 %v2235_v38  ;;  %8741 = vmatpush3.msra.mxu1 %v2254_v55  ;;  %v12030_v38 = vpop.permute.xlu1 %1788 }
 0x396   :  { %8703 = vmatpush3.msra.mxu0 %v2219_v37  ;;  %8742 = vmatprep.subr.mxu1 %v2269_v48  ;;  %v2303_v37 = vld [vmem:[%s14411_s5 + $0x2e8] sm:$0xff] }
 0x397   :  { %8704 = vmatprep.subr.mxu0 %v2234_v3  ;;  %8743 = vmatpush3.msra.mxu1 %v2253_v33 }
 0x398   :  { %8705 = vmatpush3.msra.mxu0 %v2218_v28  ;;  %8744 = vmatprep.subr.mxu1 %v2268_v53  ;;  %v2287_v28 = vld [vmem:[%s14411_s5 + $0x268] sm:$0xff] }
 0x399   :  { %8706 = vmatprep.subr.mxu0 %v2233_v7  ;;  %8745 = vmatpush3.msra.mxu1 %v2252_v45  ;;  %v2302_v7 = vld [vmem:[%s14411_s5 + $0x2e0] sm:$0xff]  ;;  %v12046_v45 = vpop.permute.xlu0 %1793 }
 0x39a   :  { %8707 = vmatpush3.msra.mxu0 %v2217_v15  ;;  %8746 = vmatprep.subr.mxu1 %v2267_v22  ;;  %v2286_v15 = vld [vmem:[%s14411_s5 + $0x260] sm:$0xff]  ;;  %v2301_v22 = vld [vmem:[%s14411_s5 + $0x2d8] sm:$0xff] }
 0x39b   :  { %8708 = vmatprep.subr.mxu0 %v2232_v14  ;;  %8747 = vmatpush3.msra.mxu1 %v2251_v11 }
 0x39c   :  { %8709 = vmatpush3.msra.mxu0 %v2216_v59  ;;  %8748 = vmatprep.subr.mxu1 %v2266_v4  ;;  %v2285_v4 = vld [vmem:[%s14411_s5 + $0x258] sm:$0xff] }
 0x39d   :  { %8710 = vmatprep.subr.mxu0 %v2231_v35  ;;  %8749 = vmatpush3.msra.mxu1 %v2250_v46  ;;  %v2300_v46 = vld [vmem:[%s14411_s5 + $0x2d0] sm:$0xff] }
 0x39e   :  { %8711 = vmatpush3.msra.mxu0 %v2215_v5  ;;  %8750 = vmatprep.subr.mxu1 %v2265_v63 }
 0x39f   :  { %8712 = vmatprep.subr.mxu0 %v2230_v40  ;;  %8751 = vmatpush3.msra.mxu1 %v2249_v27  ;;  %v2284_v40 = vld [vmem:[%s14411_s5 + $0x250] sm:$0xff] }
 0x3a0   :  { %8713 = vmatpush3.msra.mxu0 %v2214_v16  ;;  %8752 = vmatprep.subr.mxu1 %v2264_v21  ;;  %v2299_v16 = vld [vmem:[%s14411_s5 + $0x2c8] sm:$0xff]  ;;  %v2298_v21 = vld [vmem:[%s14411_s5 + $0x2c0] sm:$0xff] }
 0x3a1   :  { %8714 = vmatprep.subr.mxu0 %v2229_v39  ;;  %8753 = vmatpush3.msra.mxu1 %v2248_v26  ;;  %v2283_v39 = vld [vmem:[%s14411_s5 + $0x248] sm:$0xff]  ;;  %v2297_v26 = vld [vmem:[%s14411_s5 + $0x2b8] sm:$0xff] }
 0x3a2   :  { %8715 = vmatpush3.msra.mxu0 %v2213_v12  ;;  %8754 = vmatprep.subr.mxu1 %v2263_v49  ;;  %v2282_v12 = vld [vmem:[%s14411_s5 + $0x240] sm:$0xff]  ;;  %v2296_v49 = vld [vmem:[%s14411_s5 + $0x2b0] sm:$0xff] }
 0x3a3   :  { %8716 = vmatprep.subr.mxu0 %v2228_v20  ;;  %8755 = vmatpush3.msra.mxu1 %v2247_v34  ;;  %v2281_v20 = vld [vmem:[%s14411_s5 + $0x238] sm:$0xff]  ;;  %v2295_v34 = vld [vmem:[%s14411_s5 + $0x2a8] sm:$0xff] }
 0x3a4   :  { %8717 = vmatpush3.msra.mxu0 %v2212_v62  ;;  %8756 = vmatprep.subr.mxu1 %v2262_v41  ;;  %v2280_v62 = vld [vmem:[%s14411_s5 + $0x230] sm:$0xff]  ;;  %v2294_v41 = vld [vmem:[%s14411_s5 + $0x2a0] sm:$0xff] }
 0x3a5   :  { %8718 = vmatprep.subr.mxu0 %v2227_v17  ;;  %8757 = vmatpush3.msra.mxu1 %v2246_v9  ;;  %v2279_v17 = vld [vmem:[%s14411_s5 + $0x228] sm:$0xff]  ;;  %v2293_v9 = vld [vmem:[%s14411_s5 + $0x298] sm:$0xff] }
 0x3a6   :  { %8719 = vmatpush3.msra.mxu0 %v2211_v57  ;;  %8758 = vmatprep.subr.mxu1 %v2261_v51  ;;  %v2278_v57 = vld [vmem:[%s14411_s5 + $0x220] sm:$0xff]  ;;  %v2292_v51 = vld [vmem:[%s14411_s5 + $0x290] sm:$0xff] }
 0x3a7   :  { %8720 = vmatprep.subr.mxu0 %v2226_v18  ;;  %8759 = vmatpush3.msra.mxu1 %v2245_v10  ;;  %v2277_v18 = vld [vmem:[%s14411_s5 + $0x218] sm:$0xff]  ;;  %v2291_v10 = vld [vmem:[%s14411_s5 + $0x288] sm:$0xff] }
 0x3a8   :  { %8721 = vmatpush3.msra.mxu0 %v2210_v6  ;;  %8760 = vmatprep.subr.mxu1 %v2260_v2  ;;  %v2276_v6 = vld [vmem:[%s14411_s5 + $0x210] sm:$0xff]  ;;  %v2275_v2 = vld [vmem:[%s14411_s5 + $0x208] sm:$0xff] }
 0x3a9   :  { %8761 = vmatpush3.msra.mxu1 %v2244_v36  ;;  %8778 = vmatprep.subr.mxu0 %v2305_v43  ;;  %v2290_v36 = vld [vmem:[%s14411_s5 + $0x280] sm:$0xff] }
 0x3aa   :  { %8762 = vmatprep.subr.mxu1 %v2259_v61  ;;  %v2274_v43 = vld [vmem:[%s14411_s5 + $0x200] sm:$0xff] }
 0x3ab   :  { %8763 = vmatpush3.msra.mxu1 %v2243_v0  ;;  %v8989_v61 = vld [vmem:[%s14412_s6 + $0xe4] ss:$16 sps:$4 sm:$0xff]  }
 0x3ac   :  { %8764 = vmatprep.subr.mxu1 %v2258_v44 }
 0x3ad   :  { %8765 = vmatpush3.msra.mxu1 %v2242_v29 }
 0x3ae   :  { %8929 = vmatprep.subr.mxu1 %v12010_v23 }
 0x3be   :  { %v1896_v56 = vpop.f32.mrf.mxu0 }
 0x3bf   :  { %v1897_v1 = vadd.f32 %v1896_v56, %v12013_v58 }
 0x3c0   :  { %v1898_v25 = vpop.f32.mrf.mxu0 }
 0x3c1   :  { %v1899_v19 = vadd.f32 %v1898_v25, %v12013_v58  ;;  %v2182_v54 = vmax.f32 %v1897_v1, 0.0 }
 0x3c2   :  { %v1902_v24 = vpop.f32.mrf.mxu0 }
 0x3c3   :  { %v2183_v42 = vmax.f32 %v1899_v19, 0.0  ;;  %v1903_v52 = vadd.f32 %v1902_v24, %v12017_v30 }
 0x3c4   :  { %v1904_v47 = vpop.f32.mrf.mxu0 }
 0x3c5   :  { %v1905_v8 = vadd.f32 %v1904_v47, %v12017_v30  ;;  %2386 = vmatprep.mubr.f32.mxu0 %v2183_v42  ;;  %v2189_v55 = vmax.f32 %v1903_v52, 0.0  ;;  %v2320_v52 = vld [vmem:[%s14411_s5 + $0x370] sm:$0xff] }
 0x3c6   :  { %v1908_v50 = vpop.f32.mrf.mxu0  ;;  %2387 = vmatmul.mubr.f32.vlgmr.msra.gmra.mxu0 %v2182_v54 }
 0x3c7   :  { %v2190_v13 = vmax.f32 %v1905_v8, 0.0  ;;  %8779 = vmatpush3.msra.mxu0 %v2289_v32  ;;  %v1909_v3 = vadd.f32 %v1908_v50, %v12030_v38  ;;  %v2319_v8 = vld [vmem:[%s14411_s5 + $0x368] sm:$0xff] }
 0x3c8   :  { %v1910_v48 = vpop.f32.mrf.mxu0  ;;  %8780 = vmatprep.subr.mxu0 %v2304_v60 }
 0x3c9   :  { %v1911_v33 = vadd.f32 %v1910_v48, %v12030_v38  ;;  %2391 = vmatprep.mubr.f32.mxu0 %v2190_v13  ;;  %8781 = vmatpush3.msra.mxu0 %v2288_v31  ;;  %v2196_v59 = vmax.f32 %v1909_v3, 0.0  ;;  %v2318_v13 = vld [vmem:[%s14411_s5 + $0x360] sm:$0xff] }
 0x3ca   :  { %v1914_v53 = vpop.f32.mrf.mxu0  ;;  %2392 = vmatmul.mubr.f32.gmra.mxu0 %v2189_v55  ;;  %8782 = vmatprep.subr.mxu0 %v2303_v37 }
 0x3cb   :  { %v2197_v14 = vmax.f32 %v1911_v33, 0.0  ;;  %8783 = vmatpush3.msra.mxu0 %v2287_v28  ;;  %v1915_v11 = vadd.f32 %v1914_v53, %v12046_v45 }
 0x3cc   :  { %v1916_v35 = vpop.f32.mrf.mxu0  ;;  %8784 = vmatprep.subr.mxu0 %v2302_v7  ;;  %v2316_v7 = vld [vmem:[%s14411_s5 + $0x350] sm:$0xff] }
 0x3cd   :  { %v1917_v5 = vadd.f32 %v1916_v35, %v12046_v45  ;;  %2396 = vmatprep.mubr.f32.mxu0 %v2197_v14  ;;  %8785 = vmatpush3.msra.mxu0 %v2286_v15  ;;  %v2203_v27 = vmax.f32 %v1915_v11, 0.0  ;;  %v2315_v15 = vld [vmem:[%s14411_s5 + $0x348] sm:$0xff]  ;;  %v2313_v11 = vld [vmem:[%s14411_s5 + $0x338] sm:$0xff]  ;;  %v2312_v35 = vld [vmem:[%s14411_s5 + $0x330] sm:$0xff] }
 0x3ce   :  { %2397 = vmatmul.mubr.f32.gmra.mxu0 %v2196_v59  ;;  %8786 = vmatprep.subr.mxu0 %v2301_v22  ;;  %v2314_v59 = vld [vmem:[%s14411_s5 + $0x340] sm:$0xff] }
 0x3cf   :  { %v2204_v63 = vmax.f32 %v1917_v5, 0.0  ;;  %8787 = vmatpush3.msra.mxu0 %v2285_v4  ;;  %v2311_v4 = vld [vmem:[%s14411_s5 + $0x328] sm:$0xff] }
 0x3d0   :  { %8788 = vmatprep.subr.mxu0 %v2300_v46  ;;  %v2310_v46 = vld [vmem:[%s14411_s5 + $0x320] sm:$0xff] }
 0x3d1   :  { %2401 = vmatprep.mubr.f32.mxu0 %v2204_v63  ;;  %8789 = vmatpush3.msra.mxu0 %v2284_v40 }
 0x3d2   :  { %2402 = vmatmul.mubr.f32.gmra.mxu0 %v2203_v27  ;;  %8790 = vmatprep.subr.mxu0 %v2299_v16 }
 0x3d3   :  { %8791 = vmatpush3.msra.mxu0 %v2283_v39  ;;  %v2309_v39 = vld [vmem:[%s14411_s5 + $0x318] sm:$0xff] }
 0x3d4   :  { %8792 = vmatprep.subr.mxu0 %v2298_v21 }
 0x3d5   :  { %8793 = vmatpush3.msra.mxu0 %v2282_v12 }
 0x3d6   :  { %8794 = vmatprep.subr.mxu0 %v2297_v26 }
 0x3d7   :  { %8795 = vmatpush3.msra.mxu0 %v2281_v20  ;;  %v2308_v20 = vld [vmem:[%s14411_s5 + $0x310] sm:$0xff] }
 0x3d8   :  { %8796 = vmatprep.subr.mxu0 %v2296_v49  ;;  %v8987_v49 = vld [vmem:[%s14412_s6 + $0xe0] ss:$16 sps:$4 sm:$0xff]  }
 0x3d9   :  { %8797 = vmatpush3.msra.mxu0 %v2280_v62 }
 0x3da   :  { %8798 = vmatprep.subr.mxu0 %v2295_v34 }
 0x3db   :  { %8799 = vmatpush3.msra.mxu0 %v2279_v17 }
 0x3dc   :  { %8800 = vmatprep.subr.mxu0 %v2294_v41 }
 0x3dd   :  { %8801 = vmatpush3.msra.mxu0 %v2278_v57 }
 0x3de   :  { %8802 = vmatprep.subr.mxu0 %v2293_v9 }
 0x3df   :  { %8803 = vmatpush3.msra.mxu0 %v2277_v18  ;;  %v2307_v18 = vld [vmem:[%s14411_s5 + $0x308] sm:$0xff] }
 0x3e0   :  { %8804 = vmatprep.subr.mxu0 %v2292_v51 }
 0x3e1   :  { %8805 = vmatpush3.msra.mxu0 %v2276_v6 }
 0x3e2   :  { %8806 = vmatprep.subr.mxu0 %v2291_v10 }
 0x3e3   :  { %8807 = vmatpush3.msra.mxu0 %v2275_v2 }
 0x3e4   :  { %8808 = vmatprep.subr.mxu0 %v2290_v36  ;;  %v2306_v36 = vld [vmem:[%s14411_s5 + $0x300] sm:$0xff] }
 0x3e5   :  { %8809 = vmatpush3.msra.mxu0 %v2274_v43  ;;  %v8995_v43 = vld [vmem:[%s14412_s6 + $0xc4] ss:$16 sps:$4 sm:$0xff]  }
 0x3e6   :  { %5964 = vmatprep.subr.bf16.mxu0 %v8989_v61 }
 0x428   :  { %v1985_v0 = vpop.f32.mrf.mxu1 }
 0x429   :  { %v1986_v44 = vadd.f32 %v1985_v0, %v12013_v58 }
 0x42a   :  { %v1987_v29 = vpop.f32.mrf.mxu1 }
 0x42b   :  { %v1988_v56 = vadd.f32 %v1987_v29, %v12013_v58  ;;  %v2184_v19 = vmax.f32 %v1986_v44, 0.0  ;;  %v8992_v29 = vld [vmem:[%s14412_s6 + $0x2e4] ss:$16 sps:$4 sm:$0xff]  }
 0x42d   :  { %v1991_v1 = vpop.f32.mrf.mxu1  ;;  %v2185_v25 = vmax.f32 %v1988_v56, 0.0 }
 0x42e   :  { %v1992_v24 = vadd.f32 %v1991_v1, %v12017_v30 }
 0x42f   :  { %v1993_v42 = vpop.f32.mrf.mxu1  ;;  %2471 = vmatprep.mubr.f32.mxu1 %v2185_v25 }
 0x430   :  { %v1994_v54 = vadd.f32 %v1993_v42, %v12017_v30  ;;  %2472 = vmatmul.mubr.f32.vlgmr.msra.gmra.mxu1 %v2184_v19  ;;  %v2191_v60 = vmax.f32 %v1992_v24, 0.0  ;;  %v8990_v42 = vld [vmem:[%s14412_s6 + $0x2e0] ss:$16 sps:$4 sm:$0xff]  }
 0x431   :  { %8930 = vmatpush3.msra.mxu1 %v12010_v23  ;;  %v2317_v23 = vld [vmem:[%s14411_s5 + $0x358] sm:$0xff] }
 0x432   :  { %v2192_v47 = vmax.f32 %v1994_v54, 0.0  ;;  %v1997_v32 = vpop.f32.mrf.mxu1  ;;  %8931 = vmatprep.subr.mxu1 %v2320_v52 }
 0x433   :  { %v1998_v50 = vadd.f32 %v1997_v32, %v12030_v38  ;;  %8932 = vmatpush3.msra.mxu1 %v2320_v52  ;;  %v8993_v52 = vld [vmem:[%s14412_s6 + $0xc0] ss:$16 sps:$4 sm:$0xff]  }
 0x434   :  { %v1999_v31 = vpop.f32.mrf.mxu1  ;;  %2476 = vmatprep.mubr.f32.mxu1 %v2192_v47  ;;  %8933 = vmatprep.subr.mxu1 %v2319_v8 }
 0x435   :  { %v2000_v37 = vadd.f32 %v1999_v31, %v12030_v38  ;;  %2477 = vmatmul.mubr.f32.gmra.mxu1 %v2191_v60  ;;  %v2198_v48 = vmax.f32 %v1998_v50, 0.0  ;;  %v8996_v31 = vld [vmem:[%s14412_s6 + $0x2c0] ss:$16 sps:$4 sm:$0xff]  }
 0x436   :  { %8934 = vmatpush3.msra.mxu1 %v2319_v8 }
 0x437   :  { %v2199_v55 = vmax.f32 %v2000_v37, 0.0  ;;  %v2003_v3 = vpop.f32.mrf.mxu1  ;;  %8935 = vmatprep.subr.mxu1 %v2318_v13 }
 0x438   :  { %8936 = vmatpush3.msra.mxu1 %v2318_v13  ;;  %v2004_v28 = vadd.f32 %v2003_v3, %v12046_v45  ;;  %v9002_v3 = vld [vmem:[%s14412_s6 + $0x2a0] ss:$16 sps:$4 sm:$0xff]  }
 0x439   :  { %v2005_v33 = vpop.f32.mrf.mxu1  ;;  %2481 = vmatprep.mubr.f32.mxu1 %v2199_v55  ;;  %8937 = vmatprep.subr.mxu1 %v2317_v23  ;;  %v9004_v55 = vld [vmem:[%s14412_s6 + $0x2a4] ss:$16 sps:$4 sm:$0xff]  }
 0x43a   :  { %v2006_v53 = vadd.f32 %v2005_v33, %v12046_v45  ;;  %2482 = vmatmul.mubr.f32.gmra.mxu1 %v2198_v48  ;;  %v2205_v22 = vmax.f32 %v2004_v28, 0.0  ;;  %v9005_v48 = vld [vmem:[%s14412_s6 + $0x80] ss:$16 sps:$4 sm:$0xff]   ;;  %v9007_v28 = vld [vmem:[%s14412_s6 + $0x84] ss:$16 sps:$4 sm:$0xff]  }
 0x43b   :  { %8938 = vmatpush3.msra.mxu1 %v2317_v23  ;;  %v9001_v23 = vld [vmem:[%s14412_s6 + $0xa4] ss:$16 sps:$4 sm:$0xff]  }
 0x43c   :  { %v2206_v14 = vmax.f32 %v2006_v53, 0.0  ;;  %8939 = vmatprep.subr.mxu1 %v2316_v7  ;;  %v9010_v33 = vld [vmem:[%s14412_s6 + $0x284] ss:$16 sps:$4 sm:$0xff]   ;;  %v9011_v53 = vld [vmem:[%s14412_s6 + $0x60] ss:$16 sps:$4 sm:$0xff]  }
 0x43d   :  { %8940 = vmatpush3.msra.mxu1 %v2316_v7  ;;  %v9008_v7 = vld [vmem:[%s14412_s6 + $0x280] ss:$16 sps:$4 sm:$0xff]  }
 0x43e   :  { %2486 = vmatprep.mubr.f32.mxu1 %v2206_v14  ;;  %8941 = vmatprep.subr.mxu1 %v2315_v15  ;;  %v9016_v14 = vld [vmem:[%s14412_s6 + $0x264] ss:$16 sps:$4 sm:$0xff]  }
 0x43f   :  { %2487 = vmatmul.mubr.f32.gmra.mxu1 %v2205_v22  ;;  %v9014_v22 = vld [vmem:[%s14412_s6 + $0x260] ss:$16 sps:$4 sm:$0xff]  }
 0x440   :  { %8942 = vmatpush3.msra.mxu1 %v2315_v15  ;;  %v9013_v15 = vld [vmem:[%s14412_s6 + $0x64] ss:$16 sps:$4 sm:$0xff]  }
 0x441   :  { %8943 = vmatprep.subr.mxu1 %v2314_v59 }
 0x442   :  { %8944 = vmatpush3.msra.mxu1 %v2314_v59  ;;  %v9019_v59 = vld [vmem:[%s14412_s6 + $0x44] ss:$16 sps:$4 sm:$0xff]  }
 0x443   :  { %8945 = vmatprep.subr.mxu1 %v2313_v11 }
 0x444   :  { %8946 = vmatpush3.msra.mxu1 %v2313_v11  ;;  %v9017_v11 = vld [vmem:[%s14412_s6 + $0x40] ss:$16 sps:$4 sm:$0xff]  }
 0x445   :  { %8947 = vmatprep.subr.mxu1 %v2312_v35  ;;  %v2074_v5 = vpop.f32.mrf.mxu0 }
 0x446   :  { %8948 = vmatpush3.msra.mxu1 %v2312_v35  ;;  %v2075_v40 = vadd.f32 %v2074_v5, %v12013_v58  ;;  %v9022_v35 = vld [vmem:[%s14412_s6 + $0x244] ss:$16 sps:$4 sm:$0xff]  }
 0x447   :  { %8949 = vmatprep.subr.mxu1 %v2311_v4  ;;  %v2076_v63 = vpop.f32.mrf.mxu0  ;;  %v8925_v16 = vpop.f32.mrf.mxu1  ;;  %v9025_v5 = vld [vmem:[%s14412_s6 + $0x24] ss:$16 sps:$4 sm:$0xff]  }
 0x448   :  { %8950 = vmatpush3.msra.mxu1 %v2311_v4  ;;  %v2077_v27 = vadd.f32 %v2076_v63, %v12013_v58  ;;  %v2186_v62 = vmax.f32 %v2075_v40, 0.0  ;;  %v2169_v51 = vadd.f32 %v8925_v16, %v12017_v30  ;;  %v9020_v4 = vld [vmem:[%s14412_s6 + $0x240] ss:$16 sps:$4 sm:$0xff]   ;;  %v9028_v63 = vld [vmem:[%s14412_s6 + $0x224] ss:$16 sps:$4 sm:$0xff]  }
 0x449   :  { %8951 = vmatprep.subr.mxu1 %v2310_v46  ;;  %v2080_v21 = vpop.f32.mrf.mxu0  ;;  %v2163_v26 = vpop.f32.mrf.mxu1  ;;  %v9026_v40 = vld [vmem:[%s14412_s6 + $0x220] ss:$16 sps:$4 sm:$0xff]  }
 0x44a   :  { %v2187_v12 = vmax.f32 %v2077_v27, 0.0  ;;  %8952 = vmatpush3.msra.mxu1 %v2310_v46  ;;  %v2164_v34 = vadd.f32 %v2163_v26, %v12013_v58  ;;  %v2081_v17 = vadd.f32 %v2080_v21, %v12017_v30  ;;  %v2195_v1 = vmax.f32 %v2169_v51, 0.0  ;;  %v9023_v46 = vld [vmem:[%s14412_s6 + $0x20] ss:$16 sps:$4 sm:$0xff]   ;;  %v9031_v27 = vld [vmem:[%s14412_s6 + $0x4] ss:$16 sps:$4 sm:$0xff]  }
 0x44b   :  { %8953 = vmatprep.subr.mxu1 %v2309_v39  ;;  %v2082_v41 = vpop.f32.mrf.mxu0  ;;  %v8928_v57 = vpop.f32.mrf.mxu1  ;;  %v9029_v16 = vld [vmem:[%s14412_s6] ss:$16 sps:$4 sm:$0xff]   ;;  %v9037_v21 = vld [vmem:[%s14412_s6 + $0x1e4] ss:$16 sps:$4 sm:$0xff]  }
 0x44c   :  { %8954 = vmatpush3.msra.mxu1 %v2309_v39  ;;  %v2083_v9 = vadd.f32 %v2082_v41, %v12017_v30  ;;  %2556 = vmatprep.mubr.f32.mxu0 %v2187_v12  ;;  %v2188_v6 = vmax.f32 %v2164_v34, 0.0  ;;  %v2193_v61 = vmax.f32 %v2081_v17, 0.0  ;;  %v2179_v25 = vadd.f32 %v8928_v57, %v12046_v45  ;;  %v9034_v39 = vld [vmem:[%s14412_s6 + $0x204] ss:$16 sps:$4 sm:$0xff]   ;;  %v9032_v12 = vld [vmem:[%s14412_s6 + $0x200] ss:$16 sps:$4 sm:$0xff]  }
 0x44d   :  { %8955 = vmatprep.subr.mxu1 %v2308_v20  ;;  %v2086_v10 = vpop.f32.mrf.mxu0  ;;  %2557 = vmatmul.mubr.f32.vlgmr.msra.gmra.mxu0 %v2186_v62  ;;  %v2173_v2 = vpop.f32.mrf.mxu1  ;;  %v9040_v26 = vld [vmem:[%s14412_s6 + $0x3e4] ss:$16 sps:$4 sm:$0xff]   ;;  %v9041_v62 = vld [vmem:[%s14412_s6 + $0x1c0] ss:$16 sps:$4 sm:$0xff]  }
 0x44e   :  { %v2194_v58 = vmax.f32 %v2083_v9, 0.0  ;;  %8956 = vmatpush3.msra.mxu1 %v2308_v20  ;;  %5965 = vmatpush1.bf16.msra.mxu0 %v8987_v49  ;;  %v2174_v0 = vadd.f32 %v2173_v2, %v12030_v38  ;;  %v2087_v30 = vadd.f32 %v2086_v10, %v12030_v38  ;;  %v2209_v50 = vmax.f32 %v2179_v25, 0.0  ;;  %v9035_v20 = vld [vmem:[%s14412_s6 + $0x1e0] ss:$16 sps:$4 sm:$0xff]   ;;  %v9043_v34 = vld [vmem:[%s14412_s6 + $0x1c4] ss:$16 sps:$4 sm:$0xff]  }
 0x44f   :  { %8957 = vmatprep.subr.mxu1 %v2307_v18  ;;  %8961 = vmatprep.mubr.f32.mxu1 %v2188_v6  ;;  %v2088_v44 = vpop.f32.mrf.mxu0  ;;  %v9038_v49 = vld [vmem:[%s14412_s6 + $0x3e0] ss:$16 sps:$4 sm:$0xff]   ;;  %v9046_v41 = vld [vmem:[%s14412_s6 + $0x3c4] ss:$16 sps:$4 sm:$0xff]  }
 0x450   :  { %8958 = vmatpush3.msra.mxu1 %v2307_v18  ;;  %v2089_v56 = vadd.f32 %v2088_v44, %v12030_v38  ;;  %2561 = vmatprep.mubr.f32.mxu0 %v2194_v58  ;;  %v2202_v19 = vmax.f32 %v2174_v0, 0.0  ;;  %v8998_v38 = vld [vmem:[%s14412_s6 + $0x2c4] ss:$16 sps:$4 sm:$0xff]   ;;  %v2200_v47 = vmax.f32 %v2087_v30, 0.0  ;;  %v9044_v17 = vld [vmem:[%s14412_s6 + $0x3c0] ss:$16 sps:$4 sm:$0xff]  }
 0x451   :  { %8959 = vmatprep.subr.mxu1 %v2306_v36  ;;  %v2092_v24 = vpop.f32.mrf.mxu0  ;;  %2562 = vmatmul.mubr.f32.gmra.mxu0 %v2193_v61  ;;  %v9049_v57 = vld [vmem:[%s14412_s6 + $0x1a4] ss:$16 sps:$4 sm:$0xff]   ;;  %v9047_v9 = vld [vmem:[%s14412_s6 + $0x1a0] ss:$16 sps:$4 sm:$0xff]  }
 0x452   :  { %v2201_v54 = vmax.f32 %v2089_v56, 0.0  ;;  %8960 = vmatpush3.msra.mxu1 %v2306_v36  ;;  %5966 = vmatprep.subr.bf16.mxu0 %v8995_v43  ;;  %v2093_v32 = vadd.f32 %v2092_v24, %v12046_v45  ;;  %v9052_v18 = vld [vmem:[%s14412_s6 + $0x3a4] ss:$16 sps:$4 sm:$0xff]   ;;  %v9050_v51 = vld [vmem:[%s14412_s6 + $0x3a0] ss:$16 sps:$4 sm:$0xff]  }
 0x453   :  { %8962 = vmatmul.mubr.f32.vlgmr.msra.gmra.mxu1 %v2195_v1  ;;  %v2094_v8 = vpop.f32.mrf.mxu0  ;;  %6005 = vmatprep.subr.bf16.mxu1 %v8992_v29  ;;  %v9055_v6 = vld [vmem:[%s14412_s6 + $0x184] ss:$16 sps:$4 sm:$0xff]   ;;  %v9053_v10 = vld [vmem:[%s14412_s6 + $0x180] ss:$16 sps:$4 sm:$0xff]  }
 0x454   :  { %8964 = vmatprep.mubr.f32.mxu1 %v2202_v19  ;;  %v2095_v60 = vadd.f32 %v2094_v8, %v12046_v45  ;;  %2566 = vmatprep.mubr.f32.mxu0 %v2201_v54  ;;  %v2207_v37 = vmax.f32 %v2093_v32, 0.0  ;;  %v8999_v45 = vld [vmem:[%s14412_s6 + $0xa0] ss:$16 sps:$4 sm:$0xff]   ;;  %v9058_v58 = vld [vmem:[%s14412_s6 + $0x384] ss:$16 sps:$4 sm:$0xff]  }
 0x455   :  { %2567 = vmatmul.mubr.f32.gmra.mxu0 %v2200_v47  ;;  %6006 = vmatpush1.bf16.msra.mxu1 %v8990_v42  ;;  %v9056_v2 = vld [vmem:[%s14412_s6 + $0x380] ss:$16 sps:$4 sm:$0xff]   ;;  %v9061_v36 = vld [vmem:[%s14412_s6 + $0x164] ss:$16 sps:$4 sm:$0xff]  }
 0x456   :  { %v2208_v13 = vmax.f32 %v2095_v60, 0.0  ;;  %5967 = vmatpush1.bf16.msra.mxu0 %v8993_v52  ;;  %6007 = vmatprep.subr.bf16.mxu1 %v8998_v38  ;;  %v9059_v43 = vld [vmem:[%s14412_s6 + $0x160] ss:$16 sps:$4 sm:$0xff]   ;;  %v9064_v61 = vld [vmem:[%s14412_s6 + $0x364] ss:$16 sps:$4 sm:$0xff]  }
 0x457   :  { %8965 = vmatmul.mubr.f32.gmra.mxu1 %v2209_v50  ;;  %5968 = vmatprep.subr.bf16.mxu0 %v9001_v23  ;;  %v9062_v0 = vld [vmem:[%s14412_s6 + $0x360] ss:$16 sps:$4 sm:$0xff]   ;;  %v9067_v30 = vld [vmem:[%s14412_s6 + $0x144] ss:$16 sps:$4 sm:$0xff]  }
 0x458   :  { %2571 = vmatprep.mubr.f32.mxu0 %v2208_v13  ;;  %v9065_v44 = vld [vmem:[%s14412_s6 + $0x140] ss:$16 sps:$4 sm:$0xff]   ;;  %v9070_v29 = vld [vmem:[%s14412_s6 + $0x344] ss:$16 sps:$4 sm:$0xff]  }
 0x459   :  { %2572 = vmatmul.mubr.f32.gmra.mxu0 %v2207_v37  ;;  %6008 = vmatpush1.bf16.msra.mxu1 %v8996_v31  ;;  %v9068_v56 = vld [vmem:[%s14412_s6 + $0x340] ss:$16 sps:$4 sm:$0xff]   ;;  %v9073_v1 = vld [vmem:[%s14412_s6 + $0x124] ss:$16 sps:$4 sm:$0xff]  }
 0x45a   :  { %5969 = vmatpush1.bf16.msra.mxu0 %v8999_v45  ;;  %6009 = vmatprep.subr.bf16.mxu1 %v9004_v55  ;;  %v9071_v25 = vld [vmem:[%s14412_s6 + $0x120] ss:$16 sps:$4 sm:$0xff]   ;;  %v9076_v19 = vld [vmem:[%s14412_s6 + $0x324] ss:$16 sps:$4 sm:$0xff]  }
 0x45b   :  { %5970 = vmatprep.subr.bf16.mxu0 %v9007_v28  ;;  %v9074_v24 = vld [vmem:[%s14412_s6 + $0x320] ss:$16 sps:$4 sm:$0xff]   ;;  %v9079_v42 = vld [vmem:[%s14412_s6 + $0x104] ss:$16 sps:$4 sm:$0xff]  }
 0x45c   :  { %v9077_v54 = vld [vmem:[%s14412_s6 + $0x100] ss:$16 sps:$4 sm:$0xff]   ;;  %v9082_v38 = vld [vmem:[%s14412_s6 + $0x304] ss:$16 sps:$4 sm:$0xff]  }
 0x45d   :  { %6010 = vmatpush1.bf16.msra.mxu1 %v9002_v3  ;;  %v9080_v52 = vld [vmem:[%s14412_s6 + $0x300] ss:$16 sps:$4 sm:$0xff]   ;;  %v9085_v47 = vld [vmem:[%s14412_s6 + $0x4e4] ss:$16 sps:$4 sm:$0xff]  }
 0x45e   :  { %5971 = vmatpush1.bf16.msra.mxu0 %v9005_v48  ;;  %6011 = vmatprep.subr.bf16.mxu1 %v9010_v33  ;;  %v9089_v32 = vld [vmem:[%s14412_s6 + $0x6e4] ss:$16 sps:$4 sm:$0xff]  }
 0x45f   :  { %5972 = vmatprep.subr.bf16.mxu0 %v9013_v15 }
 0x461   :  { %6012 = vmatpush1.bf16.msra.mxu1 %v9008_v7 }
 0x462   :  { %5973 = vmatpush1.bf16.msra.mxu0 %v9011_v53  ;;  %6013 = vmatprep.subr.bf16.mxu1 %v9016_v14 }
 0x463   :  { %5974 = vmatprep.subr.bf16.mxu0 %v9019_v59 }
 0x465   :  { %6014 = vmatpush1.bf16.msra.mxu1 %v9014_v22 }
 0x466   :  { %5975 = vmatpush1.bf16.msra.mxu0 %v9017_v11  ;;  %6015 = vmatprep.subr.bf16.mxu1 %v9022_v35 }
 0x467   :  { %5976 = vmatprep.subr.bf16.mxu0 %v9025_v5 }
 0x469   :  { %6016 = vmatpush1.bf16.msra.mxu1 %v9020_v4 }
 0x46a   :  { %5977 = vmatpush1.bf16.msra.mxu0 %v9023_v46  ;;  %6017 = vmatprep.subr.bf16.mxu1 %v9028_v63 }
 0x46b   :  { %5978 = vmatprep.subr.bf16.mxu0 %v9031_v27 }
 0x46d   :  { %6018 = vmatpush1.bf16.msra.mxu1 %v9026_v40 }
 0x46e   :  { %6019 = vmatprep.subr.bf16.mxu1 %v9034_v39  ;;  %5979 = vmatpush1.bf16.msra.mxu0 %v9029_v16 }
 0x46f   :  { %5980 = vmatprep.subr.bf16.mxu0 %v9037_v21 }
 0x471   :  { %6020 = vmatpush1.bf16.msra.mxu1 %v9032_v12 }
 0x472   :  { %6021 = vmatprep.subr.bf16.mxu1 %v9040_v26  ;;  %5981 = vmatpush2.bf16.msra.mxu0 %v9035_v20 }
 0x473   :  { %5982 = vmatprep.subr.bf16.mxu0 %v9043_v34 }
 0x475   :  { %6022 = vmatpush2.bf16.msra.mxu1 %v9038_v49 }
 0x476   :  { %5983 = vmatpush2.bf16.msra.mxu0 %v9041_v62  ;;  %6023 = vmatprep.subr.bf16.mxu1 %v9046_v41 }
 0x477   :  { %5984 = vmatprep.subr.bf16.mxu0 %v9049_v57 }
 0x479   :  { %6024 = vmatpush2.bf16.msra.mxu1 %v9044_v17 }
 0x47a   :  { %5985 = vmatpush2.bf16.msra.mxu0 %v9047_v9  ;;  %6025 = vmatprep.subr.bf16.mxu1 %v9052_v18  ;;  %v14479_v9 = vld [vmem:[#allocation9_spill] sm:$0xff] }
 0x47b   :  { %5986 = vmatprep.subr.bf16.mxu0 %v9055_v6 }
 0x47d   :  { %6026 = vmatpush2.bf16.msra.mxu1 %v9050_v51 }
 0x47e   :  { %5987 = vmatpush2.bf16.msra.mxu0 %v9053_v10  ;;  %6027 = vmatprep.subr.bf16.mxu1 %v9058_v58 }
 0x47f   :  { %5988 = vmatprep.subr.bf16.mxu0 %v9061_v36 }
 0x481   :  { %6028 = vmatpush2.bf16.msra.mxu1 %v9056_v2 }
 0x482   :  { %5989 = vmatpush2.bf16.msra.mxu0 %v9059_v43  ;;  %6029 = vmatprep.subr.bf16.mxu1 %v9064_v61 }
 0x483   :  { %5990 = vmatprep.subr.bf16.mxu0 %v9067_v30 }
 0x485   :  { %6030 = vmatpush2.bf16.msra.mxu1 %v9062_v0 }
 0x486   :  { %5991 = vmatpush2.bf16.msra.mxu0 %v9065_v44  ;;  %6031 = vmatprep.subr.bf16.mxu1 %v9070_v29  ;;  %v8722_v8 = vpop.f32.mrf.mxu0 }
 0x487   :  { %5992 = vmatprep.subr.bf16.mxu0 %v9073_v1 }
 0x488   :  { %v8723_v60 = vpop.f32.mrf.mxu0 }
 0x489   :  { %6032 = vmatpush2.bf16.msra.mxu1 %v9068_v56  ;;  %v8724_v22 = vadd.f32 %v8723_v60, %v8722_v8 }
 0x48a   :  { %5993 = vmatpush2.bf16.msra.mxu0 %v9071_v25  ;;  %6033 = vmatprep.subr.bf16.mxu1 %v9076_v19  ;;  %v8725_v31 = vpop.f32.mrf.mxu0 }
 0x48b   :  { %5994 = vmatprep.subr.bf16.mxu0 %v9079_v42 }
 0x48c   :  { %v8726_v37 = vpop.f32.mrf.mxu0 }
 0x48d   :  { %6034 = vmatpush2.bf16.msra.mxu1 %v9074_v24  ;;  %v8727_v40 = vadd.f32 %v8726_v37, %v8725_v31 }
 0x48e   :  { %5995 = vmatpush2.bf16.msra.mxu0 %v9077_v54  ;;  %6035 = vmatprep.subr.bf16.mxu1 %v9082_v38  ;;  %v8728_v23 = vpop.f32.mrf.mxu0 }
 0x48f   :  { %6046 = vmatprep.subr.bf16.mxu0 %v9085_v47 }
 0x490   :  { %v8729_v3 = vpop.f32.mrf.mxu0 }
 0x491   :  { %6036 = vmatpush2.bf16.msra.mxu1 %v9080_v52  ;;  %v8730_v34 = vadd.f32 %v8729_v3, %v8728_v23 }
 0x492   :  { %6087 = vmatprep.subr.bf16.mxu1 %v9089_v32  ;;  %v8731_v28 = vpop.f32.mrf.mxu0 }
 0x494   :  { %v8732_v7 = vpop.f32.mrf.mxu0 }
 0x495   :  { %v8733_v58 = vadd.f32 %v8732_v7, %v8731_v28 }
 0x4f0   :  { %v8766_v50 = vpop.f32.mrf.mxu1 }
 0x4f2   :  { %v8767_v13 = vpop.f32.mrf.mxu1 }
 0x4f3   :  { %v8768_v53 = vadd.f32 %v8767_v13, %v8766_v50 }
 0x4f5   :  { %v8769_v45 = vpop.f32.mrf.mxu1  ;;  %v2474_v11 = vadd.f32 %v8768_v53, %v8724_v22 }
 0x4f7   :  { %v8770_v55 = vpop.f32.mrf.mxu1 }
 0x4f8   :  { %v8771_v35 = vadd.f32 %v8770_v55, %v8769_v45 }
 0x4fa   :  { %v8772_v48 = vpop.f32.mrf.mxu1  ;;  %v2479_v39 = vadd.f32 %v8771_v35, %v8727_v40 }
 0x4fc   :  { %v8773_v33 = vpop.f32.mrf.mxu1 }
 0x4fd   :  { %v8774_v12 = vadd.f32 %v8773_v33, %v8772_v48 }
 0x4ff   :  { %v8775_v15 = vpop.f32.mrf.mxu1  ;;  %v2484_v2 = vadd.f32 %v8774_v12, %v8730_v34  ;;  %v9090_v12 = vld [vmem:[%s14412_s6 + $0x4c0] ss:$16 sps:$4 sm:$0xff]  }
 0x500   :  { %v9097_v34 = vld [vmem:[%s14412_s6 + $0x4a0] ss:$16 sps:$4 sm:$0xff]  }
 0x501   :  { %v8776_v5 = vpop.f32.mrf.mxu1 }
 0x502   :  { %v8777_v17 = vadd.f32 %v8776_v5, %v8775_v15  ;;  %v9092_v5 = vld [vmem:[%s14412_s6 + $0x4c4] ss:$16 sps:$4 sm:$0xff]  }
 0x504   :  { %v2489_v44 = vadd.f32 %v8777_v17, %v8733_v58  ;;  %v9105_v17 = vld [vmem:[%s14412_s6 + $0x484] ss:$16 sps:$4 sm:$0xff]   ;;  %v9109_v58 = vld [vmem:[%s14412_s6 + $0x460] ss:$16 sps:$4 sm:$0xff]  }
 0x50d   :  { %v8810_v14 = vpop.f32.mrf.mxu0 }
 0x50f   :  { %v8811_v59 = vpop.f32.mrf.mxu0 }
 0x510   :  { %v8812_v4 = vadd.f32 %v8811_v59, %v8810_v14  ;;  %v9083_v59 = vld [vmem:[%s14412_s6 + $0x4e0] ss:$16 sps:$4 sm:$0xff]  }
 0x511   :  { %v8813_v46 = vpop.f32.mrf.mxu0 }
 0x512   :  { %v2559_v63 = vadd.f32 %v8812_v4, %v2474_v11 }
 0x513   :  { %v8963_v16 = vpop.f32.mrf.mxu1  ;;  %v8814_v27 = vpop.f32.mrf.mxu0 }
 0x514   :  { %v8815_v21 = vadd.f32 %v8814_v27, %v8813_v46 }
 0x515   :  { %v2643_v26 = vpop.f32.mrf.mxu1  ;;  %v8816_v20 = vpop.f32.mrf.mxu0 }
 0x516   :  { %v2564_v49 = vadd.f32 %v8815_v21, %v2479_v39  ;;  %v2644_v62 = vadd.f32 %v2643_v26, %v2559_v63  ;;  %v9087_v63 = vld [vmem:[%s14412_s6 + $0x6e0] ss:$16 sps:$4 sm:$0xff]   ;;  %v9095_v39 = vld [vmem:[%s14412_s6 + $0x6c4] ss:$16 sps:$4 sm:$0xff]  }
 0x517   :  { %v8817_v41 = vpop.f32.mrf.mxu0  ;;  %v8966_v6 = vpop.f32.mrf.mxu1 }
 0x518   :  { %v2649_v57 = vadd.f32 %v8963_v16, %v2564_v49  ;;  %2662 = vst [vmem:[#allocation4] sm:$0x3] %v2644_v62  ;;  %v2670_v18 = vrot.slane %v2644_v62, %v14479_v9  ;;  %v2674_v51 = vcombine.high %v2644_v62, %v2644_v62  ;;  %v8818_v10 = vadd.f32 %v8817_v41, %v8816_v20  ;;  %v9099_v20 = vld [vmem:[%s14412_s6 + $0x4a4] ss:$16 sps:$4 sm:$0xff]   ;;  %v9093_v49 = vld [vmem:[%s14412_s6 + $0x6c0] ss:$16 sps:$4 sm:$0xff]  }
 0x519   :  { %v8819_v36 = vpop.f32.mrf.mxu0  ;;  %v2653_v24 = vpop.f32.mrf.mxu1  ;;  %v9102_v62 = vld [vmem:[%s14412_s6 + $0x6a4] ss:$16 sps:$4 sm:$0xff]   ;;  %v9100_v41 = vld [vmem:[%s14412_s6 + $0x6a0] ss:$16 sps:$4 sm:$0xff]  }
 0x51a   :  { %2687 = vst [vmem:[#allocation4 + $0x8] sm:$0x3] %v2649_v57  ;;  %v2695_v43 = vrot.slane %v2649_v57, %v14479_v9  ;;  %v2699_v61 = vcombine.high %v2649_v57, %v2649_v57  ;;  %v2671_v0 = vcombine.high %v2670_v18, %v2670_v18  ;;  %v2681_v30 = vrot.slane %v2674_v51, %v14479_v9  ;;  %v9108_v57 = vld [vmem:[%s14412_s6 + $0x684] ss:$16 sps:$4 sm:$0xff]   ;;  %v9103_v18 = vld [vmem:[%s14412_s6 + $0x480] ss:$16 sps:$4 sm:$0xff]  }
 0x51b   :  { %7990 = vst.sshfl [vmem:[#allocation4 + $0x4] sm:$0x3 pattern:$0x76325410] %v2674_v51  ;;  %v2569_v29 = vadd.f32 %v8818_v10, %v2484_v2  ;;  %v8820_v56 = vpop.f32.mrf.mxu0  ;;  %v9111_v51 = vld [vmem:[%s14412_s6 + $0x464] ss:$16 sps:$4 sm:$0xff]  }
 0x51c   :  { %v2696_v1 = vcombine.high %v2695_v43, %v2695_v43  ;;  %v2706_v25 = vrot.slane %v2699_v61, %v14479_v9  ;;  %7991 = vst.sshfl [vmem:[#allocation4 + $0xc] sm:$0x3 pattern:$0x76325410] %v2699_v61  ;;  %2673 = vst [vmem:[#allocation4 + $0x2] sm:$0x3] %v2671_v0  ;;  %v2684_v19 = vcombine.high %v2681_v30, %v2681_v30 }
 0x51d   :  { %v8821_v42 = vadd.f32 %v8820_v56, %v8819_v36  ;;  %v2654_v54 = vadd.f32 %v2653_v24, %v2569_v29  ;;  %v9114_v10 = vld [vmem:[%s14412_s6 + $0x664] ss:$16 sps:$4 sm:$0xff]   ;;  %v9112_v36 = vld [vmem:[%s14412_s6 + $0x660] ss:$16 sps:$4 sm:$0xff]  }
 0x51e   :  { %2698 = vst [vmem:[#allocation4 + $0xa] sm:$0x3] %v2696_v1  ;;  %v2709_v52 = vcombine.high %v2706_v25, %v2706_v25  ;;  %2686 = vst [vmem:[#allocation4 + $0x6] sm:$0x3] %v2684_v19  ;;  %v9117_v2 = vld [vmem:[%s14412_s6 + $0x444] ss:$16 sps:$4 sm:$0xff]  }
 0x51f   :  { %v2574_v38 = vadd.f32 %v8821_v42, %v2489_v44  ;;  %2712 = vst [vmem:[#allocation4 + $0x10] sm:$0x3] %v2654_v54  ;;  %v2720_v47 = vrot.slane %v2654_v54, %v14479_v9  ;;  %v2724_v32 = vcombine.high %v2654_v54, %v2654_v54  ;;  %v9120_v43 = vld [vmem:[%s14412_s6 + $0x644] ss:$16 sps:$4 sm:$0xff]   ;;  %v9115_v61 = vld [vmem:[%s14412_s6 + $0x440] ss:$16 sps:$4 sm:$0xff]  }
 0x520   :  { %2711 = vst [vmem:[#allocation4 + $0xe] sm:$0x3] %v2709_v52  ;;  %v9123_v0 = vld [vmem:[%s14412_s6 + $0x424] ss:$16 sps:$4 sm:$0xff]   ;;  %v9118_v30 = vld [vmem:[%s14412_s6 + $0x640] ss:$16 sps:$4 sm:$0xff]  }
 0x521   :  { %v2659_v8 = vadd.f32 %v8966_v6, %v2574_v38  ;;  %v2721_v60 = vcombine.high %v2720_v47, %v2720_v47  ;;  %v2731_v50 = vrot.slane %v2724_v32, %v14479_v9  ;;  %7992 = vst.sshfl [vmem:[#allocation4 + $0x14] sm:$0x3 pattern:$0x76325410] %v2724_v32  ;;  %v9106_v6 = vld [vmem:[%s14412_s6 + $0x680] ss:$16 sps:$4 sm:$0xff]  }
 0x522   :  { %v9126_v44 = vld [vmem:[%s14412_s6 + $0x624] ss:$16 sps:$4 sm:$0xff]   ;;  %v9121_v29 = vld [vmem:[%s14412_s6 + $0x420] ss:$16 sps:$4 sm:$0xff]  }
 0x523   :  { %2737 = vst [vmem:[#allocation4 + $0x18] sm:$0x3] %v2659_v8  ;;  %v2745_v31 = vrot.slane %v2659_v8, %v14479_v9  ;;  %v2749_v13 = vcombine.high %v2659_v8, %v2659_v8  ;;  %2723 = vst [vmem:[#allocation4 + $0x12] sm:$0x3] %v2721_v60  ;;  %v2734_v37 = vcombine.high %v2731_v50, %v2731_v50  ;;  %v9129_v56 = vld [vmem:[%s14412_s6 + $0x404] ss:$16 sps:$4 sm:$0xff]  }
 0x524   :  { %v9124_v1 = vld [vmem:[%s14412_s6 + $0x620] ss:$16 sps:$4 sm:$0xff]   ;;  %v9132_v25 = vld [vmem:[%s14412_s6 + $0x604] ss:$16 sps:$4 sm:$0xff]  }
 0x525   :  { %v2746_v45 = vcombine.high %v2745_v31, %v2745_v31  ;;  %v2756_v23 = vrot.slane %v2749_v13, %v14479_v9  ;;  %7993 = vst.sshfl [vmem:[#allocation4 + $0x1c] sm:$0x3 pattern:$0x76325410] %v2749_v13  ;;  %2736 = vst [vmem:[#allocation4 + $0x16] sm:$0x3] %v2734_v37 }
 0x526   :  { %v2762_v55 = vld [vmem:[#allocation4] sm:$0xff]  ;;  %v9127_v19 = vld [vmem:[%s14412_s6 + $0x400] ss:$16 sps:$4 sm:$0xff]   ;;  %v9135_v24 = vld [vmem:[%s14412_s6 + $0x5e4] ss:$16 sps:$4 sm:$0xff]  }
 0x527   :  { %2748 = vst [vmem:[#allocation4 + $0x1a] sm:$0x3] %v2746_v45  ;;  %v2759_v3 = vcombine.high %v2756_v23, %v2756_v23  ;;  %v2777_v48 = vrot.slane %v2762_v55, %v14479_v9  ;;  %v2770_v28 = vcombine.high %v2762_v55, %v2762_v55  ;;  %v2763_v33 = vld [vmem:[#allocation4 + $0x8] sm:$0xff] }
 0x528   :  { %v12397_v15 = vrot.slane %v2763_v33, %v14479_v9  ;;  %v2787_v14 = vcombine.high %v2763_v33, %v2763_v33  ;;  %v9130_v42 = vld [vmem:[%s14412_s6 + $0x600] ss:$16 sps:$4 sm:$0xff]   ;;  %v9138_v54 = vld [vmem:[%s14412_s6 + $0x7e4] ss:$16 sps:$4 sm:$0xff]  }
 0x529   :  { %2761 = vst [vmem:[#allocation4 + $0x1e] sm:$0x3] %v2759_v3  ;;  %v2785_v7 = vcombine.high %v2777_v48, %v2777_v48  ;;  %v2784_v53 = vrot.slane %v2770_v28, %v14479_v9  ;;  %v12406_v4 = vpack.c.bf16 %v2777_v48, %v2777_v48  ;;  %v9133_v52 = vld [vmem:[%s14412_s6 + $0x5e0] ss:$16 sps:$4 sm:$0xff]   ;;  %v9141_v38 = vld [vmem:[%s14412_s6 + $0x5c4] ss:$16 sps:$4 sm:$0xff]  }
 0x52a   :  { %v2802_v35 = vcombine.high %v12397_v15, %v12397_v15  ;;  %v12412_v46 = vrot.slane %v2787_v14, %v14479_v9  ;;  %v9136_v47 = vld [vmem:[%s14412_s6 + $0x7e0] ss:$16 sps:$4 sm:$0xff]   ;;  %v9144_v32 = vld [vmem:[%s14412_s6 + $0x7c4] ss:$16 sps:$4 sm:$0xff]  }
 0x52b   :  { %v12399_v22 = vpack.c.bf16 %v2785_v7, %v2785_v7  ;;  %v2786_v11 = vcombine.high %v2784_v53, %v2784_v53  ;;  %v12423_v27 = vpack.c.bf16 %v2784_v53, %v2784_v53  ;;  %v9139_v8 = vld [vmem:[%s14412_s6 + $0x5c0] ss:$16 sps:$4 sm:$0xff]   ;;  %v9147_v60 = vld [vmem:[%s14412_s6 + $0x5a4] ss:$16 sps:$4 sm:$0xff]  }
 0x52c   :  { %v12420_v16 = vpack.c.bf16 %v2802_v35, %v2802_v35  ;;  %v2803_v21 = vcombine.high %v12412_v46, %v12412_v46  ;;  %v9142_v50 = vld [vmem:[%s14412_s6 + $0x7c0] ss:$16 sps:$4 sm:$0xff]   ;;  %v9150_v31 = vld [vmem:[%s14412_s6 + $0x7a4] ss:$16 sps:$4 sm:$0xff]   ;;  %v2764_v35 = vld [vmem:[#allocation4 + $0x10] sm:$0xff] }
 0x52d   :  { %5996 = vmatprep.mubr.bf16.mxu0 %v12399_v22  ;;  %v12415_v40 = vpack.c.bf16 %v2786_v11, %v2786_v11  ;;  %v9145_v13 = vld [vmem:[%s14412_s6 + $0x5a0] ss:$16 sps:$4 sm:$0xff]   ;;  %v9153_v37 = vld [vmem:[%s14412_s6 + $0x584] ss:$16 sps:$4 sm:$0xff]  }
 0x52e   :  { %5997 = vmatmul.mubr.bf16.vlgmr.msra.gmra.mxu0 %v12406_v4  ;;  %v12435_v26 = vpack.c.bf16 %v2803_v21, %v2803_v21  ;;  %v9148_v45 = vld [vmem:[%s14412_s6 + $0x7a0] ss:$16 sps:$4 sm:$0xff]   ;;  %v9156_v23 = vld [vmem:[%s14412_s6 + $0x784] ss:$16 sps:$4 sm:$0xff]   ;;  %v2804_v21 = vcombine.high %v2764_v35, %v2764_v35 }
 0x52f   :  { %6047 = vmatpush1.bf16.msra.mxu0 %v9083_v59  ;;  %6037 = vmatprep.mubr.bf16.mxu1 %v12415_v40  ;;  %v9151_v55 = vld [vmem:[%s14412_s6 + $0x580] ss:$16 sps:$4 sm:$0xff]   ;;  %v9159_v3 = vld [vmem:[%s14412_s6 + $0x564] ss:$16 sps:$4 sm:$0xff]  }
 0x530   :  { %6038 = vmatmul.mubr.bf16.vlgmr.msra.gmra.mxu1 %v12423_v27  ;;  %6048 = vmatprep.subr.bf16.mxu0 %v9092_v5  ;;  %v9154_v48 = vld [vmem:[%s14412_s6 + $0x780] ss:$16 sps:$4 sm:$0xff]   ;;  %v9162_v28 = vld [vmem:[%s14412_s6 + $0x764] ss:$16 sps:$4 sm:$0xff]  }
 0x531   :  { %6088 = vmatpush1.bf16.msra.mxu1 %v9087_v63  ;;  %6078 = vmatprep.mubr.bf16.mxu0 %v12420_v16  ;;  %v9157_v33 = vld [vmem:[%s14412_s6 + $0x560] ss:$16 sps:$4 sm:$0xff]   ;;  %v9165_v7 = vld [vmem:[%s14412_s6 + $0x544] ss:$16 sps:$4 sm:$0xff]  }
 0x532   :  { %6089 = vmatprep.subr.bf16.mxu1 %v9095_v39  ;;  %6119 = vmatprep.mubr.bf16.mxu1 %v12435_v26  ;;  %v9160_v53 = vld [vmem:[%s14412_s6 + $0x760] ss:$16 sps:$4 sm:$0xff]   ;;  %v9168_v14 = vld [vmem:[%s14412_s6 + $0x744] ss:$16 sps:$4 sm:$0xff]  }
 0x533   :  { %6049 = vmatpush1.bf16.msra.mxu0 %v9090_v12  ;;  %v9163_v59 = vld [vmem:[%s14412_s6 + $0x540] ss:$16 sps:$4 sm:$0xff]   ;;  %v9171_v11 = vld [vmem:[%s14412_s6 + $0x524] ss:$16 sps:$4 sm:$0xff]  }
 0x534   :  { %6050 = vmatprep.subr.bf16.mxu0 %v9099_v20  ;;  %v9166_v5 = vld [vmem:[%s14412_s6 + $0x740] ss:$16 sps:$4 sm:$0xff]   ;;  %v9174_v63 = vld [vmem:[%s14412_s6 + $0x724] ss:$16 sps:$4 sm:$0xff]  }
 0x535   :  { %6090 = vmatpush1.bf16.msra.mxu1 %v9093_v49  ;;  %v9169_v39 = vld [vmem:[%s14412_s6 + $0x520] ss:$16 sps:$4 sm:$0xff]   ;;  %v9177_v12 = vld [vmem:[%s14412_s6 + $0x504] ss:$16 sps:$4 sm:$0xff]   ;;  %v12602_v49 = vrot.slane %v2764_v35, %v14479_v9 }
 0x536   :  { %6091 = vmatprep.subr.bf16.mxu1 %v9102_v62  ;;  %v9172_v20 = vld [vmem:[%s14412_s6 + $0x720] ss:$16 sps:$4 sm:$0xff]   ;;  %v9180_v62 = vld [vmem:[%s14412_s6 + $0x704] ss:$16 sps:$4 sm:$0xff]  }
 0x537   :  { %6051 = vmatpush1.bf16.msra.mxu0 %v9097_v34  ;;  %v9175_v34 = vld [vmem:[%s14412_s6 + $0x500] ss:$16 sps:$4 sm:$0xff]   ;;  %v9244_v35 = vld [vmem:[%s14412_s6 + $0x9a4] ss:$16 sps:$4 sm:$0xff]  }
 0x538   :  { %6052 = vmatprep.subr.bf16.mxu0 %v9105_v17  ;;  %v12611_v17 = vrot.slane %v2804_v21, %v14479_v9  ;;  %v9250_v21 = vld [vmem:[%s14412_s6 + $0x984] ss:$16 sps:$4 sm:$0xff]  }
 0x539   :  { %6092 = vmatpush1.bf16.msra.mxu1 %v9100_v41  ;;  %v9183_v41 = vld [vmem:[%s14412_s6 + $0x8e4] ss:$16 sps:$4 sm:$0xff]  }
 0x53a   :  { %6093 = vmatprep.subr.bf16.mxu1 %v9108_v57  ;;  %v9178_v57 = vld [vmem:[%s14412_s6 + $0x700] ss:$16 sps:$4 sm:$0xff]  }
 0x53b   :  { %6053 = vmatpush1.bf16.msra.mxu0 %v9103_v18  ;;  %v2819_v18 = vcombine.high %v12602_v49, %v12602_v49 }
 0x53c   :  { %6054 = vmatprep.subr.bf16.mxu0 %v9111_v51  ;;  %v9186_v51 = vld [vmem:[%s14412_s6 + $0xae4] ss:$16 sps:$4 sm:$0xff]  }
 0x53d   :  { %6094 = vmatpush1.bf16.msra.mxu1 %v9106_v6  ;;  %v9181_v6 = vld [vmem:[%s14412_s6 + $0x8e0] ss:$16 sps:$4 sm:$0xff]  }
 0x53e   :  { %6095 = vmatprep.subr.bf16.mxu1 %v9114_v10  ;;  %v2820_v10 = vcombine.high %v12611_v17, %v12611_v17 }
 0x53f   :  { %6055 = vmatpush1.bf16.msra.mxu0 %v9109_v58  ;;  %v12631_v58 = vpack.c.bf16 %v12397_v15, %v12397_v15  ;;  %v9193_v15 = vld [vmem:[%s14412_s6 + $0xac4] ss:$16 sps:$4 sm:$0xff]  }
 0x540   :  { %6056 = vmatprep.subr.bf16.mxu0 %v9117_v2  ;;  %v9190_v2 = vld [vmem:[%s14412_s6 + $0x8c4] ss:$16 sps:$4 sm:$0xff]  }
 0x541   :  { %6096 = vmatpush1.bf16.msra.mxu1 %v9112_v36  ;;  %v12636_v36 = vpack.c.bf16 %v2819_v18, %v2819_v18  ;;  %v9254_v18 = vld [vmem:[%s14412_s6 + $0x960] ss:$16 sps:$4 sm:$0xff]  }
 0x542   :  { %6097 = vmatprep.subr.bf16.mxu1 %v9120_v43  ;;  %v9184_v43 = vld [vmem:[%s14412_s6 + $0xae0] ss:$16 sps:$4 sm:$0xff]  }
 0x543   :  { %6057 = vmatpush1.bf16.msra.mxu0 %v9115_v61  ;;  %v12644_v61 = vpack.c.bf16 %v12412_v46, %v12412_v46  ;;  %v9196_v46 = vld [vmem:[%s14412_s6 + $0x8a4] ss:$16 sps:$4 sm:$0xff]  }
 0x544   :  { %6058 = vmatprep.subr.bf16.mxu0 %v9123_v0  ;;  %v12650_v0 = vpack.c.bf16 %v2820_v10, %v2820_v10  ;;  %v9265_v10 = vld [vmem:[%s14412_s6 + $0xb44] ss:$16 sps:$4 sm:$0xff]  }
 0x545   :  { %6098 = vmatpush1.bf16.msra.mxu1 %v9118_v30  ;;  %v9188_v30 = vld [vmem:[%s14412_s6 + $0x8c0] ss:$16 sps:$4 sm:$0xff]  }
 0x546   :  { %6099 = vmatprep.subr.bf16.mxu1 %v9126_v44  ;;  %v9191_v44 = vld [vmem:[%s14412_s6 + $0xac0] ss:$16 sps:$4 sm:$0xff]  }
 0x547   :  { %6059 = vmatpush1.bf16.msra.mxu0 %v9121_v29  ;;  %v9199_v29 = vld [vmem:[%s14412_s6 + $0xaa4] ss:$16 sps:$4 sm:$0xff]  }
 0x548   :  { %6060 = vmatprep.subr.bf16.mxu0 %v9129_v56  ;;  %v9194_v56 = vld [vmem:[%s14412_s6 + $0x8a0] ss:$16 sps:$4 sm:$0xff]  }
 0x549   :  { %6100 = vmatpush1.bf16.msra.mxu1 %v9124_v1  ;;  %v9202_v1 = vld [vmem:[%s14412_s6 + $0x884] ss:$16 sps:$4 sm:$0xff]  }
 0x54a   :  { %6101 = vmatprep.subr.bf16.mxu1 %v9132_v25  ;;  %v9197_v25 = vld [vmem:[%s14412_s6 + $0xaa0] ss:$16 sps:$4 sm:$0xff]  }
 0x54b   :  { %6061 = vmatpush1.bf16.msra.mxu0 %v9127_v19  ;;  %v9205_v19 = vld [vmem:[%s14412_s6 + $0xa84] ss:$16 sps:$4 sm:$0xff]  }
 0x54c   :  { %6062 = vmatprep.subr.bf16.mxu0 %v9135_v24  ;;  %v9200_v24 = vld [vmem:[%s14412_s6 + $0x880] ss:$16 sps:$4 sm:$0xff]  }
 0x54d   :  { %6102 = vmatpush1.bf16.msra.mxu1 %v9130_v42  ;;  %v9208_v42 = vld [vmem:[%s14412_s6 + $0x864] ss:$16 sps:$4 sm:$0xff]  }
 0x54e   :  { %6103 = vmatprep.subr.bf16.mxu1 %v9138_v54  ;;  %v9203_v54 = vld [vmem:[%s14412_s6 + $0xa80] ss:$16 sps:$4 sm:$0xff]  }
 0x54f   :  { %6063 = vmatpush2.bf16.msra.mxu0 %v9133_v52  ;;  %v9211_v52 = vld [vmem:[%s14412_s6 + $0xa64] ss:$16 sps:$4 sm:$0xff]  }
 0x550   :  { %6064 = vmatprep.subr.bf16.mxu0 %v9141_v38  ;;  %v9206_v38 = vld [vmem:[%s14412_s6 + $0x860] ss:$16 sps:$4 sm:$0xff]  }
 0x551   :  { %6104 = vmatpush2.bf16.msra.mxu1 %v9136_v47  ;;  %v9214_v47 = vld [vmem:[%s14412_s6 + $0x844] ss:$16 sps:$4 sm:$0xff]  }
 0x552   :  { %6105 = vmatprep.subr.bf16.mxu1 %v9144_v32  ;;  %v9209_v32 = vld [vmem:[%s14412_s6 + $0xa60] ss:$16 sps:$4 sm:$0xff]  }
 0x553   :  { %6065 = vmatpush2.bf16.msra.mxu0 %v9139_v8  ;;  %v9217_v8 = vld [vmem:[%s14412_s6 + $0xa44] ss:$16 sps:$4 sm:$0xff]  }
 0x554   :  { %6066 = vmatprep.subr.bf16.mxu0 %v9147_v60  ;;  %v9212_v60 = vld [vmem:[%s14412_s6 + $0x840] ss:$16 sps:$4 sm:$0xff]  }
 0x555   :  { %6106 = vmatpush2.bf16.msra.mxu1 %v9142_v50  ;;  %v9220_v50 = vld [vmem:[%s14412_s6 + $0x824] ss:$16 sps:$4 sm:$0xff]  }
 0x556   :  { %6107 = vmatprep.subr.bf16.mxu1 %v9150_v31  ;;  %v9215_v31 = vld [vmem:[%s14412_s6 + $0xa40] ss:$16 sps:$4 sm:$0xff]  }
 0x557   :  { %6067 = vmatpush2.bf16.msra.mxu0 %v9145_v13  ;;  %v9223_v13 = vld [vmem:[%s14412_s6 + $0xa24] ss:$16 sps:$4 sm:$0xff]  }
 0x558   :  { %6068 = vmatprep.subr.bf16.mxu0 %v9153_v37  ;;  %v9218_v37 = vld [vmem:[%s14412_s6 + $0x820] ss:$16 sps:$4 sm:$0xff]  }
 0x559   :  { %6108 = vmatpush2.bf16.msra.mxu1 %v9148_v45  ;;  %v9226_v45 = vld [vmem:[%s14412_s6 + $0x804] ss:$16 sps:$4 sm:$0xff]  }
 0x55a   :  { %6109 = vmatprep.subr.bf16.mxu1 %v9156_v23  ;;  %v9221_v23 = vld [vmem:[%s14412_s6 + $0xa20] ss:$16 sps:$4 sm:$0xff]  }
 0x55b   :  { %6069 = vmatpush2.bf16.msra.mxu0 %v9151_v55  ;;  %v9229_v55 = vld [vmem:[%s14412_s6 + $0xa04] ss:$16 sps:$4 sm:$0xff]  }
 0x55c   :  { %6070 = vmatprep.subr.bf16.mxu0 %v9159_v3  ;;  %v9224_v3 = vld [vmem:[%s14412_s6 + $0x800] ss:$16 sps:$4 sm:$0xff]  }
 0x55d   :  { %6110 = vmatpush2.bf16.msra.mxu1 %v9154_v48  ;;  %v9232_v48 = vld [vmem:[%s14412_s6 + $0x9e4] ss:$16 sps:$4 sm:$0xff]  }
 0x55e   :  { %6111 = vmatprep.subr.bf16.mxu1 %v9162_v28  ;;  %v9227_v28 = vld [vmem:[%s14412_s6 + $0xa00] ss:$16 sps:$4 sm:$0xff]  }
 0x55f   :  { %6071 = vmatpush2.bf16.msra.mxu0 %v9157_v33  ;;  %v9235_v33 = vld [vmem:[%s14412_s6 + $0xbe4] ss:$16 sps:$4 sm:$0xff]  }
 0x560   :  { %6072 = vmatprep.subr.bf16.mxu0 %v9165_v7  ;;  %v9230_v7 = vld [vmem:[%s14412_s6 + $0x9e0] ss:$16 sps:$4 sm:$0xff]  }
 0x561   :  { %6112 = vmatpush2.bf16.msra.mxu1 %v9160_v53  ;;  %v9238_v53 = vld [vmem:[%s14412_s6 + $0x9c4] ss:$16 sps:$4 sm:$0xff]  }
 0x562   :  { %6113 = vmatprep.subr.bf16.mxu1 %v9168_v14  ;;  %v9233_v14 = vld [vmem:[%s14412_s6 + $0xbe0] ss:$16 sps:$4 sm:$0xff]  }
 0x563   :  { %6073 = vmatpush2.bf16.msra.mxu0 %v9163_v59  ;;  %v9241_v59 = vld [vmem:[%s14412_s6 + $0xbc4] ss:$16 sps:$4 sm:$0xff]  }
 0x564   :  { %6074 = vmatprep.subr.bf16.mxu0 %v9171_v11  ;;  %v9236_v11 = vld [vmem:[%s14412_s6 + $0x9c0] ss:$16 sps:$4 sm:$0xff]  }
 0x565   :  { %6114 = vmatpush2.bf16.msra.mxu1 %v9166_v5  ;;  %v9239_v5 = vld [vmem:[%s14412_s6 + $0xbc0] ss:$16 sps:$4 sm:$0xff]  }
 0x566   :  { %6115 = vmatprep.subr.bf16.mxu1 %v9174_v63  ;;  %v9247_v63 = vld [vmem:[%s14412_s6 + $0xba4] ss:$16 sps:$4 sm:$0xff]  }
 0x567   :  { %6075 = vmatpush2.bf16.msra.mxu0 %v9169_v39  ;;  %v9242_v39 = vld [vmem:[%s14412_s6 + $0x9a0] ss:$16 sps:$4 sm:$0xff]  }
 0x568   :  { %6076 = vmatprep.subr.bf16.mxu0 %v9177_v12  ;;  %v9245_v12 = vld [vmem:[%s14412_s6 + $0xba0] ss:$16 sps:$4 sm:$0xff]  }
 0x569   :  { %6116 = vmatpush2.bf16.msra.mxu1 %v9172_v20  ;;  %v9253_v20 = vld [vmem:[%s14412_s6 + $0xb84] ss:$16 sps:$4 sm:$0xff]  }
 0x56a   :  { %6117 = vmatprep.subr.bf16.mxu1 %v9180_v62  ;;  %v9248_v62 = vld [vmem:[%s14412_s6 + $0x980] ss:$16 sps:$4 sm:$0xff]  }
 0x56b   :  { %6077 = vmatpush2.bf16.msra.mxu0 %v9175_v34  ;;  %v9256_v34 = vld [vmem:[%s14412_s6 + $0x964] ss:$16 sps:$4 sm:$0xff]  }
 0x56c   :  { %6128 = vmatprep.subr.bf16.mxu0 %v9183_v41  ;;  %v9251_v41 = vld [vmem:[%s14412_s6 + $0xb80] ss:$16 sps:$4 sm:$0xff]  }
 0x56d   :  { %6118 = vmatpush2.bf16.msra.mxu1 %v9178_v57  ;;  %v9259_v57 = vld [vmem:[%s14412_s6 + $0xb64] ss:$16 sps:$4 sm:$0xff]  }
 0x56e   :  { %6079 = vmatmul.mubr.bf16.vlgmr.msra.gmra.mxu0 %v12631_v58  ;;  %6169 = vmatprep.subr.bf16.mxu1 %v9186_v51  ;;  %v9262_v51 = vld [vmem:[%s14412_s6 + $0x944] ss:$16 sps:$4 sm:$0xff]  }
 0x56f   :  { %6129 = vmatpush1.bf16.msra.mxu0 %v9181_v6  ;;  %6160 = vmatprep.mubr.bf16.mxu0 %v12636_v36  ;;  %v9257_v6 = vld [vmem:[%s14412_s6 + $0xb60] ss:$16 sps:$4 sm:$0xff]  }
 0x570   :  { %6120 = vmatmul.mubr.bf16.vlgmr.msra.gmra.mxu1 %v12644_v61  ;;  %6130 = vmatprep.subr.bf16.mxu0 %v9190_v2  ;;  %v9260_v2 = vld [vmem:[%s14412_s6 + $0x940] ss:$16 sps:$4 sm:$0xff]  }
 0x571   :  { %6170 = vmatpush1.bf16.msra.mxu1 %v9184_v43  ;;  %6201 = vmatprep.mubr.bf16.mxu1 %v12650_v0  ;;  %v9268_v43 = vld [vmem:[%s14412_s6 + $0x924] ss:$16 sps:$4 sm:$0xff]  }
 0x572   :  { %6171 = vmatprep.subr.bf16.mxu1 %v9193_v15  ;;  %v2765_v15 = vld [vmem:[#allocation4 + $0x18] sm:$0xff] }
 0x573   :  { %6131 = vmatpush1.bf16.msra.mxu0 %v9188_v30  ;;  %v9263_v30 = vld [vmem:[%s14412_s6 + $0xb40] ss:$16 sps:$4 sm:$0xff]  }
 0x574   :  { %6132 = vmatprep.subr.bf16.mxu0 %v9196_v46  ;;  %v9271_v46 = vld [vmem:[%s14412_s6 + $0xb24] ss:$16 sps:$4 sm:$0xff]  }
 0x575   :  { %6172 = vmatpush1.bf16.msra.mxu1 %v9191_v44  ;;  %v9266_v44 = vld [vmem:[%s14412_s6 + $0x920] ss:$16 sps:$4 sm:$0xff]  }
 0x576   :  { %6173 = vmatprep.subr.bf16.mxu1 %v9199_v29  ;;  %v2821_v29 = vcombine.high %v2765_v15, %v2765_v15 }
 0x577   :  { %6133 = vmatpush1.bf16.msra.mxu0 %v9194_v56  ;;  %v9274_v56 = vld [vmem:[%s14412_s6 + $0x904] ss:$16 sps:$4 sm:$0xff]  }
 0x578   :  { %6134 = vmatprep.subr.bf16.mxu0 %v9202_v1  ;;  %v9269_v1 = vld [vmem:[%s14412_s6 + $0xb20] ss:$16 sps:$4 sm:$0xff]  }
 0x579   :  { %6174 = vmatpush1.bf16.msra.mxu1 %v9197_v25  ;;  %v12820_v25 = vrot.slane %v2765_v15, %v14479_v9  ;;  %v9330_v15 = vld [vmem:[%s14412_s6 + $0xfe0] ss:$16 sps:$4 sm:$0xff]  }
 0x57a   :  { %6175 = vmatprep.subr.bf16.mxu1 %v9205_v19  ;;  %v9277_v19 = vld [vmem:[%s14412_s6 + $0xb04] ss:$16 sps:$4 sm:$0xff]  }
 0x57b   :  { %6135 = vmatpush1.bf16.msra.mxu0 %v9200_v24  ;;  %v9272_v24 = vld [vmem:[%s14412_s6 + $0x900] ss:$16 sps:$4 sm:$0xff]  }
 0x57c   :  { %6136 = vmatprep.subr.bf16.mxu0 %v9208_v42  ;;  %v12829_v42 = vrot.slane %v2821_v29, %v14479_v9  ;;  %v9278_v9 = vld [vmem:[%s14412_s6 + $0xce0] ss:$16 sps:$4 sm:$0xff]  }
 0x57d   :  { %6176 = vmatpush1.bf16.msra.mxu1 %v9203_v54  ;;  %v9280_v54 = vld [vmem:[%s14412_s6 + $0xce4] ss:$16 sps:$4 sm:$0xff]   ;;  %v9336_v29 = vld [vmem:[%s14412_s6 + $0xfc0] ss:$16 sps:$4 sm:$0xff]  }
 0x57e   :  { %6177 = vmatprep.subr.bf16.mxu1 %v9211_v52  ;;  %v9275_v52 = vld [vmem:[%s14412_s6 + $0xb00] ss:$16 sps:$4 sm:$0xff]  }
 0x57f   :  { %6137 = vmatpush1.bf16.msra.mxu0 %v9206_v38  ;;  %v2836_v38 = vcombine.high %v12820_v25, %v12820_v25 }
 0x580   :  { %6138 = vmatprep.subr.bf16.mxu0 %v9214_v47  ;;  %v9283_v47 = vld [vmem:[%s14412_s6 + $0xee4] ss:$16 sps:$4 sm:$0xff]  }
 0x581   :  { %6178 = vmatpush1.bf16.msra.mxu1 %v9209_v32  ;;  %v2837_v32 = vcombine.high %v12829_v42, %v12829_v42 }
 0x582   :  { %6179 = vmatprep.subr.bf16.mxu1 %v9217_v8  ;;  %v12849_v8 = vpack.c.bf16 %v12602_v49, %v12602_v49  ;;  %v9290_v49 = vld [vmem:[%s14412_s6 + $0xec4] ss:$16 sps:$4 sm:$0xff]  }
 0x583   :  { %6139 = vmatpush1.bf16.msra.mxu0 %v9212_v60  ;;  %v9287_v60 = vld [vmem:[%s14412_s6 + $0xcc4] ss:$16 sps:$4 sm:$0xff]  }
 0x584   :  { %6140 = vmatprep.subr.bf16.mxu0 %v9220_v50  ;;  %v12854_v50 = vpack.c.bf16 %v2836_v38, %v2836_v38  ;;  %v9353_v38 = vld [vmem:[%s14412_s6 + $0xd64] ss:$16 sps:$4 sm:$0xff]  }
 0x585   :  { %6180 = vmatpush1.bf16.msra.mxu1 %v9215_v31  ;;  %v9281_v31 = vld [vmem:[%s14412_s6 + $0xee0] ss:$16 sps:$4 sm:$0xff]  }
 0x586   :  { %6181 = vmatprep.subr.bf16.mxu1 %v9223_v13  ;;  %v12862_v13 = vpack.c.bf16 %v12611_v17, %v12611_v17  ;;  %v9293_v17 = vld [vmem:[%s14412_s6 + $0xca4] ss:$16 sps:$4 sm:$0xff]  }
 0x587   :  { %6141 = vmatpush1.bf16.msra.mxu0 %v9218_v37  ;;  %v12868_v37 = vpack.c.bf16 %v2837_v32, %v2837_v32  ;;  %v9351_v32 = vld [vmem:[%s14412_s6 + $0xd60] ss:$16 sps:$4 sm:$0xff]  }
 0x588   :  { %6142 = vmatprep.subr.bf16.mxu0 %v9226_v45  ;;  %v9285_v45 = vld [vmem:[%s14412_s6 + $0xcc0] ss:$16 sps:$4 sm:$0xff]  }
 0x589   :  { %6182 = vmatpush1.bf16.msra.mxu1 %v9221_v23  ;;  %v9288_v23 = vld [vmem:[%s14412_s6 + $0xec0] ss:$16 sps:$4 sm:$0xff]  }
 0x58a   :  { %6183 = vmatprep.subr.bf16.mxu1 %v9229_v55  ;;  %v9296_v55 = vld [vmem:[%s14412_s6 + $0xea4] ss:$16 sps:$4 sm:$0xff]  }
 0x58b   :  { %6143 = vmatpush1.bf16.msra.mxu0 %v9224_v3  ;;  %v9291_v3 = vld [vmem:[%s14412_s6 + $0xca0] ss:$16 sps:$4 sm:$0xff]  }
 0x58c   :  { %6144 = vmatprep.subr.bf16.mxu0 %v9232_v48  ;;  %v9299_v48 = vld [vmem:[%s14412_s6 + $0xc84] ss:$16 sps:$4 sm:$0xff]  }
 0x58d   :  { %6184 = vmatpush1.bf16.msra.mxu1 %v9227_v28  ;;  %v9294_v28 = vld [vmem:[%s14412_s6 + $0xea0] ss:$16 sps:$4 sm:$0xff]  }
 0x58e   :  { %6185 = vmatprep.subr.bf16.mxu1 %v9235_v33  ;;  %v9302_v33 = vld [vmem:[%s14412_s6 + $0xe84] ss:$16 sps:$4 sm:$0xff]  }
 0x58f   :  { %6145 = vmatpush2.bf16.msra.mxu0 %v9230_v7  ;;  %v9297_v7 = vld [vmem:[%s14412_s6 + $0xc80] ss:$16 sps:$4 sm:$0xff]  }
 0x590   :  { %6146 = vmatprep.subr.bf16.mxu0 %v9238_v53  ;;  %v9305_v53 = vld [vmem:[%s14412_s6 + $0xc64] ss:$16 sps:$4 sm:$0xff]  }
 0x591   :  { %6186 = vmatpush2.bf16.msra.mxu1 %v9233_v14  ;;  %v9300_v14 = vld [vmem:[%s14412_s6 + $0xe80] ss:$16 sps:$4 sm:$0xff]  }
 0x592   :  { %6187 = vmatprep.subr.bf16.mxu1 %v9241_v59  ;;  %v9308_v59 = vld [vmem:[%s14412_s6 + $0xe64] ss:$16 sps:$4 sm:$0xff]  }
 0x593   :  { %6147 = vmatpush2.bf16.msra.mxu0 %v9236_v11  ;;  %v9303_v11 = vld [vmem:[%s14412_s6 + $0xc60] ss:$16 sps:$4 sm:$0xff]  }
 0x594   :  { %6148 = vmatprep.subr.bf16.mxu0 %v9244_v35  ;;  %v9311_v35 = vld [vmem:[%s14412_s6 + $0xc44] ss:$16 sps:$4 sm:$0xff]  }
 0x595   :  { %6188 = vmatpush2.bf16.msra.mxu1 %v9239_v5  ;;  %v9306_v5 = vld [vmem:[%s14412_s6 + $0xe60] ss:$16 sps:$4 sm:$0xff]  }
 0x596   :  { %6189 = vmatprep.subr.bf16.mxu1 %v9247_v63  ;;  %v9314_v63 = vld [vmem:[%s14412_s6 + $0xe44] ss:$16 sps:$4 sm:$0xff]  }
 0x597   :  { %6149 = vmatpush2.bf16.msra.mxu0 %v9242_v39  ;;  %v9309_v39 = vld [vmem:[%s14412_s6 + $0xc40] ss:$16 sps:$4 sm:$0xff]  }
 0x598   :  { %6150 = vmatprep.subr.bf16.mxu0 %v9250_v21  ;;  %v9317_v21 = vld [vmem:[%s14412_s6 + $0xc24] ss:$16 sps:$4 sm:$0xff]  }
 0x599   :  { %6190 = vmatpush2.bf16.msra.mxu1 %v9245_v12  ;;  %v9312_v12 = vld [vmem:[%s14412_s6 + $0xe40] ss:$16 sps:$4 sm:$0xff]  }
 0x59a   :  { %6191 = vmatprep.subr.bf16.mxu1 %v9253_v20  ;;  %v9320_v20 = vld [vmem:[%s14412_s6 + $0xe24] ss:$16 sps:$4 sm:$0xff]  }
 0x59b   :  { %6151 = vmatpush2.bf16.msra.mxu0 %v9248_v62  ;;  %v9315_v62 = vld [vmem:[%s14412_s6 + $0xc20] ss:$16 sps:$4 sm:$0xff]  }
 0x59c   :  { %6152 = vmatprep.subr.bf16.mxu0 %v9256_v34  ;;  %v9323_v34 = vld [vmem:[%s14412_s6 + $0xc04] ss:$16 sps:$4 sm:$0xff]  }
 0x59d   :  { %6192 = vmatpush2.bf16.msra.mxu1 %v9251_v41  ;;  %v9318_v41 = vld [vmem:[%s14412_s6 + $0xe20] ss:$16 sps:$4 sm:$0xff]  }
 0x59e   :  { %6193 = vmatprep.subr.bf16.mxu1 %v9259_v57  ;;  %v9326_v57 = vld [vmem:[%s14412_s6 + $0xe04] ss:$16 sps:$4 sm:$0xff]  }
 0x59f   :  { %6153 = vmatpush2.bf16.msra.mxu0 %v9254_v18  ;;  %v9321_v18 = vld [vmem:[%s14412_s6 + $0xc00] ss:$16 sps:$4 sm:$0xff]  }
 0x5a0   :  { %6154 = vmatprep.subr.bf16.mxu0 %v9262_v51  ;;  %v9329_v51 = vld [vmem:[%s14412_s6 + $0xde4] ss:$16 sps:$4 sm:$0xff]  }
 0x5a1   :  { %6194 = vmatpush2.bf16.msra.mxu1 %v9257_v6  ;;  %v9324_v6 = vld [vmem:[%s14412_s6 + $0xe00] ss:$16 sps:$4 sm:$0xff]  }
 0x5a2   :  { %6195 = vmatprep.subr.bf16.mxu1 %v9265_v10  ;;  %v9332_v10 = vld [vmem:[%s14412_s6 + $0xfe4] ss:$16 sps:$4 sm:$0xff]  }
 0x5a3   :  { %6155 = vmatpush2.bf16.msra.mxu0 %v9260_v2  ;;  %v9327_v2 = vld [vmem:[%s14412_s6 + $0xde0] ss:$16 sps:$4 sm:$0xff]  }
 0x5a4   :  { %6156 = vmatprep.subr.bf16.mxu0 %v9268_v43  ;;  %v9335_v43 = vld [vmem:[%s14412_s6 + $0xdc4] ss:$16 sps:$4 sm:$0xff]  }
 0x5a5   :  { %6196 = vmatpush2.bf16.msra.mxu1 %v9263_v30  ;;  %v9338_v30 = vld [vmem:[%s14412_s6 + $0xfc4] ss:$16 sps:$4 sm:$0xff]  }
 0x5a6   :  { %6197 = vmatprep.subr.bf16.mxu1 %v9271_v46  ;;  %v9333_v46 = vld [vmem:[%s14412_s6 + $0xdc0] ss:$16 sps:$4 sm:$0xff]  }
 0x5a7   :  { %6157 = vmatpush2.bf16.msra.mxu0 %v9266_v44  ;;  %v9341_v44 = vld [vmem:[%s14412_s6 + $0xda4] ss:$16 sps:$4 sm:$0xff]  }
 0x5a8   :  { %6158 = vmatprep.subr.bf16.mxu0 %v9274_v56  ;;  %v9344_v56 = vld [vmem:[%s14412_s6 + $0xfa4] ss:$16 sps:$4 sm:$0xff]  }
 0x5a9   :  { %6198 = vmatpush2.bf16.msra.mxu1 %v9269_v1  ;;  %v9339_v1 = vld [vmem:[%s14412_s6 + $0xda0] ss:$16 sps:$4 sm:$0xff]  }
 0x5aa   :  { %6199 = vmatprep.subr.bf16.mxu1 %v9277_v19  ;;  %v9347_v19 = vld [vmem:[%s14412_s6 + $0xd84] ss:$16 sps:$4 sm:$0xff]  }
 0x5ab   :  { %6159 = vmatpush2.bf16.msra.mxu0 %v9272_v24  ;;  %v9342_v24 = vld [vmem:[%s14412_s6 + $0xfa0] ss:$16 sps:$4 sm:$0xff]  }
 0x5ac   :  { %6210 = vmatprep.subr.bf16.mxu0 %v9280_v54  ;;  %v9350_v54 = vld [vmem:[%s14412_s6 + $0xf84] ss:$16 sps:$4 sm:$0xff]  }
 0x5ad   :  { %6200 = vmatpush2.bf16.msra.mxu1 %v9275_v52  ;;  %v9345_v52 = vld [vmem:[%s14412_s6 + $0xd80] ss:$16 sps:$4 sm:$0xff]  }
 0x5ae   :  { %6161 = vmatmul.mubr.bf16.vlgmr.msra.gmra.mxu0 %v12849_v8  ;;  %6251 = vmatprep.subr.bf16.mxu1 %v9283_v47  ;;  %v9348_v47 = vld [vmem:[%s14412_s6 + $0xf80] ss:$16 sps:$4 sm:$0xff]  }
 0x5af   :  { %6211 = vmatpush1.bf16.msra.mxu0 %v9278_v9  ;;  %6242 = vmatprep.mubr.bf16.mxu0 %v12854_v50  ;;  %v9356_v9 = vld [vmem:[%s14412_s6 + $0xf64] ss:$16 sps:$4 sm:$0xff]  }
 0x5b0   :  { %6202 = vmatmul.mubr.bf16.vlgmr.msra.gmra.mxu1 %v12862_v13  ;;  %6212 = vmatprep.subr.bf16.mxu0 %v9287_v60  ;;  %v9359_v60 = vld [vmem:[%s14412_s6 + $0xd44] ss:$16 sps:$4 sm:$0xff]  }
 0x5b1   :  { %6252 = vmatpush1.bf16.msra.mxu1 %v9281_v31  ;;  %6283 = vmatprep.mubr.bf16.mxu1 %v12868_v37  ;;  %v9354_v31 = vld [vmem:[%s14412_s6 + $0xf60] ss:$16 sps:$4 sm:$0xff]  }
 0x5b2   :  { %6253 = vmatprep.subr.bf16.mxu1 %v9290_v49  ;;  %v9362_v49 = vld [vmem:[%s14412_s6 + $0xf44] ss:$16 sps:$4 sm:$0xff]  }
 0x5b3   :  { %6213 = vmatpush1.bf16.msra.mxu0 %v9285_v45  ;;  %v9357_v45 = vld [vmem:[%s14412_s6 + $0xd40] ss:$16 sps:$4 sm:$0xff]  }
 0x5b4   :  { %6214 = vmatprep.subr.bf16.mxu0 %v9293_v17  ;;  %v9365_v17 = vld [vmem:[%s14412_s6 + $0xd24] ss:$16 sps:$4 sm:$0xff]  }
 0x5b5   :  { %6254 = vmatpush1.bf16.msra.mxu1 %v9288_v23  ;;  %v9360_v23 = vld [vmem:[%s14412_s6 + $0xf40] ss:$16 sps:$4 sm:$0xff]  }
 0x5b6   :  { %6255 = vmatprep.subr.bf16.mxu1 %v9296_v55  ;;  %v9368_v55 = vld [vmem:[%s14412_s6 + $0xf24] ss:$16 sps:$4 sm:$0xff]  }
 0x5b7   :  { %6215 = vmatpush1.bf16.msra.mxu0 %v9291_v3  ;;  %v9363_v3 = vld [vmem:[%s14412_s6 + $0xd20] ss:$16 sps:$4 sm:$0xff]  }
 0x5b8   :  { %6216 = vmatprep.subr.bf16.mxu0 %v9299_v48  ;;  %v9371_v48 = vld [vmem:[%s14412_s6 + $0xd04] ss:$16 sps:$4 sm:$0xff]  }
 0x5b9   :  { %6256 = vmatpush1.bf16.msra.mxu1 %v9294_v28  ;;  %v9366_v28 = vld [vmem:[%s14412_s6 + $0xf20] ss:$16 sps:$4 sm:$0xff]  }
 0x5ba   :  { %6257 = vmatprep.subr.bf16.mxu1 %v9302_v33  ;;  %v9374_v33 = vld [vmem:[%s14412_s6 + $0xf04] ss:$16 sps:$4 sm:$0xff]  }
 0x5bb   :  { %6217 = vmatpush1.bf16.msra.mxu0 %v9297_v7  ;;  %v9369_v7 = vld [vmem:[%s14412_s6 + $0xd00] ss:$16 sps:$4 sm:$0xff]  }
 0x5bc   :  { %6218 = vmatprep.subr.bf16.mxu0 %v9305_v53  ;;  %v14480_v53 = vld [vmem:[#allocation8_spill] sm:$0xff] }
 0x5bd   :  { %6258 = vmatpush1.bf16.msra.mxu1 %v9300_v14  ;;  %v3386_v14 = vsub.s32 0, %v14480_v53 }
 0x5be   :  { %6259 = vmatprep.subr.bf16.mxu1 %v9308_v59  ;;  %v9377_v59 = vld [vmem:[%s14412_s6 + $0xec] ss:$16 sps:$4 sm:$0xff]  }
 0x5bf   :  { %6219 = vmatpush1.bf16.msra.mxu0 %v9303_v11  ;;  %v3382_v11 = vld [vmem:[%s14413_s7] sm:$0xf] }
 0x5c0   :  { %6220 = vmatprep.subr.bf16.mxu0 %v9311_v35  ;;  %v9372_v35 = vld [vmem:[%s14412_s6 + $0xf00] ss:$16 sps:$4 sm:$0xff]  }
 0x5c1   :  { %6260 = vmatpush1.bf16.msra.mxu1 %v9306_v5  ;;  %v3390_v5 = vsub.s32 1, %v14480_v53 }
 0x5c2   :  { %6261 = vmatprep.subr.bf16.mxu1 %v9314_v63  ;;  %v9380_v63 = vld [vmem:[%s14412_s6 + $0x2ec] ss:$16 sps:$4 sm:$0xff]  }
 0x5c3   :  { %6221 = vmatpush1.bf16.msra.mxu0 %v9309_v39  ;;  %v9375_v39 = vld [vmem:[%s14412_s6 + $0xe8] ss:$16 sps:$4 sm:$0xff]  }
 0x5c4   :  { %6222 = vmatprep.subr.bf16.mxu0 %v9317_v21  ;;  %v3387_v21 = vrot.slane %v3382_v11, %v3386_v14 }
 0x5c5   :  { %6262 = vmatpush1.bf16.msra.mxu1 %v9312_v12  ;;  %v13064_v12 = vpack.c.bf16 %v12820_v25, %v12820_v25  ;;  %v13077_v25 = vpack.c.bf16 %v12829_v42, %v12829_v42  ;;  %v9389_v42 = vld [vmem:[%s14412_s6 + $0xac] ss:$16 sps:$4 sm:$0xff]  }
 0x5c6   :  { %6263 = vmatprep.subr.bf16.mxu1 %v9320_v20  ;;  %v9383_v20 = vld [vmem:[%s14412_s6 + $0xcc] ss:$16 sps:$4 sm:$0xff]  }
 0x5c7   :  { %6223 = vmatpush1.bf16.msra.mxu0 %v9315_v62  ;;  %v9378_v62 = vld [vmem:[%s14412_s6 + $0x2e8] ss:$16 sps:$4 sm:$0xff]  }
 0x5c8   :  { %6224 = vmatprep.subr.bf16.mxu0 %v9323_v34  ;;  %v3391_v34 = vrot.slane %v3382_v11, %v3390_v5  ;;  %v9420_v11 = vld [vmem:[%s14412_s6 + $0x208] ss:$16 sps:$4 sm:$0xff]  }
 0x5c9   :  { %6264 = vmatpush1.bf16.msra.mxu1 %v9318_v41 }
 0x5ca   :  { %6265 = vmatprep.subr.bf16.mxu1 %v9326_v57  ;;  %v9386_v57 = vld [vmem:[%s14412_s6 + $0x2cc] ss:$16 sps:$4 sm:$0xff]  }
 0x5cb   :  { %6225 = vmatpush1.bf16.msra.mxu0 %v9321_v18 }
 0x5cc   :  { %6226 = vmatprep.subr.bf16.mxu0 %v9329_v51  ;;  %v9381_v51 = vld [vmem:[%s14412_s6 + $0xc8] ss:$16 sps:$4 sm:$0xff]  }
 0x5cd   :  { %6266 = vmatpush1.bf16.msra.mxu1 %v9324_v6 }
 0x5ce   :  { %6267 = vmatprep.subr.bf16.mxu1 %v9332_v10 }
 0x5cf   :  { %6227 = vmatpush2.bf16.msra.mxu0 %v9327_v2 }
 0x5d0   :  { %6228 = vmatprep.subr.bf16.mxu0 %v9335_v43 }
 0x5d1   :  { %6268 = vmatpush2.bf16.msra.mxu1 %v9330_v15 }
 0x5d2   :  { %6269 = vmatprep.subr.bf16.mxu1 %v9338_v30 }
 0x5d3   :  { %6229 = vmatpush2.bf16.msra.mxu0 %v9333_v46  ;;  %v9392_v46 = vld [vmem:[%s14412_s6 + $0x2ac] ss:$16 sps:$4 sm:$0xff]  }
 0x5d4   :  { %6230 = vmatprep.subr.bf16.mxu0 %v9341_v44 }
 0x5d5   :  { %6270 = vmatpush2.bf16.msra.mxu1 %v9336_v29  ;;  %v9387_v29 = vld [vmem:[%s14412_s6 + $0xa8] ss:$16 sps:$4 sm:$0xff]  }
 0x5d6   :  { %6271 = vmatprep.subr.bf16.mxu1 %v9344_v56 }
 0x5d7   :  { %6231 = vmatpush2.bf16.msra.mxu0 %v9339_v1  ;;  %v9395_v1 = vld [vmem:[%s14412_s6 + $0x8c] ss:$16 sps:$4 sm:$0xff]  }
 0x5d8   :  { %6232 = vmatprep.subr.bf16.mxu0 %v9347_v19  ;;  %v9390_v19 = vld [vmem:[%s14412_s6 + $0x2a8] ss:$16 sps:$4 sm:$0xff]  }
 0x5d9   :  { %6272 = vmatpush2.bf16.msra.mxu1 %v9342_v24 }
 0x5da   :  { %6273 = vmatprep.subr.bf16.mxu1 %v9350_v54  ;;  %v9398_v54 = vld [vmem:[%s14412_s6 + $0x28c] ss:$16 sps:$4 sm:$0xff]  }
 0x5db   :  { %6233 = vmatpush2.bf16.msra.mxu0 %v9345_v52  ;;  %v9393_v52 = vld [vmem:[%s14412_s6 + $0x88] ss:$16 sps:$4 sm:$0xff]  }
 0x5dc   :  { %6234 = vmatprep.subr.bf16.mxu0 %v9353_v38  ;;  %v9401_v38 = vld [vmem:[%s14412_s6 + $0x6c] ss:$16 sps:$4 sm:$0xff]  }
 0x5dd   :  { %6274 = vmatpush2.bf16.msra.mxu1 %v9348_v47  ;;  %v9396_v47 = vld [vmem:[%s14412_s6 + $0x288] ss:$16 sps:$4 sm:$0xff]  }
 0x5de   :  { %6275 = vmatprep.subr.bf16.mxu1 %v9356_v9  ;;  %v9404_v9 = vld [vmem:[%s14412_s6 + $0x26c] ss:$16 sps:$4 sm:$0xff]  }
 0x5df   :  { %6235 = vmatpush2.bf16.msra.mxu0 %v9351_v32  ;;  %v9399_v32 = vld [vmem:[%s14412_s6 + $0x68] ss:$16 sps:$4 sm:$0xff]  }
 0x5e0   :  { %6236 = vmatprep.subr.bf16.mxu0 %v9359_v60  ;;  %v9407_v60 = vld [vmem:[%s14412_s6 + $0x4c] ss:$16 sps:$4 sm:$0xff]  }
 0x5e1   :  { %6276 = vmatpush2.bf16.msra.mxu1 %v9354_v31  ;;  %v9402_v31 = vld [vmem:[%s14412_s6 + $0x268] ss:$16 sps:$4 sm:$0xff]  }
 0x5e2   :  { %6277 = vmatprep.subr.bf16.mxu1 %v9362_v49  ;;  %v9410_v49 = vld [vmem:[%s14412_s6 + $0x24c] ss:$16 sps:$4 sm:$0xff]  }
 0x5e3   :  { %6237 = vmatpush2.bf16.msra.mxu0 %v9357_v45  ;;  %v9405_v45 = vld [vmem:[%s14412_s6 + $0x48] ss:$16 sps:$4 sm:$0xff]  }
 0x5e4   :  { %6238 = vmatprep.subr.bf16.mxu0 %v9365_v17  ;;  %v9413_v17 = vld [vmem:[%s14412_s6 + $0x2c] ss:$16 sps:$4 sm:$0xff]  }
 0x5e5   :  { %6278 = vmatpush2.bf16.msra.mxu1 %v9360_v23  ;;  %v9408_v23 = vld [vmem:[%s14412_s6 + $0x248] ss:$16 sps:$4 sm:$0xff]  }
 0x5e6   :  { %6279 = vmatprep.subr.bf16.mxu1 %v9368_v55  ;;  %v9416_v55 = vld [vmem:[%s14412_s6 + $0x22c] ss:$16 sps:$4 sm:$0xff]  }
 0x5e7   :  { %6239 = vmatpush2.bf16.msra.mxu0 %v9363_v3  ;;  %v9411_v3 = vld [vmem:[%s14412_s6 + $0x28] ss:$16 sps:$4 sm:$0xff]  }
 0x5e8   :  { %6240 = vmatprep.subr.bf16.mxu0 %v9371_v48  ;;  %v9419_v48 = vld [vmem:[%s14412_s6 + $0xc] ss:$16 sps:$4 sm:$0xff]  }
 0x5e9   :  { %6280 = vmatpush2.bf16.msra.mxu1 %v9366_v28  ;;  %v9414_v28 = vld [vmem:[%s14412_s6 + $0x228] ss:$16 sps:$4 sm:$0xff]  }
 0x5ea   :  { %6281 = vmatprep.subr.bf16.mxu1 %v9374_v33  ;;  %v9422_v33 = vld [vmem:[%s14412_s6 + $0x20c] ss:$16 sps:$4 sm:$0xff]  }
 0x5eb   :  { %6241 = vmatpush2.bf16.msra.mxu0 %v9369_v7  ;;  %v9417_v7 = vld [vmem:[%s14412_s6 + $0x8] ss:$16 sps:$4 sm:$0xff]  }
 0x5ec   :  { %6292 = vmatprep.subr.bf16.mxu0 %v9377_v59  ;;  %v9425_v59 = vld [vmem:[%s14412_s6 + $0x1ec] ss:$16 sps:$4 sm:$0xff]  }
 0x5ed   :  { %6282 = vmatpush2.bf16.msra.mxu1 %v9372_v35  ;;  %v9428_v35 = vld [vmem:[%s14412_s6 + $0x3ec] ss:$16 sps:$4 sm:$0xff]  }
 0x5ee   :  { %6243 = vmatmul.mubr.bf16.vlgmr.msra.gmra.mxu0 %v13064_v12  ;;  %v5998_v41 = vpop.f32.mrf.mxu0  ;;  %6333 = vmatprep.subr.bf16.mxu1 %v9380_v63  ;;  %v9423_v63 = vld [vmem:[%s14412_s6 + $0x1e8] ss:$16 sps:$4 sm:$0xff]  }
 0x5ef   :  { %v5999_v18 = vadd.f32 %v5998_v41, %v3387_v21  ;;  %6293 = vmatpush1.bf16.msra.mxu0 %v9375_v39  ;;  %6324 = vmatprep.mubr.bf16.mxu0 %v12399_v22  ;;  %v9384_v22 = vld [vmem:[%s14412_s6 + $0x2c8] ss:$16 sps:$4 sm:$0xff]   ;;  %v9431_v39 = vld [vmem:[%s14412_s6 + $0x1cc] ss:$16 sps:$4 sm:$0xff]  }
 0x5f0   :  { %6284 = vmatmul.mubr.bf16.vlgmr.msra.gmra.mxu1 %v13077_v25  ;;  %v6000_v6 = vpop.f32.mrf.mxu0  ;;  %v6039_v10 = vpop.f32.mrf.mxu1  ;;  %6294 = vmatprep.subr.bf16.mxu0 %v9383_v20  ;;  %v9426_v21 = vld [vmem:[%s14412_s6 + $0x3e8] ss:$16 sps:$4 sm:$0xff]   ;;  %v9434_v20 = vld [vmem:[%s14412_s6 + $0x3cc] ss:$16 sps:$4 sm:$0xff]  }
 0x5f1   :  { %v6001_v2 = vadd.f32 %v6000_v6, %v3391_v34  ;;  %v13090_v43 = vadd.f32 %v6039_v10, %v5999_v18  ;;  %6334 = vmatpush1.bf16.msra.mxu1 %v9378_v62  ;;  %6365 = vmatprep.mubr.bf16.mxu1 %v12415_v40  ;;  %v9429_v62 = vld [vmem:[%s14412_s6 + $0x1c8] ss:$16 sps:$4 sm:$0xff]   ;;  %v9437_v34 = vld [vmem:[%s14412_s6 + $0x1ac] ss:$16 sps:$4 sm:$0xff]  }
 0x5f2   :  { %v6002_v15 = vpop.f32.mrf.mxu0  ;;  %v6041_v30 = vpop.f32.mrf.mxu1  ;;  %6335 = vmatprep.subr.bf16.mxu1 %v9386_v57  ;;  %v9432_v41 = vld [vmem:[%s14412_s6 + $0x3c8] ss:$16 sps:$4 sm:$0xff]   ;;  %v9440_v57 = vld [vmem:[%s14412_s6 + $0x3ac] ss:$16 sps:$4 sm:$0xff]  }
 0x5f3   :  { %v13099_v44 = vadd.f32 %v6041_v30, %v6001_v2  ;;  %6295 = vmatpush1.bf16.msra.mxu0 %v9381_v51  ;;  %v9435_v18 = vld [vmem:[%s14412_s6 + $0x1a8] ss:$16 sps:$4 sm:$0xff]   ;;  %v9443_v51 = vld [vmem:[%s14412_s6 + $0x18c] ss:$16 sps:$4 sm:$0xff]  }
 0x5f4   :  { %v6003_v56 = vpop.f32.mrf.mxu0  ;;  %v6043_v40 = vpop.f32.mrf.mxu1  ;;  %6296 = vmatprep.subr.bf16.mxu0 %v9389_v42  ;;  %v9438_v6 = vld [vmem:[%s14412_s6 + $0x3a8] ss:$16 sps:$4 sm:$0xff]   ;;  %v9446_v10 = vld [vmem:[%s14412_s6 + $0x38c] ss:$16 sps:$4 sm:$0xff]  }
 0x5f5   :  { %6336 = vmatpush1.bf16.msra.mxu1 %v9384_v22  ;;  %v9441_v42 = vld [vmem:[%s14412_s6 + $0x188] ss:$16 sps:$4 sm:$0xff]   ;;  %v9449_v2 = vld [vmem:[%s14412_s6 + $0x16c] ss:$16 sps:$4 sm:$0xff]  }
 0x5f6   :  { %v6044_v24 = vpop.f32.mrf.mxu1  ;;  %6337 = vmatprep.subr.bf16.mxu1 %v9392_v46  ;;  %v9444_v22 = vld [vmem:[%s14412_s6 + $0x388] ss:$16 sps:$4 sm:$0xff]   ;;  %v9452_v15 = vld [vmem:[%s14412_s6 + $0x36c] ss:$16 sps:$4 sm:$0xff]  }
 0x5f7   :  { %6297 = vmatpush1.bf16.msra.mxu0 %v9387_v29  ;;  %v9447_v30 = vld [vmem:[%s14412_s6 + $0x168] ss:$16 sps:$4 sm:$0xff]   ;;  %v9455_v46 = vld [vmem:[%s14412_s6 + $0x14c] ss:$16 sps:$4 sm:$0xff]  }
 0x5f8   :  { %6298 = vmatprep.subr.bf16.mxu0 %v9395_v1  ;;  %v9450_v29 = vld [vmem:[%s14412_s6 + $0x368] ss:$16 sps:$4 sm:$0xff]   ;;  %v9458_v56 = vld [vmem:[%s14412_s6 + $0x34c] ss:$16 sps:$4 sm:$0xff]  }
 0x5f9   :  { %6338 = vmatpush1.bf16.msra.mxu1 %v9390_v19  ;;  %v9453_v40 = vld [vmem:[%s14412_s6 + $0x148] ss:$16 sps:$4 sm:$0xff]   ;;  %v9461_v1 = vld [vmem:[%s14412_s6 + $0x12c] ss:$16 sps:$4 sm:$0xff]  }
 0x5fa   :  { %6339 = vmatprep.subr.bf16.mxu1 %v9398_v54  ;;  %v9456_v19 = vld [vmem:[%s14412_s6 + $0x348] ss:$16 sps:$4 sm:$0xff]   ;;  %v9464_v24 = vld [vmem:[%s14412_s6 + $0x32c] ss:$16 sps:$4 sm:$0xff]  }
 0x5fb   :  { %6299 = vmatpush1.bf16.msra.mxu0 %v9393_v52  ;;  %v9459_v54 = vld [vmem:[%s14412_s6 + $0x128] ss:$16 sps:$4 sm:$0xff]   ;;  %v9467_v52 = vld [vmem:[%s14412_s6 + $0x10c] ss:$16 sps:$4 sm:$0xff]  }
 0x5fc   :  { %6300 = vmatprep.subr.bf16.mxu0 %v9401_v38  ;;  %v9462_v38 = vld [vmem:[%s14412_s6 + $0x328] ss:$16 sps:$4 sm:$0xff]  }
 0x5fd   :  { %6340 = vmatpush1.bf16.msra.mxu1 %v9396_v47  ;;  %v9470_v47 = vld [vmem:[%s14412_s6 + $0x30c] ss:$16 sps:$4 sm:$0xff]  }
 0x5fe   :  { %6341 = vmatprep.subr.bf16.mxu1 %v9404_v9  ;;  %v9465_v9 = vld [vmem:[%s14412_s6 + $0x108] ss:$16 sps:$4 sm:$0xff]  }
 0x5ff   :  { %6301 = vmatpush1.bf16.msra.mxu0 %v9399_v32  ;;  %v9473_v32 = vld [vmem:[%s14412_s6 + $0x4ec] ss:$16 sps:$4 sm:$0xff]  }
 0x600   :  { %6302 = vmatprep.subr.bf16.mxu0 %v9407_v60  ;;  %v9468_v60 = vld [vmem:[%s14412_s6 + $0x308] ss:$16 sps:$4 sm:$0xff]  }
 0x601   :  { %6342 = vmatpush1.bf16.msra.mxu1 %v9402_v31  ;;  %v9476_v31 = vld [vmem:[%s14412_s6 + $0x6ec] ss:$16 sps:$4 sm:$0xff]  }
 0x602   :  { %6343 = vmatprep.subr.bf16.mxu1 %v9410_v49  ;;  %v9471_v49 = vld [vmem:[%s14412_s6 + $0x4e8] ss:$16 sps:$4 sm:$0xff]  }
 0x603   :  { %6303 = vmatpush1.bf16.msra.mxu0 %v9405_v45  ;;  %v9479_v45 = vld [vmem:[%s14412_s6 + $0x4cc] ss:$16 sps:$4 sm:$0xff]  }
 0x604   :  { %6304 = vmatprep.subr.bf16.mxu0 %v9413_v17  ;;  %v9474_v17 = vld [vmem:[%s14412_s6 + $0x6e8] ss:$16 sps:$4 sm:$0xff]  }
 0x605   :  { %6344 = vmatpush1.bf16.msra.mxu1 %v9408_v23 }
 0x606   :  { %6345 = vmatprep.subr.bf16.mxu1 %v9416_v55  ;;  %v9482_v55 = vld [vmem:[%s14412_s6 + $0x6cc] ss:$16 sps:$4 sm:$0xff]  }
 0x607   :  { %6305 = vmatpush1.bf16.msra.mxu0 %v9411_v3 }
 0x608   :  { %6306 = vmatprep.subr.bf16.mxu0 %v9419_v48  ;;  %v9477_v48 = vld [vmem:[%s14412_s6 + $0x4c8] ss:$16 sps:$4 sm:$0xff]  }
 0x609   :  { %6346 = vmatpush1.bf16.msra.mxu1 %v9414_v28 }
 0x60a   :  { %6347 = vmatprep.subr.bf16.mxu1 %v9422_v33 }
 0x60b   :  { %6307 = vmatpush1.bf16.msra.mxu0 %v9417_v7 }
 0x60c   :  { %6308 = vmatprep.subr.bf16.mxu0 %v9425_v59 }
 0x60d   :  { %6348 = vmatpush1.bf16.msra.mxu1 %v9420_v11 }
 0x60e   :  { %6349 = vmatprep.subr.bf16.mxu1 %v9428_v35 }
 0x60f   :  { %6309 = vmatpush2.bf16.msra.mxu0 %v9423_v63 }
 0x610   :  { %6310 = vmatprep.subr.bf16.mxu0 %v9431_v39  ;;  %v9491_v39 = vld [vmem:[%s14412_s6 + $0x48c] ss:$16 sps:$4 sm:$0xff]  }
 0x611   :  { %6350 = vmatpush2.bf16.msra.mxu1 %v9426_v21  ;;  %v9486_v21 = vld [vmem:[%s14412_s6 + $0x6a8] ss:$16 sps:$4 sm:$0xff]  }
 0x612   :  { %6351 = vmatprep.subr.bf16.mxu1 %v9434_v20 }
 0x613   :  { %6311 = vmatpush2.bf16.msra.mxu0 %v9429_v62  ;;  %v9494_v62 = vld [vmem:[%s14412_s6 + $0x68c] ss:$16 sps:$4 sm:$0xff]  }
 0x614   :  { %6312 = vmatprep.subr.bf16.mxu0 %v9437_v34  ;;  %v9489_v34 = vld [vmem:[%s14412_s6 + $0x488] ss:$16 sps:$4 sm:$0xff]  }
 0x615   :  { %6352 = vmatpush2.bf16.msra.mxu1 %v9432_v41  ;;  %v9497_v41 = vld [vmem:[%s14412_s6 + $0x46c] ss:$16 sps:$4 sm:$0xff]  }
 0x616   :  { %6353 = vmatprep.subr.bf16.mxu1 %v9440_v57  ;;  %v9492_v57 = vld [vmem:[%s14412_s6 + $0x688] ss:$16 sps:$4 sm:$0xff]  }
 0x617   :  { %6313 = vmatpush2.bf16.msra.mxu0 %v9435_v18  ;;  %v9500_v18 = vld [vmem:[%s14412_s6 + $0x66c] ss:$16 sps:$4 sm:$0xff]  }
 0x618   :  { %6314 = vmatprep.subr.bf16.mxu0 %v9443_v51  ;;  %v9495_v51 = vld [vmem:[%s14412_s6 + $0x468] ss:$16 sps:$4 sm:$0xff]  }
 0x619   :  { %6354 = vmatpush2.bf16.msra.mxu1 %v9438_v6  ;;  %v9503_v6 = vld [vmem:[%s14412_s6 + $0x44c] ss:$16 sps:$4 sm:$0xff]  }
 0x61a   :  { %6355 = vmatprep.subr.bf16.mxu1 %v9446_v10  ;;  %v9498_v10 = vld [vmem:[%s14412_s6 + $0x668] ss:$16 sps:$4 sm:$0xff]  }
 0x61b   :  { %6315 = vmatpush2.bf16.msra.mxu0 %v9441_v42  ;;  %v9506_v42 = vld [vmem:[%s14412_s6 + $0x64c] ss:$16 sps:$4 sm:$0xff]  }
 0x61c   :  { %6316 = vmatprep.subr.bf16.mxu0 %v9449_v2  ;;  %v9501_v2 = vld [vmem:[%s14412_s6 + $0x448] ss:$16 sps:$4 sm:$0xff]  }
 0x61d   :  { %6356 = vmatpush2.bf16.msra.mxu1 %v9444_v22  ;;  %v9509_v22 = vld [vmem:[%s14412_s6 + $0x42c] ss:$16 sps:$4 sm:$0xff]  }
 0x61e   :  { %6357 = vmatprep.subr.bf16.mxu1 %v9452_v15  ;;  %v9504_v15 = vld [vmem:[%s14412_s6 + $0x648] ss:$16 sps:$4 sm:$0xff]  }
 0x61f   :  { %6317 = vmatpush2.bf16.msra.mxu0 %v9447_v30  ;;  %v9512_v30 = vld [vmem:[%s14412_s6 + $0x62c] ss:$16 sps:$4 sm:$0xff]  }
 0x620   :  { %6318 = vmatprep.subr.bf16.mxu0 %v9455_v46  ;;  %v9507_v46 = vld [vmem:[%s14412_s6 + $0x428] ss:$16 sps:$4 sm:$0xff]  }
 0x621   :  { %6358 = vmatpush2.bf16.msra.mxu1 %v9450_v29  ;;  %v9515_v29 = vld [vmem:[%s14412_s6 + $0x40c] ss:$16 sps:$4 sm:$0xff]  }
 0x622   :  { %6359 = vmatprep.subr.bf16.mxu1 %v9458_v56  ;;  %v9510_v56 = vld [vmem:[%s14412_s6 + $0x628] ss:$16 sps:$4 sm:$0xff]  }
 0x623   :  { %6319 = vmatpush2.bf16.msra.mxu0 %v9453_v40  ;;  %v9518_v40 = vld [vmem:[%s14412_s6 + $0x60c] ss:$16 sps:$4 sm:$0xff]  }
 0x624   :  { %6320 = vmatprep.subr.bf16.mxu0 %v9461_v1  ;;  %v9513_v1 = vld [vmem:[%s14412_s6 + $0x408] ss:$16 sps:$4 sm:$0xff]  }
 0x625   :  { %6360 = vmatpush2.bf16.msra.mxu1 %v9456_v19  ;;  %v9521_v19 = vld [vmem:[%s14412_s6 + $0x5ec] ss:$16 sps:$4 sm:$0xff]  }
 0x626   :  { %6361 = vmatprep.subr.bf16.mxu1 %v9464_v24  ;;  %v9516_v24 = vld [vmem:[%s14412_s6 + $0x608] ss:$16 sps:$4 sm:$0xff]  }
 0x627   :  { %6321 = vmatpush2.bf16.msra.mxu0 %v9459_v54  ;;  %v9524_v54 = vld [vmem:[%s14412_s6 + $0x7ec] ss:$16 sps:$4 sm:$0xff]  }
 0x628   :  { %6322 = vmatprep.subr.bf16.mxu0 %v9467_v52  ;;  %v9519_v52 = vld [vmem:[%s14412_s6 + $0x5e8] ss:$16 sps:$4 sm:$0xff]  }
 0x629   :  { %6362 = vmatpush2.bf16.msra.mxu1 %v9462_v38  ;;  %v9527_v38 = vld [vmem:[%s14412_s6 + $0x5cc] ss:$16 sps:$4 sm:$0xff]  }
 0x62a   :  { %6363 = vmatprep.subr.bf16.mxu1 %v9470_v47  ;;  %v9522_v47 = vld [vmem:[%s14412_s6 + $0x7e8] ss:$16 sps:$4 sm:$0xff]  }
 0x62b   :  { %6323 = vmatpush2.bf16.msra.mxu0 %v9465_v9  ;;  %v9530_v9 = vld [vmem:[%s14412_s6 + $0x7cc] ss:$16 sps:$4 sm:$0xff]  }
 0x62c   :  { %6374 = vmatprep.subr.bf16.mxu0 %v9473_v32  ;;  %v9525_v32 = vld [vmem:[%s14412_s6 + $0x5c8] ss:$16 sps:$4 sm:$0xff]  }
 0x62d   :  { %6364 = vmatpush2.bf16.msra.mxu1 %v9468_v60  ;;  %v9533_v60 = vld [vmem:[%s14412_s6 + $0x5ac] ss:$16 sps:$4 sm:$0xff]  }
 0x62e   :  { %v6080_v23 = vpop.f32.mrf.mxu0  ;;  %6325 = vmatmul.mubr.bf16.vlgmr.msra.gmra.mxu0 %v12406_v4  ;;  %6415 = vmatprep.subr.bf16.mxu1 %v9476_v31  ;;  %v9485_v4 = vld [vmem:[%s14412_s6 + $0x4ac] ss:$16 sps:$4 sm:$0xff]   ;;  %v9528_v31 = vld [vmem:[%s14412_s6 + $0x7c8] ss:$16 sps:$4 sm:$0xff]  }
 0x62f   :  { %v6081_v3 = vadd.f32 %v6080_v23, %v13090_v43  ;;  %6375 = vmatpush1.bf16.msra.mxu0 %v9471_v49  ;;  %6406 = vmatprep.mubr.bf16.mxu0 %v12420_v16  ;;  %v9480_v16 = vld [vmem:[%s14412_s6 + $0x6c8] ss:$16 sps:$4 sm:$0xff]   ;;  %v9536_v49 = vld [vmem:[%s14412_s6 + $0x7ac] ss:$16 sps:$4 sm:$0xff]  }
 0x630   :  { %v6082_v28 = vpop.f32.mrf.mxu0  ;;  %v6121_v33 = vpop.f32.mrf.mxu1  ;;  %6366 = vmatmul.mubr.bf16.vlgmr.msra.gmra.mxu1 %v12423_v27  ;;  %6376 = vmatprep.subr.bf16.mxu0 %v9479_v45  ;;  %v9488_v27 = vld [vmem:[%s14412_s6 + $0x6ac] ss:$16 sps:$4 sm:$0xff]   ;;  %v9531_v45 = vld [vmem:[%s14412_s6 + $0x5a8] ss:$16 sps:$4 sm:$0xff]  }
 0x631   :  { %v6083_v7 = vadd.f32 %v6082_v28, %v13099_v44  ;;  %v13292_v59 = vadd.f32 %v6121_v33, %v6081_v3  ;;  %6416 = vmatpush1.bf16.msra.mxu1 %v9474_v17  ;;  %6447 = vmatprep.mubr.bf16.mxu1 %v12435_v26  ;;  %v9483_v44 = vld [vmem:[%s14412_s6 + $0x4a8] ss:$16 sps:$4 sm:$0xff]   ;;  %v9539_v17 = vld [vmem:[%s14412_s6 + $0x58c] ss:$16 sps:$4 sm:$0xff]  }
 0x632   :  { %v6084_v43 = vpop.f32.mrf.mxu0  ;;  %v6123_v11 = vpop.f32.mrf.mxu1  ;;  %6417 = vmatprep.subr.bf16.mxu1 %v9482_v55  ;;  %v9534_v23 = vld [vmem:[%s14412_s6 + $0x7a8] ss:$16 sps:$4 sm:$0xff]   ;;  %v9542_v55 = vld [vmem:[%s14412_s6 + $0x78c] ss:$16 sps:$4 sm:$0xff]  }
 0x633   :  { %v13301_v35 = vadd.f32 %v6123_v11, %v6083_v7  ;;  %6377 = vmatpush1.bf16.msra.mxu0 %v9477_v48  ;;  %v9537_v3 = vld [vmem:[%s14412_s6 + $0x588] ss:$16 sps:$4 sm:$0xff]   ;;  %v9545_v48 = vld [vmem:[%s14412_s6 + $0x56c] ss:$16 sps:$4 sm:$0xff]  }
 0x634   :  { %v6085_v63 = vpop.f32.mrf.mxu0  ;;  %v6125_v26 = vpop.f32.mrf.mxu1  ;;  %6378 = vmatprep.subr.bf16.mxu0 %v9485_v4  ;;  %v9540_v28 = vld [vmem:[%s14412_s6 + $0x788] ss:$16 sps:$4 sm:$0xff]   ;;  %v9548_v33 = vld [vmem:[%s14412_s6 + $0x76c] ss:$16 sps:$4 sm:$0xff]  }
 0x635   :  { %6418 = vmatpush1.bf16.msra.mxu1 %v9480_v16  ;;  %v9543_v4 = vld [vmem:[%s14412_s6 + $0x568] ss:$16 sps:$4 sm:$0xff]   ;;  %v9551_v7 = vld [vmem:[%s14412_s6 + $0x54c] ss:$16 sps:$4 sm:$0xff]  }
 0x636   :  { %v6126_v20 = vpop.f32.mrf.mxu1  ;;  %6419 = vmatprep.subr.bf16.mxu1 %v9488_v27  ;;  %v9546_v16 = vld [vmem:[%s14412_s6 + $0x768] ss:$16 sps:$4 sm:$0xff]   ;;  %v9554_v43 = vld [vmem:[%s14412_s6 + $0x74c] ss:$16 sps:$4 sm:$0xff]  }
 0x637   :  { %6379 = vmatpush1.bf16.msra.mxu0 %v9483_v44  ;;  %v9549_v11 = vld [vmem:[%s14412_s6 + $0x548] ss:$16 sps:$4 sm:$0xff]   ;;  %v9557_v27 = vld [vmem:[%s14412_s6 + $0x52c] ss:$16 sps:$4 sm:$0xff]  }
 0x638   :  { %6380 = vmatprep.subr.bf16.mxu0 %v9491_v39  ;;  %v9552_v44 = vld [vmem:[%s14412_s6 + $0x748] ss:$16 sps:$4 sm:$0xff]   ;;  %v9560_v63 = vld [vmem:[%s14412_s6 + $0x72c] ss:$16 sps:$4 sm:$0xff]  }
 0x639   :  { %6420 = vmatpush1.bf16.msra.mxu1 %v9486_v21  ;;  %v9555_v26 = vld [vmem:[%s14412_s6 + $0x528] ss:$16 sps:$4 sm:$0xff]   ;;  %v9563_v39 = vld [vmem:[%s14412_s6 + $0x50c] ss:$16 sps:$4 sm:$0xff]  }
 0x63a   :  { %6421 = vmatprep.subr.bf16.mxu1 %v9494_v62  ;;  %v9558_v21 = vld [vmem:[%s14412_s6 + $0x728] ss:$16 sps:$4 sm:$0xff]   ;;  %v9566_v20 = vld [vmem:[%s14412_s6 + $0x70c] ss:$16 sps:$4 sm:$0xff]  }
 0x63b   :  { %6381 = vmatpush1.bf16.msra.mxu0 %v9489_v34  ;;  %v9561_v62 = vld [vmem:[%s14412_s6 + $0x508] ss:$16 sps:$4 sm:$0xff]   ;;  %v9569_v34 = vld [vmem:[%s14412_s6 + $0x8ec] ss:$16 sps:$4 sm:$0xff]  }
 0x63c   :  { %6382 = vmatprep.subr.bf16.mxu0 %v9497_v41  ;;  %v9564_v41 = vld [vmem:[%s14412_s6 + $0x708] ss:$16 sps:$4 sm:$0xff]  }
 0x63d   :  { %6422 = vmatpush1.bf16.msra.mxu1 %v9492_v57  ;;  %v9572_v57 = vld [vmem:[%s14412_s6 + $0xaec] ss:$16 sps:$4 sm:$0xff]  }
 0x63e   :  { %6423 = vmatprep.subr.bf16.mxu1 %v9500_v18  ;;  %v9567_v18 = vld [vmem:[%s14412_s6 + $0x8e8] ss:$16 sps:$4 sm:$0xff]  }
 0x63f   :  { %6383 = vmatpush1.bf16.msra.mxu0 %v9495_v51  ;;  %v9575_v51 = vld [vmem:[%s14412_s6 + $0x8cc] ss:$16 sps:$4 sm:$0xff]  }
 0x640   :  { %6384 = vmatprep.subr.bf16.mxu0 %v9503_v6  ;;  %v9570_v6 = vld [vmem:[%s14412_s6 + $0xae8] ss:$16 sps:$4 sm:$0xff]  }
 0x641   :  { %6424 = vmatpush1.bf16.msra.mxu1 %v9498_v10 }
 0x642   :  { %6425 = vmatprep.subr.bf16.mxu1 %v9506_v42  ;;  %v9578_v42 = vld [vmem:[%s14412_s6 + $0xacc] ss:$16 sps:$4 sm:$0xff]  }
 0x643   :  { %6385 = vmatpush1.bf16.msra.mxu0 %v9501_v2 }
 0x644   :  { %6386 = vmatprep.subr.bf16.mxu0 %v9509_v22  ;;  %v9573_v22 = vld [vmem:[%s14412_s6 + $0x8c8] ss:$16 sps:$4 sm:$0xff]  }
 0x645   :  { %6426 = vmatpush1.bf16.msra.mxu1 %v9504_v15 }
 0x646   :  { %6427 = vmatprep.subr.bf16.mxu1 %v9512_v30 }
 0x647   :  { %6387 = vmatpush1.bf16.msra.mxu0 %v9507_v46 }
 0x648   :  { %6388 = vmatprep.subr.bf16.mxu0 %v9515_v29 }
 0x649   :  { %6428 = vmatpush1.bf16.msra.mxu1 %v9510_v56 }
 0x64a   :  { %6429 = vmatprep.subr.bf16.mxu1 %v9518_v40 }
 0x64b   :  { %6389 = vmatpush1.bf16.msra.mxu0 %v9513_v1 }
 0x64c   :  { %6390 = vmatprep.subr.bf16.mxu0 %v9521_v19  ;;  %v9587_v19 = vld [vmem:[%s14412_s6 + $0x88c] ss:$16 sps:$4 sm:$0xff]  }
 0x64d   :  { %6430 = vmatpush1.bf16.msra.mxu1 %v9516_v24  ;;  %v9582_v24 = vld [vmem:[%s14412_s6 + $0xaa8] ss:$16 sps:$4 sm:$0xff]  }
 0x64e   :  { %6431 = vmatprep.subr.bf16.mxu1 %v9524_v54 }
 0x64f   :  { %6391 = vmatpush2.bf16.msra.mxu0 %v9519_v52  ;;  %v9590_v52 = vld [vmem:[%s14412_s6 + $0xa8c] ss:$16 sps:$4 sm:$0xff]  }
 0x650   :  { %6392 = vmatprep.subr.bf16.mxu0 %v9527_v38  ;;  %v9585_v38 = vld [vmem:[%s14412_s6 + $0x888] ss:$16 sps:$4 sm:$0xff]  }
 0x651   :  { %6432 = vmatpush2.bf16.msra.mxu1 %v9522_v47  ;;  %v9593_v47 = vld [vmem:[%s14412_s6 + $0x86c] ss:$16 sps:$4 sm:$0xff]  }
 0x652   :  { %6433 = vmatprep.subr.bf16.mxu1 %v9530_v9  ;;  %v9588_v9 = vld [vmem:[%s14412_s6 + $0xa88] ss:$16 sps:$4 sm:$0xff]  }
 0x653   :  { %6393 = vmatpush2.bf16.msra.mxu0 %v9525_v32  ;;  %v9596_v32 = vld [vmem:[%s14412_s6 + $0xa6c] ss:$16 sps:$4 sm:$0xff]  }
 0x654   :  { %6394 = vmatprep.subr.bf16.mxu0 %v9533_v60  ;;  %v9591_v60 = vld [vmem:[%s14412_s6 + $0x868] ss:$16 sps:$4 sm:$0xff]  }
 0x655   :  { %6434 = vmatpush2.bf16.msra.mxu1 %v9528_v31  ;;  %v9599_v31 = vld [vmem:[%s14412_s6 + $0x84c] ss:$16 sps:$4 sm:$0xff]  }
 0x656   :  { %6435 = vmatprep.subr.bf16.mxu1 %v9536_v49  ;;  %v9594_v49 = vld [vmem:[%s14412_s6 + $0xa68] ss:$16 sps:$4 sm:$0xff]  }
 0x657   :  { %6395 = vmatpush2.bf16.msra.mxu0 %v9531_v45  ;;  %v9602_v45 = vld [vmem:[%s14412_s6 + $0xa4c] ss:$16 sps:$4 sm:$0xff]  }
 0x658   :  { %6396 = vmatprep.subr.bf16.mxu0 %v9539_v17  ;;  %v9597_v17 = vld [vmem:[%s14412_s6 + $0x848] ss:$16 sps:$4 sm:$0xff]  }
 0x659   :  { %6436 = vmatpush2.bf16.msra.mxu1 %v9534_v23  ;;  %v9605_v23 = vld [vmem:[%s14412_s6 + $0x82c] ss:$16 sps:$4 sm:$0xff]  }
 0x65a   :  { %6437 = vmatprep.subr.bf16.mxu1 %v9542_v55  ;;  %v9600_v55 = vld [vmem:[%s14412_s6 + $0xa48] ss:$16 sps:$4 sm:$0xff]  }
 0x65b   :  { %6397 = vmatpush2.bf16.msra.mxu0 %v9537_v3  ;;  %v9608_v3 = vld [vmem:[%s14412_s6 + $0xa2c] ss:$16 sps:$4 sm:$0xff]  }
 0x65c   :  { %6398 = vmatprep.subr.bf16.mxu0 %v9545_v48  ;;  %v9603_v48 = vld [vmem:[%s14412_s6 + $0x828] ss:$16 sps:$4 sm:$0xff]  }
 0x65d   :  { %6438 = vmatpush2.bf16.msra.mxu1 %v9540_v28  ;;  %v9611_v28 = vld [vmem:[%s14412_s6 + $0x80c] ss:$16 sps:$4 sm:$0xff]  }
 0x65e   :  { %6439 = vmatprep.subr.bf16.mxu1 %v9548_v33  ;;  %v9606_v33 = vld [vmem:[%s14412_s6 + $0xa28] ss:$16 sps:$4 sm:$0xff]  }
 0x65f   :  { %6399 = vmatpush2.bf16.msra.mxu0 %v9543_v4  ;;  %v9614_v4 = vld [vmem:[%s14412_s6 + $0xa0c] ss:$16 sps:$4 sm:$0xff]  }
 0x660   :  { %6400 = vmatprep.subr.bf16.mxu0 %v9551_v7  ;;  %v9609_v7 = vld [vmem:[%s14412_s6 + $0x808] ss:$16 sps:$4 sm:$0xff]  }
 0x661   :  { %6440 = vmatpush2.bf16.msra.mxu1 %v9546_v16  ;;  %v9617_v16 = vld [vmem:[%s14412_s6 + $0x9ec] ss:$16 sps:$4 sm:$0xff]  }
 0x662   :  { %6441 = vmatprep.subr.bf16.mxu1 %v9554_v43  ;;  %v9612_v43 = vld [vmem:[%s14412_s6 + $0xa08] ss:$16 sps:$4 sm:$0xff]  }
 0x663   :  { %6401 = vmatpush2.bf16.msra.mxu0 %v9549_v11  ;;  %v9620_v11 = vld [vmem:[%s14412_s6 + $0xbec] ss:$16 sps:$4 sm:$0xff]  }
 0x664   :  { %6402 = vmatprep.subr.bf16.mxu0 %v9557_v27  ;;  %v9615_v27 = vld [vmem:[%s14412_s6 + $0x9e8] ss:$16 sps:$4 sm:$0xff]  }
 0x665   :  { %6442 = vmatpush2.bf16.msra.mxu1 %v9552_v44  ;;  %v9623_v44 = vld [vmem:[%s14412_s6 + $0x9cc] ss:$16 sps:$4 sm:$0xff]  }
 0x666   :  { %6443 = vmatprep.subr.bf16.mxu1 %v9560_v63  ;;  %v9618_v63 = vld [vmem:[%s14412_s6 + $0xbe8] ss:$16 sps:$4 sm:$0xff]  }
 0x667   :  { %6403 = vmatpush2.bf16.msra.mxu0 %v9555_v26  ;;  %v9626_v26 = vld [vmem:[%s14412_s6 + $0xbcc] ss:$16 sps:$4 sm:$0xff]  }
 0x668   :  { %6404 = vmatprep.subr.bf16.mxu0 %v9563_v39  ;;  %v9621_v39 = vld [vmem:[%s14412_s6 + $0x9c8] ss:$16 sps:$4 sm:$0xff]  }
 0x669   :  { %6444 = vmatpush2.bf16.msra.mxu1 %v9558_v21  ;;  %v9629_v21 = vld [vmem:[%s14412_s6 + $0x9ac] ss:$16 sps:$4 sm:$0xff]  }
 0x66a   :  { %6445 = vmatprep.subr.bf16.mxu1 %v9566_v20  ;;  %v9624_v20 = vld [vmem:[%s14412_s6 + $0xbc8] ss:$16 sps:$4 sm:$0xff]  }
 0x66b   :  { %6405 = vmatpush2.bf16.msra.mxu0 %v9561_v62  ;;  %v9632_v62 = vld [vmem:[%s14412_s6 + $0xbac] ss:$16 sps:$4 sm:$0xff]  }
 0x66c   :  { %6456 = vmatprep.subr.bf16.mxu0 %v9569_v34  ;;  %v9627_v34 = vld [vmem:[%s14412_s6 + $0x9a8] ss:$16 sps:$4 sm:$0xff]  }
 0x66d   :  { %6446 = vmatpush2.bf16.msra.mxu1 %v9564_v41  ;;  %v9635_v41 = vld [vmem:[%s14412_s6 + $0x98c] ss:$16 sps:$4 sm:$0xff]  }
 0x66e   :  { %v6162_v10 = vpop.f32.mrf.mxu0  ;;  %6407 = vmatmul.mubr.bf16.vlgmr.msra.gmra.mxu0 %v12631_v58  ;;  %6497 = vmatprep.subr.bf16.mxu1 %v9572_v57  ;;  %v9581_v58 = vld [vmem:[%s14412_s6 + $0x8ac] ss:$16 sps:$4 sm:$0xff]   ;;  %v9630_v57 = vld [vmem:[%s14412_s6 + $0xba8] ss:$16 sps:$4 sm:$0xff]  }
 0x66f   :  { %v6163_v2 = vadd.f32 %v6162_v10, %v13292_v59  ;;  %6457 = vmatpush1.bf16.msra.mxu0 %v9567_v18  ;;  %6488 = vmatprep.mubr.bf16.mxu0 %v12636_v36  ;;  %v9576_v36 = vld [vmem:[%s14412_s6 + $0xac8] ss:$16 sps:$4 sm:$0xff]   ;;  %v9638_v18 = vld [vmem:[%s14412_s6 + $0xb8c] ss:$16 sps:$4 sm:$0xff]  }
 0x670   :  { %v6164_v15 = vpop.f32.mrf.mxu0  ;;  %v6203_v30 = vpop.f32.mrf.mxu1  ;;  %6448 = vmatmul.mubr.bf16.vlgmr.msra.gmra.mxu1 %v12644_v61  ;;  %6458 = vmatprep.subr.bf16.mxu0 %v9575_v51  ;;  %v9584_v61 = vld [vmem:[%s14412_s6 + $0xaac] ss:$16 sps:$4 sm:$0xff]   ;;  %v9633_v51 = vld [vmem:[%s14412_s6 + $0x988] ss:$16 sps:$4 sm:$0xff]  }
 0x671   :  { %v6165_v46 = vadd.f32 %v6164_v15, %v13301_v35  ;;  %v13494_v29 = vadd.f32 %v6203_v30, %v6163_v2  ;;  %6498 = vmatpush1.bf16.msra.mxu1 %v9570_v6  ;;  %6529 = vmatprep.mubr.bf16.mxu1 %v12650_v0  ;;  %v9579_v35 = vld [vmem:[%s14412_s6 + $0x8a8] ss:$16 sps:$4 sm:$0xff]   ;;  %v9641_v6 = vld [vmem:[%s14412_s6 + $0x96c] ss:$16 sps:$4 sm:$0xff]  }
 0x672   :  { %v6166_v59 = vpop.f32.mrf.mxu0  ;;  %v6205_v56 = vpop.f32.mrf.mxu1  ;;  %6499 = vmatprep.subr.bf16.mxu1 %v9578_v42  ;;  %v9636_v10 = vld [vmem:[%s14412_s6 + $0xb88] ss:$16 sps:$4 sm:$0xff]   ;;  %v9644_v42 = vld [vmem:[%s14412_s6 + $0xb6c] ss:$16 sps:$4 sm:$0xff]  }
 0x673   :  { %v13503_v40 = vadd.f32 %v6205_v56, %v6165_v46  ;;  %6459 = vmatpush1.bf16.msra.mxu0 %v9573_v22  ;;  %v9639_v2 = vld [vmem:[%s14412_s6 + $0x968] ss:$16 sps:$4 sm:$0xff]   ;;  %v9647_v22 = vld [vmem:[%s14412_s6 + $0x94c] ss:$16 sps:$4 sm:$0xff]  }
 0x674   :  { %v6167_v1 = vpop.f32.mrf.mxu0  ;;  %v6207_v0 = vpop.f32.mrf.mxu1  ;;  %6460 = vmatprep.subr.bf16.mxu0 %v9581_v58  ;;  %v9642_v15 = vld [vmem:[%s14412_s6 + $0xb68] ss:$16 sps:$4 sm:$0xff]   ;;  %v9650_v30 = vld [vmem:[%s14412_s6 + $0xb4c] ss:$16 sps:$4 sm:$0xff]  }
 0x675   :  { %6500 = vmatpush1.bf16.msra.mxu1 %v9576_v36  ;;  %v9645_v58 = vld [vmem:[%s14412_s6 + $0x948] ss:$16 sps:$4 sm:$0xff]   ;;  %v9653_v46 = vld [vmem:[%s14412_s6 + $0x92c] ss:$16 sps:$4 sm:$0xff]  }
 0x676   :  { %v6208_v54 = vpop.f32.mrf.mxu1  ;;  %6501 = vmatprep.subr.bf16.mxu1 %v9584_v61  ;;  %v9648_v36 = vld [vmem:[%s14412_s6 + $0xb48] ss:$16 sps:$4 sm:$0xff]   ;;  %v9656_v59 = vld [vmem:[%s14412_s6 + $0xb2c] ss:$16 sps:$4 sm:$0xff]  }
 0x677   :  { %6461 = vmatpush1.bf16.msra.mxu0 %v9579_v35  ;;  %v9651_v56 = vld [vmem:[%s14412_s6 + $0x928] ss:$16 sps:$4 sm:$0xff]   ;;  %v9659_v61 = vld [vmem:[%s14412_s6 + $0x90c] ss:$16 sps:$4 sm:$0xff]  }
 0x678   :  { %6462 = vmatprep.subr.bf16.mxu0 %v9587_v19  ;;  %v9654_v35 = vld [vmem:[%s14412_s6 + $0xb28] ss:$16 sps:$4 sm:$0xff]   ;;  %v9662_v1 = vld [vmem:[%s14412_s6 + $0xb0c] ss:$16 sps:$4 sm:$0xff]  }
 0x679   :  { %6502 = vmatpush1.bf16.msra.mxu1 %v9582_v24  ;;  %v9657_v0 = vld [vmem:[%s14412_s6 + $0x908] ss:$16 sps:$4 sm:$0xff]   ;;  %v9665_v19 = vld [vmem:[%s14412_s6 + $0xcec] ss:$16 sps:$4 sm:$0xff]  }
 0x67a   :  { %6503 = vmatprep.subr.bf16.mxu1 %v9590_v52  ;;  %v9660_v24 = vld [vmem:[%s14412_s6 + $0xb08] ss:$16 sps:$4 sm:$0xff]   ;;  %v9668_v54 = vld [vmem:[%s14412_s6 + $0xeec] ss:$16 sps:$4 sm:$0xff]  }
 0x67b   :  { %6463 = vmatpush1.bf16.msra.mxu0 %v9585_v38  ;;  %v9663_v52 = vld [vmem:[%s14412_s6 + $0xce8] ss:$16 sps:$4 sm:$0xff]   ;;  %v9671_v38 = vld [vmem:[%s14412_s6 + $0xccc] ss:$16 sps:$4 sm:$0xff]  }
 0x67c   :  { %6464 = vmatprep.subr.bf16.mxu0 %v9593_v47  ;;  %v9666_v47 = vld [vmem:[%s14412_s6 + $0xee8] ss:$16 sps:$4 sm:$0xff]  }
 0x67d   :  { %6504 = vmatpush1.bf16.msra.mxu1 %v9588_v9 }
 0x67e   :  { %6505 = vmatprep.subr.bf16.mxu1 %v9596_v32  ;;  %v9674_v32 = vld [vmem:[%s14412_s6 + $0xecc] ss:$16 sps:$4 sm:$0xff]  }
 0x67f   :  { %6465 = vmatpush1.bf16.msra.mxu0 %v9591_v60 }
 0x680   :  { %6466 = vmatprep.subr.bf16.mxu0 %v9599_v31  ;;  %v9669_v31 = vld [vmem:[%s14412_s6 + $0xcc8] ss:$16 sps:$4 sm:$0xff]  }
 0x681   :  { %6506 = vmatpush1.bf16.msra.mxu1 %v9594_v49 }
 0x682   :  { %6507 = vmatprep.subr.bf16.mxu1 %v9602_v45 }
 0x683   :  { %6467 = vmatpush1.bf16.msra.mxu0 %v9597_v17 }
 0x684   :  { %6468 = vmatprep.subr.bf16.mxu0 %v9605_v23 }
 0x685   :  { %6508 = vmatpush1.bf16.msra.mxu1 %v9600_v55  ;;  %v9675_v55 = vld [vmem:[%s14412_s6 + $0xca8] ss:$16 sps:$4 sm:$0xff]  }
 0x686   :  { %6509 = vmatprep.subr.bf16.mxu1 %v9608_v3 }
 0x687   :  { %6469 = vmatpush1.bf16.msra.mxu0 %v9603_v48 }
 0x688   :  { %6470 = vmatprep.subr.bf16.mxu0 %v9611_v28  ;;  %v9678_v28 = vld [vmem:[%s14412_s6 + $0xea8] ss:$16 sps:$4 sm:$0xff]  }
 0x689   :  { %6510 = vmatpush1.bf16.msra.mxu1 %v9606_v33 }
 0x68a   :  { %6511 = vmatprep.subr.bf16.mxu1 %v9614_v4  ;;  %v9686_v4 = vld [vmem:[%s14412_s6 + $0xe8c] ss:$16 sps:$4 sm:$0xff]  }
 0x68b   :  { %6471 = vmatpush1.bf16.msra.mxu0 %v9609_v7  ;;  %v9681_v7 = vld [vmem:[%s14412_s6 + $0xc88] ss:$16 sps:$4 sm:$0xff]  }
 0x68c   :  { %6472 = vmatprep.subr.bf16.mxu0 %v9617_v16  ;;  %v9689_v16 = vld [vmem:[%s14412_s6 + $0xc6c] ss:$16 sps:$4 sm:$0xff]  }
 0x68d   :  { %6512 = vmatpush1.bf16.msra.mxu1 %v9612_v43  ;;  %v9684_v43 = vld [vmem:[%s14412_s6 + $0xe88] ss:$16 sps:$4 sm:$0xff]  }
 0x68e   :  { %6513 = vmatprep.subr.bf16.mxu1 %v9620_v11  ;;  %v9692_v11 = vld [vmem:[%s14412_s6 + $0xe6c] ss:$16 sps:$4 sm:$0xff]  }
 0x68f   :  { %6473 = vmatpush2.bf16.msra.mxu0 %v9615_v27  ;;  %v9687_v27 = vld [vmem:[%s14412_s6 + $0xc68] ss:$16 sps:$4 sm:$0xff]  }
 0x690   :  { %6474 = vmatprep.subr.bf16.mxu0 %v9623_v44  ;;  %v9695_v44 = vld [vmem:[%s14412_s6 + $0xc4c] ss:$16 sps:$4 sm:$0xff]  }
 0x691   :  { %6514 = vmatpush2.bf16.msra.mxu1 %v9618_v63  ;;  %v9690_v63 = vld [vmem:[%s14412_s6 + $0xe68] ss:$16 sps:$4 sm:$0xff]  }
 0x692   :  { %6515 = vmatprep.subr.bf16.mxu1 %v9626_v26  ;;  %v9698_v26 = vld [vmem:[%s14412_s6 + $0xe4c] ss:$16 sps:$4 sm:$0xff]  }
 0x693   :  { %6475 = vmatpush2.bf16.msra.mxu0 %v9621_v39  ;;  %v9693_v39 = vld [vmem:[%s14412_s6 + $0xc48] ss:$16 sps:$4 sm:$0xff]  }
 0x694   :  { %6476 = vmatprep.subr.bf16.mxu0 %v9629_v21  ;;  %v9701_v21 = vld [vmem:[%s14412_s6 + $0xc2c] ss:$16 sps:$4 sm:$0xff]  }
 0x695   :  { %6516 = vmatpush2.bf16.msra.mxu1 %v9624_v20  ;;  %v9696_v20 = vld [vmem:[%s14412_s6 + $0xe48] ss:$16 sps:$4 sm:$0xff]  }
 0x696   :  { %6517 = vmatprep.subr.bf16.mxu1 %v9632_v62  ;;  %v9704_v62 = vld [vmem:[%s14412_s6 + $0xe2c] ss:$16 sps:$4 sm:$0xff]  }
 0x697   :  { %6477 = vmatpush2.bf16.msra.mxu0 %v9627_v34  ;;  %v9699_v34 = vld [vmem:[%s14412_s6 + $0xc28] ss:$16 sps:$4 sm:$0xff]  }
 0x698   :  { %6478 = vmatprep.subr.bf16.mxu0 %v9635_v41  ;;  %v9707_v41 = vld [vmem:[%s14412_s6 + $0xc0c] ss:$16 sps:$4 sm:$0xff]  }
 0x699   :  { %6518 = vmatpush2.bf16.msra.mxu1 %v9630_v57  ;;  %v9702_v57 = vld [vmem:[%s14412_s6 + $0xe28] ss:$16 sps:$4 sm:$0xff]  }
 0x69a   :  { %6519 = vmatprep.subr.bf16.mxu1 %v9638_v18  ;;  %v9710_v18 = vld [vmem:[%s14412_s6 + $0xe0c] ss:$16 sps:$4 sm:$0xff]  }
 0x69b   :  { %6479 = vmatpush2.bf16.msra.mxu0 %v9633_v51  ;;  %v9705_v51 = vld [vmem:[%s14412_s6 + $0xc08] ss:$16 sps:$4 sm:$0xff]  }
 0x69c   :  { %6480 = vmatprep.subr.bf16.mxu0 %v9641_v6  ;;  %v9713_v6 = vld [vmem:[%s14412_s6 + $0xdec] ss:$16 sps:$4 sm:$0xff]  }
 0x69d   :  { %6520 = vmatpush2.bf16.msra.mxu1 %v9636_v10  ;;  %v9708_v10 = vld [vmem:[%s14412_s6 + $0xe08] ss:$16 sps:$4 sm:$0xff]  }
 0x69e   :  { %6521 = vmatprep.subr.bf16.mxu1 %v9644_v42  ;;  %v9716_v42 = vld [vmem:[%s14412_s6 + $0xfec] ss:$16 sps:$4 sm:$0xff]  }
 0x69f   :  { %6481 = vmatpush2.bf16.msra.mxu0 %v9639_v2  ;;  %v9711_v2 = vld [vmem:[%s14412_s6 + $0xde8] ss:$16 sps:$4 sm:$0xff]  }
 0x6a0   :  { %6482 = vmatprep.subr.bf16.mxu0 %v9647_v22  ;;  %v9719_v22 = vld [vmem:[%s14412_s6 + $0xdcc] ss:$16 sps:$4 sm:$0xff]  }
 0x6a1   :  { %6522 = vmatpush2.bf16.msra.mxu1 %v9642_v15  ;;  %v9714_v15 = vld [vmem:[%s14412_s6 + $0xfe8] ss:$16 sps:$4 sm:$0xff]  }
 0x6a2   :  { %6523 = vmatprep.subr.bf16.mxu1 %v9650_v30  ;;  %v9722_v30 = vld [vmem:[%s14412_s6 + $0xfcc] ss:$16 sps:$4 sm:$0xff]  }
 0x6a3   :  { %6483 = vmatpush2.bf16.msra.mxu0 %v9645_v58  ;;  %v9717_v58 = vld [vmem:[%s14412_s6 + $0xdc8] ss:$16 sps:$4 sm:$0xff]  }
 0x6a4   :  { %6484 = vmatprep.subr.bf16.mxu0 %v9653_v46  ;;  %v9725_v46 = vld [vmem:[%s14412_s6 + $0xdac] ss:$16 sps:$4 sm:$0xff]  }
 0x6a5   :  { %6524 = vmatpush2.bf16.msra.mxu1 %v9648_v36  ;;  %v9720_v36 = vld [vmem:[%s14412_s6 + $0xfc8] ss:$16 sps:$4 sm:$0xff]  }
 0x6a6   :  { %6525 = vmatprep.subr.bf16.mxu1 %v9656_v59  ;;  %v9728_v59 = vld [vmem:[%s14412_s6 + $0xfac] ss:$16 sps:$4 sm:$0xff]  }
 0x6a7   :  { %6485 = vmatpush2.bf16.msra.mxu0 %v9651_v56  ;;  %v9723_v56 = vld [vmem:[%s14412_s6 + $0xda8] ss:$16 sps:$4 sm:$0xff]  }
 0x6a8   :  { %6486 = vmatprep.subr.bf16.mxu0 %v9659_v61  ;;  %v9731_v61 = vld [vmem:[%s14412_s6 + $0xd8c] ss:$16 sps:$4 sm:$0xff]  }
 0x6a9   :  { %6526 = vmatpush2.bf16.msra.mxu1 %v9654_v35  ;;  %v9726_v35 = vld [vmem:[%s14412_s6 + $0xfa8] ss:$16 sps:$4 sm:$0xff]  }
 0x6aa   :  { %6527 = vmatprep.subr.bf16.mxu1 %v9662_v1  ;;  %v9734_v1 = vld [vmem:[%s14412_s6 + $0xf8c] ss:$16 sps:$4 sm:$0xff]  }
 0x6ab   :  { %6487 = vmatpush2.bf16.msra.mxu0 %v9657_v0  ;;  %v9729_v0 = vld [vmem:[%s14412_s6 + $0xd88] ss:$16 sps:$4 sm:$0xff]  }
 0x6ac   :  { %6538 = vmatprep.subr.bf16.mxu0 %v9665_v19  ;;  %v9737_v19 = vld [vmem:[%s14412_s6 + $0xd6c] ss:$16 sps:$4 sm:$0xff]  }
 0x6ad   :  { %6528 = vmatpush2.bf16.msra.mxu1 %v9660_v24  ;;  %v9732_v24 = vld [vmem:[%s14412_s6 + $0xf88] ss:$16 sps:$4 sm:$0xff]  }
 0x6ae   :  { %v6244_v9 = vpop.f32.mrf.mxu0  ;;  %6489 = vmatmul.mubr.bf16.vlgmr.msra.gmra.mxu0 %v12849_v8  ;;  %6579 = vmatprep.subr.bf16.mxu1 %v9668_v54  ;;  %v9677_v8 = vld [vmem:[%s14412_s6 + $0xcac] ss:$16 sps:$4 sm:$0xff]  }
 0x6af   :  { %v6245_v60 = vadd.f32 %v6244_v9, %v13494_v29  ;;  %6539 = vmatpush1.bf16.msra.mxu0 %v9663_v52  ;;  %6570 = vmatprep.mubr.bf16.mxu0 %v12854_v50  ;;  %v9672_v50 = vld [vmem:[%s14412_s6 + $0xec8] ss:$16 sps:$4 sm:$0xff]   ;;  %v9740_v54 = vld [vmem:[%s14412_s6 + $0xf6c] ss:$16 sps:$4 sm:$0xff]  }
 0x6b0   :  { %v13691_v49 = vpop.f32.mrf.mxu0  ;;  %v6285_v45 = vpop.f32.mrf.mxu1  ;;  %6530 = vmatmul.mubr.bf16.vlgmr.msra.gmra.mxu1 %v12862_v13  ;;  %6540 = vmatprep.subr.bf16.mxu0 %v9671_v38  ;;  %v9680_v13 = vld [vmem:[%s14412_s6 + $0xeac] ss:$16 sps:$4 sm:$0xff]   ;;  %v9735_v52 = vld [vmem:[%s14412_s6 + $0xd68] ss:$16 sps:$4 sm:$0xff]  }
 0x6b1   :  { %v13697_v17 = vadd.f32 %v6285_v45, %v6245_v60  ;;  %6580 = vmatpush1.bf16.msra.mxu1 %v9666_v47  ;;  %6611 = vmatprep.mubr.bf16.mxu1 %v12868_v37  ;;  %v9683_v37 = vld [vmem:[%s14412_s6 + $0xc8c] ss:$16 sps:$4 sm:$0xff]   ;;  %v9738_v47 = vld [vmem:[%s14412_s6 + $0xf68] ss:$16 sps:$4 sm:$0xff]  }
 0x6b2   :  { %v6248_v29 = vpop.f32.mrf.mxu0  ;;  %v13703_v23 = vpop.f32.mrf.mxu1  ;;  %6581 = vmatprep.subr.bf16.mxu1 %v9674_v32  ;;  %v9743_v38 = vld [vmem:[%s14412_s6 + $0xd4c] ss:$16 sps:$4 sm:$0xff]   ;;  %v9741_v32 = vld [vmem:[%s14412_s6 + $0xd48] ss:$16 sps:$4 sm:$0xff]  }
 0x6b3   :  { %6541 = vmatpush1.bf16.msra.mxu0 %v9669_v31  ;;  %v9746_v9 = vld [vmem:[%s14412_s6 + $0xf4c] ss:$16 sps:$4 sm:$0xff]   ;;  %v6247_v31 = vadd.f32 %v13691_v49, %v13503_v40  ;;  %v9744_v45 = vld [vmem:[%s14412_s6 + $0xf48] ss:$16 sps:$4 sm:$0xff]  }
 0x6b4   :  { %v6249_v3 = vpop.f32.mrf.mxu0  ;;  %v6289_v48 = vpop.f32.mrf.mxu1  ;;  %6542 = vmatprep.subr.bf16.mxu0 %v9677_v8  ;;  %v9749_v60 = vld [vmem:[%s14412_s6 + $0xd2c] ss:$16 sps:$4 sm:$0xff]   ;;  %v9750_v29 = vld [vmem:[%s14412_s6 + $0xf28] ss:$16 sps:$4 sm:$0xff]  }
 0x6b5   :  { %6582 = vmatpush1.bf16.msra.mxu1 %v9672_v50  ;;  %v9752_v8 = vld [vmem:[%s14412_s6 + $0xf2c] ss:$16 sps:$4 sm:$0xff]   ;;  %v9747_v50 = vld [vmem:[%s14412_s6 + $0xd28] ss:$16 sps:$4 sm:$0xff]   ;;  %v6288_v49 = vadd.f32 %v13703_v23, %v6247_v31  ;;  %v3394_v3 = vsub.s32 2, %v14480_v53 }
 0x6b6   :  { %v6290_v33 = vpop.f32.mrf.mxu1  ;;  %6583 = vmatprep.subr.bf16.mxu1 %v9680_v13  ;;  %v9755_v40 = vld [vmem:[%s14412_s6 + $0xd0c] ss:$16 sps:$4 sm:$0xff]   ;;  %v9761_v23 = vld [vmem:[%s14414_s8 + $0xe4] ss:$16 sps:$4 sm:$0xff]  }
 0x6b7   :  { %6543 = vmatpush1.bf16.msra.mxu0 %v9675_v55  ;;  %v9758_v13 = vld [vmem:[%s14412_s6 + $0xf0c] ss:$16 sps:$4 sm:$0xff]   ;;  %v9753_v55 = vld [vmem:[%s14412_s6 + $0xd08] ss:$16 sps:$4 sm:$0xff]   ;;  %v6621_v48 = vmax.f32 %v6288_v49, 0.0 }
 0x6b8   :  { %6544 = vmatprep.subr.bf16.mxu0 %v9683_v37  ;;  %v9756_v37 = vld [vmem:[%s14412_s6 + $0xf08] ss:$16 sps:$4 sm:$0xff]   ;;  %v9983_v33 = vld [vmem:[%s14413_s7] sm:$0xf]  ;;  %v9788_v31 = vld [vmem:[%s14414_s8 + $0x1c4] ss:$16 sps:$4 sm:$0xff]  }
 0x6b9   :  { %6584 = vmatpush1.bf16.msra.mxu1 %v9678_v28  ;;  %v3398_v28 = vsub.s32 3, %v14480_v53  ;;  %v9876_v49 = vld [vmem:[%s14414_s8 + $0x200] ss:$16 sps:$4 sm:$0xff]  }
 0x6ba   :  { %6585 = vmatprep.subr.bf16.mxu1 %v9686_v4  ;;  %v3395_v4 = vrot.slane %v9983_v33, %v3394_v3 }
 0x6bb   :  { %6545 = vmatpush1.bf16.msra.mxu0 %v9681_v7  ;;  %v9759_v7 = vld [vmem:[%s14414_s8 + $0xe0] ss:$16 sps:$4 sm:$0xff]  }
 0x6bc   :  { %6546 = vmatprep.subr.bf16.mxu0 %v9689_v16  ;;  %v9764_v16 = vld [vmem:[%s14414_s8 + $0xc4] ss:$16 sps:$4 sm:$0xff]  }
 0x6bd   :  { %6586 = vmatpush1.bf16.msra.mxu1 %v9684_v43  ;;  %v13889_v43 = vpack.c.bf16 %v6621_v48, %v6621_v48  ;;  %v9884_v48 = vld [vmem:[%s14414_s8 + $0x3c4] ss:$16 sps:$4 sm:$0xff]  }
 0x6be   :  { %6587 = vmatprep.subr.bf16.mxu1 %v9692_v11  ;;  %v3399_v11 = vrot.slane %v9983_v33, %v3398_v28  ;;  %v9797_v33 = vld [vmem:[%s14414_s8 + $0x164] ss:$16 sps:$4 sm:$0xff]  }
 0x6bf   :  { %6547 = vmatpush1.bf16.msra.mxu0 %v9687_v27 }
 0x6c0   :  { %6548 = vmatprep.subr.bf16.mxu0 %v9695_v44 }
 0x6c1   :  { %6588 = vmatpush1.bf16.msra.mxu1 %v9690_v63  ;;  %v9762_v63 = vld [vmem:[%s14414_s8 + $0xc0] ss:$16 sps:$4 sm:$0xff]  }
 0x6c2   :  { %6589 = vmatprep.subr.bf16.mxu1 %v9698_v26 }
 0x6c3   :  { %6549 = vmatpush1.bf16.msra.mxu0 %v9693_v39 }
 0x6c4   :  { %6550 = vmatprep.subr.bf16.mxu0 %v9701_v21  ;;  %v9767_v21 = vld [vmem:[%s14414_s8 + $0xa4] ss:$16 sps:$4 sm:$0xff]  }
 0x6c5   :  { %6590 = vmatpush1.bf16.msra.mxu1 %v9696_v20 }
 0x6c6   :  { %6591 = vmatprep.subr.bf16.mxu1 %v9704_v62 }
 0x6c7   :  { %6551 = vmatpush1.bf16.msra.mxu0 %v9699_v34 }
 0x6c8   :  { %6552 = vmatprep.subr.bf16.mxu0 %v9707_v41 }
 0x6c9   :  { %6592 = vmatpush1.bf16.msra.mxu1 %v9702_v57  ;;  %v9765_v57 = vld [vmem:[%s14414_s8 + $0xa0] ss:$16 sps:$4 sm:$0xff]  }
 0x6ca   :  { %6593 = vmatprep.subr.bf16.mxu1 %v9710_v18 }
 0x6cb   :  { %6553 = vmatpush1.bf16.msra.mxu0 %v9705_v51 }
 0x6cc   :  { %6554 = vmatprep.subr.bf16.mxu0 %v9713_v6 }
 0x6cd   :  { %6594 = vmatpush1.bf16.msra.mxu1 %v9708_v10  ;;  %v9855_v10 = vld [vmem:[%s14414_s8 + $0x2e0] ss:$16 sps:$4 sm:$0xff]  }
 0x6ce   :  { %6595 = vmatprep.subr.bf16.mxu1 %v9716_v42  ;;  %v9857_v42 = vld [vmem:[%s14414_s8 + $0x2e4] ss:$16 sps:$4 sm:$0xff]  }
 0x6cf   :  { %6555 = vmatpush2.bf16.msra.mxu0 %v9711_v2  ;;  %v9768_v2 = vld [vmem:[%s14414_s8 + $0x80] ss:$16 sps:$4 sm:$0xff]  }
 0x6d0   :  { %6556 = vmatprep.subr.bf16.mxu0 %v9719_v22  ;;  %v9860_v22 = vld [vmem:[%s14414_s8 + $0x2c4] ss:$16 sps:$4 sm:$0xff]  }
 0x6d1   :  { %6596 = vmatpush2.bf16.msra.mxu1 %v9714_v15  ;;  %v9773_v15 = vld [vmem:[%s14414_s8 + $0x64] ss:$16 sps:$4 sm:$0xff]  }
 0x6d2   :  { %6597 = vmatprep.subr.bf16.mxu1 %v9722_v30  ;;  %v9858_v30 = vld [vmem:[%s14414_s8 + $0x2c0] ss:$16 sps:$4 sm:$0xff]  }
 0x6d3   :  { %6557 = vmatpush2.bf16.msra.mxu0 %v9717_v58  ;;  %v9863_v58 = vld [vmem:[%s14414_s8 + $0x2a4] ss:$16 sps:$4 sm:$0xff]  }
 0x6d4   :  { %6558 = vmatprep.subr.bf16.mxu0 %v9725_v46  ;;  %v9771_v46 = vld [vmem:[%s14414_s8 + $0x60] ss:$16 sps:$4 sm:$0xff]  }
 0x6d5   :  { %6598 = vmatpush2.bf16.msra.mxu1 %v9720_v36  ;;  %v9776_v36 = vld [vmem:[%s14414_s8 + $0x44] ss:$16 sps:$4 sm:$0xff]  }
 0x6d6   :  { %6599 = vmatprep.subr.bf16.mxu1 %v9728_v59  ;;  %v9861_v59 = vld [vmem:[%s14414_s8 + $0x2a0] ss:$16 sps:$4 sm:$0xff]  }
 0x6d7   :  { %6559 = vmatpush2.bf16.msra.mxu0 %v9723_v56  ;;  %v9866_v56 = vld [vmem:[%s14414_s8 + $0x284] ss:$16 sps:$4 sm:$0xff]  }
 0x6d8   :  { %6560 = vmatprep.subr.bf16.mxu0 %v9731_v61  ;;  %v9774_v61 = vld [vmem:[%s14414_s8 + $0x40] ss:$16 sps:$4 sm:$0xff]  }
 0x6d9   :  { %6600 = vmatpush2.bf16.msra.mxu1 %v9726_v35  ;;  %v9779_v35 = vld [vmem:[%s14414_s8 + $0x24] ss:$16 sps:$4 sm:$0xff]  }
 0x6da   :  { %6601 = vmatprep.subr.bf16.mxu1 %v9734_v1  ;;  %v9864_v1 = vld [vmem:[%s14414_s8 + $0x280] ss:$16 sps:$4 sm:$0xff]  }
 0x6db   :  { %6561 = vmatpush2.bf16.msra.mxu0 %v9729_v0  ;;  %v9869_v0 = vld [vmem:[%s14414_s8 + $0x264] ss:$16 sps:$4 sm:$0xff]  }
 0x6dc   :  { %6562 = vmatprep.subr.bf16.mxu0 %v9737_v19  ;;  %v9777_v19 = vld [vmem:[%s14414_s8 + $0x20] ss:$16 sps:$4 sm:$0xff]  }
 0x6dd   :  { %6602 = vmatpush2.bf16.msra.mxu1 %v9732_v24  ;;  %v9782_v24 = vld [vmem:[%s14414_s8 + $0x4] ss:$16 sps:$4 sm:$0xff]  }
 0x6de   :  { %6603 = vmatprep.subr.bf16.mxu1 %v9740_v54  ;;  %v9867_v54 = vld [vmem:[%s14414_s8 + $0x260] ss:$16 sps:$4 sm:$0xff]  }
 0x6df   :  { %6563 = vmatpush2.bf16.msra.mxu0 %v9735_v52  ;;  %v9872_v52 = vld [vmem:[%s14414_s8 + $0x244] ss:$16 sps:$4 sm:$0xff]  }
 0x6e0   :  { %6564 = vmatprep.subr.bf16.mxu0 %v9743_v38  ;;  %v9780_v38 = vld [vmem:[%s14414_s8] ss:$16 sps:$4 sm:$0xff]  }
 0x6e1   :  { %6604 = vmatpush2.bf16.msra.mxu1 %v9738_v47  ;;  %v9785_v47 = vld [vmem:[%s14414_s8 + $0x1e4] ss:$16 sps:$4 sm:$0xff]  }
 0x6e2   :  { %6605 = vmatprep.subr.bf16.mxu1 %v9746_v9  ;;  %v9870_v9 = vld [vmem:[%s14414_s8 + $0x240] ss:$16 sps:$4 sm:$0xff]  }
 0x6e3   :  { %6565 = vmatpush2.bf16.msra.mxu0 %v9741_v32  ;;  %v9875_v32 = vld [vmem:[%s14414_s8 + $0x224] ss:$16 sps:$4 sm:$0xff]  }
 0x6e4   :  { %6566 = vmatprep.subr.bf16.mxu0 %v9749_v60  ;;  %v9783_v60 = vld [vmem:[%s14414_s8 + $0x1e0] ss:$16 sps:$4 sm:$0xff]  }
 0x6e5   :  { %6606 = vmatpush2.bf16.msra.mxu1 %v9744_v45  ;;  %v9873_v45 = vld [vmem:[%s14414_s8 + $0x220] ss:$16 sps:$4 sm:$0xff]  }
 0x6e6   :  { %6607 = vmatprep.subr.bf16.mxu1 %v9752_v8  ;;  %v9878_v8 = vld [vmem:[%s14414_s8 + $0x204] ss:$16 sps:$4 sm:$0xff]  }
 0x6e7   :  { %6567 = vmatpush2.bf16.msra.mxu0 %v9747_v50  ;;  %v9786_v50 = vld [vmem:[%s14414_s8 + $0x1c0] ss:$16 sps:$4 sm:$0xff]  }
 0x6e8   :  { %6568 = vmatprep.subr.bf16.mxu0 %v9755_v40  ;;  %v9791_v40 = vld [vmem:[%s14414_s8 + $0x1a4] ss:$16 sps:$4 sm:$0xff]  }
 0x6e9   :  { %6608 = vmatpush2.bf16.msra.mxu1 %v9750_v29  ;;  %v9881_v29 = vld [vmem:[%s14414_s8 + $0x3e4] ss:$16 sps:$4 sm:$0xff]  }
 0x6ea   :  { %6609 = vmatprep.subr.bf16.mxu1 %v9758_v13  ;;  %v9789_v13 = vld [vmem:[%s14414_s8 + $0x1a0] ss:$16 sps:$4 sm:$0xff]  }
 0x6eb   :  { %6569 = vmatpush2.bf16.msra.mxu0 %v9753_v55  ;;  %v9794_v55 = vld [vmem:[%s14414_s8 + $0x184] ss:$16 sps:$4 sm:$0xff]  }
 0x6ec   :  { %7418 = vmatprep.subr.bf16.mxu0 %v9761_v23  ;;  %v9879_v23 = vld [vmem:[%s14414_s8 + $0x3e0] ss:$16 sps:$4 sm:$0xff]  }
 0x6ed   :  { %6610 = vmatpush2.bf16.msra.mxu1 %v9756_v37  ;;  %v9792_v37 = vld [vmem:[%s14414_s8 + $0x180] ss:$16 sps:$4 sm:$0xff]  }
 0x6ee   :  { %v6326_v27 = vpop.f32.mrf.mxu0  ;;  %6571 = vmatmul.mubr.bf16.vlgmr.msra.gmra.mxu0 %v13064_v12  ;;  %7459 = vmatprep.subr.bf16.mxu1 %v9857_v42 }
 0x6ef   :  { %v6327_v44 = vadd.f32 %v6326_v27, %v3395_v4  ;;  %7419 = vmatpush1.bf16.msra.mxu0 %v9759_v7  ;;  %7450 = vmatprep.mubr.bf16.mxu0 %v13889_v43  ;;  %v9882_v4 = vld [vmem:[%s14414_s8 + $0x3c0] ss:$16 sps:$4 sm:$0xff]   ;;  %v9887_v7 = vld [vmem:[%s14414_s8 + $0x3a4] ss:$16 sps:$4 sm:$0xff]  }
 0x6f0   :  { %v6328_v26 = vpop.f32.mrf.mxu0  ;;  %v6367_v39 = vpop.f32.mrf.mxu1  ;;  %6612 = vmatmul.mubr.bf16.vlgmr.msra.gmra.mxu1 %v13077_v25  ;;  %7420 = vmatprep.subr.bf16.mxu0 %v9764_v16  ;;  %v9770_v25 = vld [vmem:[%s14414_s8 + $0x84] ss:$16 sps:$4 sm:$0xff]   ;;  %v9795_v16 = vld [vmem:[%s14414_s8 + $0x160] ss:$16 sps:$4 sm:$0xff]  }
 0x6f1   :  { %v6329_v20 = vadd.f32 %v6328_v26, %v3399_v11  ;;  %v13902_v62 = vadd.f32 %v6367_v39, %v6327_v44  ;;  %7460 = vmatpush1.bf16.msra.mxu1 %v9855_v10  ;;  %v9800_v11 = vld [vmem:[%s14414_s8 + $0x144] ss:$16 sps:$4 sm:$0xff]   ;;  %v9885_v27 = vld [vmem:[%s14414_s8 + $0x3a0] ss:$16 sps:$4 sm:$0xff]   ;;  %v9807_v10 = vld [vmem:[%s14414_s8 + $0xe8] ss:$16 sps:$4 sm:$0xff]  }
 0x6f2   :  { %v6330_v12 = vpop.f32.mrf.mxu0  ;;  %v6369_v34 = vpop.f32.mrf.mxu1  ;;  %7461 = vmatprep.subr.bf16.mxu1 %v9860_v22  ;;  %v9890_v44 = vld [vmem:[%s14414_s8 + $0x384] ss:$16 sps:$4 sm:$0xff]   ;;  %v9888_v39 = vld [vmem:[%s14414_s8 + $0x380] ss:$16 sps:$4 sm:$0xff]  }
 0x6f3   :  { %v13904_v41 = vadd.f32 %v6369_v34, %v6329_v20  ;;  %7421 = vmatpush1.bf16.msra.mxu0 %v9762_v63  ;;  %v9798_v63 = vld [vmem:[%s14414_s8 + $0x140] ss:$16 sps:$4 sm:$0xff]   ;;  %v9803_v26 = vld [vmem:[%s14414_s8 + $0x124] ss:$16 sps:$4 sm:$0xff]  }
 0x6f4   :  { %v6331_v18 = vpop.f32.mrf.mxu0  ;;  %v6371_v51 = vpop.f32.mrf.mxu1  ;;  %7422 = vmatprep.subr.bf16.mxu0 %v9767_v21  ;;  %v9893_v21 = vld [vmem:[%s14414_s8 + $0x364] ss:$16 sps:$4 sm:$0xff]   ;;  %v9801_v20 = vld [vmem:[%s14414_s8 + $0x120] ss:$16 sps:$4 sm:$0xff]  }
 0x6f5   :  { %7462 = vmatpush1.bf16.msra.mxu1 %v9858_v30  ;;  %v9806_v12 = vld [vmem:[%s14414_s8 + $0x104] ss:$16 sps:$4 sm:$0xff]   ;;  %v9891_v34 = vld [vmem:[%s14414_s8 + $0x360] ss:$16 sps:$4 sm:$0xff]   ;;  %v6620_v51 = vmax.f32 %v13697_v17, 0.0 }
 0x6f6   :  { %v6372_v6 = vpop.f32.mrf.mxu1  ;;  %7463 = vmatprep.subr.bf16.mxu1 %v9863_v58  ;;  %v9804_v18 = vld [vmem:[%s14414_s8 + $0x100] ss:$16 sps:$4 sm:$0xff]   ;;  %v9812_v17 = vld [vmem:[%s14414_s8 + $0xcc] ss:$16 sps:$4 sm:$0xff]   ;;  %v9899_v30 = vld [vmem:[%s14414_s8 + $0x324] ss:$16 sps:$4 sm:$0xff]  }
 0x6f7   :  { %7423 = vmatpush1.bf16.msra.mxu0 %v9765_v57  ;;  %v9896_v57 = vld [vmem:[%s14414_s8 + $0x344] ss:$16 sps:$4 sm:$0xff]   ;;  %v9894_v6 = vld [vmem:[%s14414_s8 + $0x340] ss:$16 sps:$4 sm:$0xff]   ;;  %v14078_v42 = vpack.c.bf16 %v6620_v51, %v6620_v51 }
 0x6f8   :  { %7424 = vmatprep.subr.bf16.mxu0 %v9770_v25  ;;  %v9809_v25 = vld [vmem:[%s14414_s8 + $0xec] ss:$16 sps:$4 sm:$0xff]  }
 0x6f9   :  { %7464 = vmatpush1.bf16.msra.mxu1 %v9861_v59 }
 0x6fa   :  { %7465 = vmatprep.subr.bf16.mxu1 %v9866_v56 }
 0x6fb   :  { %7425 = vmatpush1.bf16.msra.mxu0 %v9768_v2 }
 0x6fc   :  { %7426 = vmatprep.subr.bf16.mxu0 %v9773_v15  ;;  %v9810_v15 = vld [vmem:[%s14414_s8 + $0xc8] ss:$16 sps:$4 sm:$0xff]  }
 0x6fd   :  { %7466 = vmatpush1.bf16.msra.mxu1 %v9864_v1  ;;  %v9813_v1 = vld [vmem:[%s14414_s8 + $0xa8] ss:$16 sps:$4 sm:$0xff]  }
 0x6fe   :  { %7467 = vmatprep.subr.bf16.mxu1 %v9869_v0  ;;  %v9902_v0 = vld [vmem:[%s14414_s8 + $0x304] ss:$16 sps:$4 sm:$0xff]  }
 0x6ff   :  { %7427 = vmatpush1.bf16.msra.mxu0 %v9771_v46 }
 0x700   :  { %7428 = vmatprep.subr.bf16.mxu0 %v9776_v36  ;;  %v9815_v36 = vld [vmem:[%s14414_s8 + $0xac] ss:$16 sps:$4 sm:$0xff]  }
 0x701   :  { %7468 = vmatpush1.bf16.msra.mxu1 %v9867_v54  ;;  %v9900_v54 = vld [vmem:[%s14414_s8 + $0x300] ss:$16 sps:$4 sm:$0xff]  }
 0x702   :  { %7469 = vmatprep.subr.bf16.mxu1 %v9872_v52 }
 0x703   :  { %7429 = vmatpush1.bf16.msra.mxu0 %v9774_v61 }
 0x704   :  { %7430 = vmatprep.subr.bf16.mxu0 %v9779_v35 }
 0x705   :  { %7470 = vmatpush1.bf16.msra.mxu1 %v9870_v9  ;;  %v9821_v9 = vld [vmem:[%s14414_s8 + $0x6c] ss:$16 sps:$4 sm:$0xff]  }
 0x706   :  { %7471 = vmatprep.subr.bf16.mxu1 %v9875_v32  ;;  %v9819_v32 = vld [vmem:[%s14414_s8 + $0x68] ss:$16 sps:$4 sm:$0xff]  }
 0x707   :  { %7431 = vmatpush1.bf16.msra.mxu0 %v9777_v19 }
 0x708   :  { %7432 = vmatprep.subr.bf16.mxu0 %v9782_v24 }
 0x709   :  { %7472 = vmatpush1.bf16.msra.mxu1 %v9873_v45  ;;  %v9827_v45 = vld [vmem:[%s14414_s8 + $0x2c] ss:$16 sps:$4 sm:$0xff]  }
 0x70a   :  { %7473 = vmatprep.subr.bf16.mxu1 %v9878_v8  ;;  %v9825_v8 = vld [vmem:[%s14414_s8 + $0x28] ss:$16 sps:$4 sm:$0xff]  }
 0x70b   :  { %7433 = vmatpush1.bf16.msra.mxu0 %v9780_v38  ;;  %v9816_v38 = vld [vmem:[%s14414_s8 + $0x88] ss:$16 sps:$4 sm:$0xff]  }
 0x70c   :  { %7434 = vmatprep.subr.bf16.mxu0 %v9785_v47  ;;  %v9905_v47 = vld [vmem:[%s14414_s8 + $0x2ec] ss:$16 sps:$4 sm:$0xff]  }
 0x70d   :  { %7474 = vmatpush1.bf16.msra.mxu1 %v9876_v49  ;;  %v9833_v49 = vld [vmem:[%s14414_s8 + $0x1ec] ss:$16 sps:$4 sm:$0xff]  }
 0x70e   :  { %7475 = vmatprep.subr.bf16.mxu1 %v9881_v29  ;;  %v9831_v29 = vld [vmem:[%s14414_s8 + $0x1e8] ss:$16 sps:$4 sm:$0xff]  }
 0x70f   :  { %7435 = vmatpush2.bf16.msra.mxu0 %v9783_v60  ;;  %v9824_v60 = vld [vmem:[%s14414_s8 + $0x4c] ss:$16 sps:$4 sm:$0xff]  }
 0x710   :  { %7436 = vmatprep.subr.bf16.mxu0 %v9788_v31  ;;  %v9822_v31 = vld [vmem:[%s14414_s8 + $0x48] ss:$16 sps:$4 sm:$0xff]  }
 0x711   :  { %7476 = vmatpush2.bf16.msra.mxu1 %v9879_v23  ;;  %v9839_v23 = vld [vmem:[%s14414_s8 + $0x1ac] ss:$16 sps:$4 sm:$0xff]  }
 0x712   :  { %7477 = vmatprep.subr.bf16.mxu1 %v9884_v48  ;;  %v9837_v48 = vld [vmem:[%s14414_s8 + $0x1a8] ss:$16 sps:$4 sm:$0xff]  }
 0x713   :  { %7437 = vmatpush2.bf16.msra.mxu0 %v9786_v50  ;;  %v9830_v50 = vld [vmem:[%s14414_s8 + $0xc] ss:$16 sps:$4 sm:$0xff]  }
 0x714   :  { %7438 = vmatprep.subr.bf16.mxu0 %v9791_v40  ;;  %v9828_v40 = vld [vmem:[%s14414_s8 + $0x8] ss:$16 sps:$4 sm:$0xff]  }
 0x715   :  { %7478 = vmatpush2.bf16.msra.mxu1 %v9882_v4  ;;  %v9845_v4 = vld [vmem:[%s14414_s8 + $0x16c] ss:$16 sps:$4 sm:$0xff]  }
 0x716   :  { %7479 = vmatprep.subr.bf16.mxu1 %v9887_v7  ;;  %v9843_v7 = vld [vmem:[%s14414_s8 + $0x168] ss:$16 sps:$4 sm:$0xff]  }
 0x717   :  { %7439 = vmatpush2.bf16.msra.mxu0 %v9789_v13  ;;  %v9836_v13 = vld [vmem:[%s14414_s8 + $0x1cc] ss:$16 sps:$4 sm:$0xff]  }
 0x718   :  { %7440 = vmatprep.subr.bf16.mxu0 %v9794_v55  ;;  %v9834_v55 = vld [vmem:[%s14414_s8 + $0x1c8] ss:$16 sps:$4 sm:$0xff]  }
 0x719   :  { %7480 = vmatpush2.bf16.msra.mxu1 %v9885_v27  ;;  %v9851_v27 = vld [vmem:[%s14414_s8 + $0x12c] ss:$16 sps:$4 sm:$0xff]  }
 0x71a   :  { %7481 = vmatprep.subr.bf16.mxu1 %v9890_v44  ;;  %v9849_v44 = vld [vmem:[%s14414_s8 + $0x128] ss:$16 sps:$4 sm:$0xff]  }
 0x71b   :  { %7441 = vmatpush2.bf16.msra.mxu0 %v9792_v37  ;;  %v9842_v37 = vld [vmem:[%s14414_s8 + $0x18c] ss:$16 sps:$4 sm:$0xff]  }
 0x71c   :  { %7442 = vmatprep.subr.bf16.mxu0 %v9797_v33  ;;  %v9840_v33 = vld [vmem:[%s14414_s8 + $0x188] ss:$16 sps:$4 sm:$0xff]  }
 0x71d   :  { %7482 = vmatpush2.bf16.msra.mxu1 %v9888_v39 }
 0x71e   :  { %7483 = vmatprep.subr.bf16.mxu1 %v9893_v21 }
 0x71f   :  { %7443 = vmatpush2.bf16.msra.mxu0 %v9795_v16  ;;  %v9848_v16 = vld [vmem:[%s14414_s8 + $0x14c] ss:$16 sps:$4 sm:$0xff]  }
 0x720   :  { %7444 = vmatprep.subr.bf16.mxu0 %v9800_v11  ;;  %v9846_v11 = vld [vmem:[%s14414_s8 + $0x148] ss:$16 sps:$4 sm:$0xff]  }
 0x721   :  { %7484 = vmatpush2.bf16.msra.mxu1 %v9891_v34 }
 0x722   :  { %7485 = vmatprep.subr.bf16.mxu1 %v9896_v57 }
 0x723   :  { %7445 = vmatpush2.bf16.msra.mxu0 %v9798_v63  ;;  %v9854_v63 = vld [vmem:[%s14414_s8 + $0x10c] ss:$16 sps:$4 sm:$0xff]  }
 0x724   :  { %7446 = vmatprep.subr.bf16.mxu0 %v9803_v26  ;;  %v9852_v26 = vld [vmem:[%s14414_s8 + $0x108] ss:$16 sps:$4 sm:$0xff]  }
 0x725   :  { %7486 = vmatpush2.bf16.msra.mxu1 %v9894_v6 }
 0x726   :  { %7487 = vmatprep.subr.bf16.mxu1 %v9899_v30 }
 0x727   :  { %7447 = vmatpush2.bf16.msra.mxu0 %v9801_v20 }
 0x728   :  { %7448 = vmatprep.subr.bf16.mxu0 %v9806_v12 }
 0x72b   :  { %7449 = vmatpush2.bf16.msra.mxu0 %v9804_v18 }
 0x72c   :  { %7500 = vmatprep.subr.bf16.mxu0 %v9809_v25 }
 0x72e   :  { %v6408_v2 = vpop.f32.mrf.mxu0  ;;  %7451 = vmatmul.mubr.bf16.vlgmr.msra.gmra.mxu0 %v14078_v42 }
 0x72f   :  { %v6409_v22 = vadd.f32 %v6408_v2, %v13902_v62  ;;  %7501 = vmatpush1.bf16.msra.mxu0 %v9807_v10  ;;  %7532 = vmatprep.mubr.bf16.mxu0 %v13889_v43  ;;  %v9897_v62 = vld [vmem:[%s14414_s8 + $0x320] ss:$16 sps:$4 sm:$0xff]  }
 0x730   :  { %v6410_v58 = vpop.f32.mrf.mxu0  ;;  %v6449_v46 = vpop.f32.mrf.mxu1  ;;  %7502 = vmatprep.subr.bf16.mxu0 %v9812_v17  ;;  %7488 = vmatpush2.bf16.msra.mxu1 %v9897_v62 }
 0x731   :  { %v6411_v43 = vadd.f32 %v6410_v58, %v13904_v41  ;;  %v14099_v59 = vadd.f32 %v6449_v46, %v6409_v22  ;;  %v9818_v41 = vld [vmem:[%s14414_s8 + $0x8c] ss:$16 sps:$4 sm:$0xff]   ;;  %7489 = vmatprep.subr.bf16.mxu1 %v9902_v0 }
 0x732   :  { %v6412_v56 = vpop.f32.mrf.mxu0  ;;  %v6451_v61 = vpop.f32.mrf.mxu1 }
 0x733   :  { %v14101_v35 = vadd.f32 %v6451_v61, %v6411_v43  ;;  %7503 = vmatpush1.bf16.msra.mxu0 %v9810_v15 }
 0x734   :  { %v6413_v19 = vpop.f32.mrf.mxu0  ;;  %v6453_v24 = vpop.f32.mrf.mxu1  ;;  %7504 = vmatprep.subr.bf16.mxu0 %v9815_v36  ;;  %7490 = vmatpush2.bf16.msra.mxu1 %v9900_v54 }
 0x735   :  { %7541 = vmatprep.subr.bf16.mxu1 %v9905_v47  ;;  %v9955_v47 = vld [vmem:[%s14416_s10 + $0x68] sm:$0xff]  }
 0x736   :  { %v6454_v52 = vpop.f32.mrf.mxu1 }
 0x737   :  { %7505 = vmatpush1.bf16.msra.mxu0 %v9813_v1  ;;  %v9953_v1 = vld [vmem:[%s14416_s10 + $0x70] sm:$0xff]   ;;  %v9908_v52 = vld [vmem:[%s14414_s8 + $0x2cc] ss:$16 sps:$4 sm:$0xff]  }
 0x738   :  { %7506 = vmatprep.subr.bf16.mxu0 %v9818_v41  ;;  %v9903_v41 = vld [vmem:[%s14414_s8 + $0x2e8] ss:$16 sps:$4 sm:$0xff]  }
 0x73b   :  { %7507 = vmatpush1.bf16.msra.mxu0 %v9816_v38  ;;  %v9954_v38 = vld [vmem:[%s14416_s10 + $0x30] sm:$0xff]  }
 0x73c   :  { %7508 = vmatprep.subr.bf16.mxu0 %v9821_v9  ;;  %v9906_v9 = vld [vmem:[%s14414_s8 + $0x2c8] ss:$16 sps:$4 sm:$0xff]  }
 0x73f   :  { %7509 = vmatpush1.bf16.msra.mxu0 %v9819_v32  ;;  %v9911_v32 = vld [vmem:[%s14414_s8 + $0x2ac] ss:$16 sps:$4 sm:$0xff]  }
 0x740   :  { %7510 = vmatprep.subr.bf16.mxu0 %v9824_v60  ;;  %v9956_v60 = vld [vmem:[%s14416_s10 + $0x28] sm:$0xff]  }
 0x743   :  { %7511 = vmatpush1.bf16.msra.mxu0 %v9822_v31  ;;  %v9957_v31 = vld [vmem:[%s14416_s10 + $0x60] sm:$0xff]  }
 0x744   :  { %7512 = vmatprep.subr.bf16.mxu0 %v9827_v45  ;;  %v9909_v45 = vld [vmem:[%s14414_s8 + $0x2a8] ss:$16 sps:$4 sm:$0xff]  }
 0x747   :  { %7513 = vmatpush1.bf16.msra.mxu0 %v9825_v8  ;;  %v9914_v8 = vld [vmem:[%s14414_s8 + $0x28c] ss:$16 sps:$4 sm:$0xff]  }
 0x748   :  { %7514 = vmatprep.subr.bf16.mxu0 %v9830_v50  ;;  %v9958_v50 = vld [vmem:[%s14416_s10 + $0x20] sm:$0xff]  }
 0x74b   :  { %7515 = vmatpush1.bf16.msra.mxu0 %v9828_v40  ;;  %v9959_v40 = vld [vmem:[%s14416_s10 + $0x58] sm:$0xff]  }
 0x74c   :  { %7516 = vmatprep.subr.bf16.mxu0 %v9833_v49  ;;  %v9912_v49 = vld [vmem:[%s14414_s8 + $0x288] ss:$16 sps:$4 sm:$0xff]  }
 0x74f   :  { %7517 = vmatpush2.bf16.msra.mxu0 %v9831_v29  ;;  %v9917_v29 = vld [vmem:[%s14414_s8 + $0x26c] ss:$16 sps:$4 sm:$0xff]  }
 0x750   :  { %7518 = vmatprep.subr.bf16.mxu0 %v9836_v13  ;;  %v9960_v13 = vld [vmem:[%s14416_s10 + $0x18] sm:$0xff]  }
 0x753   :  { %7519 = vmatpush2.bf16.msra.mxu0 %v9834_v55  ;;  %v9961_v55 = vld [vmem:[%s14416_s10 + $0x50] sm:$0xff]  }
 0x754   :  { %7520 = vmatprep.subr.bf16.mxu0 %v9839_v23  ;;  %v9915_v23 = vld [vmem:[%s14414_s8 + $0x268] ss:$16 sps:$4 sm:$0xff]  }
 0x757   :  { %7521 = vmatpush2.bf16.msra.mxu0 %v9837_v48  ;;  %v9920_v48 = vld [vmem:[%s14414_s8 + $0x24c] ss:$16 sps:$4 sm:$0xff]  }
 0x758   :  { %7522 = vmatprep.subr.bf16.mxu0 %v9842_v37  ;;  %v9962_v37 = vld [vmem:[%s14416_s10 + $0x10] sm:$0xff]  }
 0x75b   :  { %7523 = vmatpush2.bf16.msra.mxu0 %v9840_v33  ;;  %v9918_v33 = vld [vmem:[%s14414_s8 + $0x248] ss:$16 sps:$4 sm:$0xff]  }
 0x75c   :  { %7524 = vmatprep.subr.bf16.mxu0 %v9845_v4  ;;  %v9923_v4 = vld [vmem:[%s14414_s8 + $0x22c] ss:$16 sps:$4 sm:$0xff]  }
 0x75f   :  { %7525 = vmatpush2.bf16.msra.mxu0 %v9843_v7  ;;  %v9921_v7 = vld [vmem:[%s14414_s8 + $0x228] ss:$16 sps:$4 sm:$0xff]  }
 0x760   :  { %7526 = vmatprep.subr.bf16.mxu0 %v9848_v16  ;;  %v9926_v16 = vld [vmem:[%s14414_s8 + $0x20c] ss:$16 sps:$4 sm:$0xff]  }
 0x763   :  { %7527 = vmatpush2.bf16.msra.mxu0 %v9846_v11  ;;  %v9924_v11 = vld [vmem:[%s14414_s8 + $0x208] ss:$16 sps:$4 sm:$0xff]  }
 0x764   :  { %7528 = vmatprep.subr.bf16.mxu0 %v9851_v27  ;;  %v9929_v27 = vld [vmem:[%s14414_s8 + $0x3ec] ss:$16 sps:$4 sm:$0xff]  }
 0x767   :  { %7529 = vmatpush2.bf16.msra.mxu0 %v9849_v44  ;;  %v9927_v44 = vld [vmem:[%s14414_s8 + $0x3e8] ss:$16 sps:$4 sm:$0xff]  }
 0x768   :  { %7530 = vmatprep.subr.bf16.mxu0 %v9854_v63  ;;  %v9932_v63 = vld [vmem:[%s14414_s8 + $0x3cc] ss:$16 sps:$4 sm:$0xff]  }
 0x76b   :  { %7531 = vmatpush2.bf16.msra.mxu0 %v9852_v26  ;;  %v9930_v26 = vld [vmem:[%s14414_s8 + $0x3c8] ss:$16 sps:$4 sm:$0xff]  }
 0x76e   :  { %v6490_v39 = vpop.f32.mrf.mxu0  ;;  %7533 = vmatmul.mubr.bf16.vlgmr.msra.gmra.mxu0 %v14078_v42 }
 0x76f   :  { %v6491_v25 = vadd.f32 %v6490_v39, %v14099_v59  ;;  %v9951_v59 = vld [vmem:[%s14416_s10 + $0x78] sm:$0xff]  }
 0x770   :  { %v6492_v21 = vpop.f32.mrf.mxu0  ;;  %v6531_v20 = vpop.f32.mrf.mxu1  ;;  %8842 = vmatprep.subr.bf16.mxu0 %v9951_v59  ;;  %v9935_v39 = vld [vmem:[%s14414_s8 + $0x3ac] ss:$16 sps:$4 sm:$0xff]  }
 0x771   :  { %v6493_v6 = vadd.f32 %v6492_v21, %v14101_v35  ;;  %v6532_v10 = vadd.f32 %v6531_v20, %v6491_v25  ;;  %v9952_v35 = vld [vmem:[%s14416_s10 + $0x38] sm:$0xff]   ;;  %v9971_v59 = vld [vmem:[%s14416_s10 + $0xe8] sm:$0xff]  }
 0x772   :  { %v6494_v12 = vpop.f32.mrf.mxu0  ;;  %v6533_v34 = vpop.f32.mrf.mxu1  ;;  %8843 = vmatpush3.bf16.msra.mxu0 %v9952_v35  ;;  %v9933_v21 = vld [vmem:[%s14414_s8 + $0x3a8] ss:$16 sps:$4 sm:$0xff]   ;;  %v9938_v20 = vld [vmem:[%s14414_s8 + $0x38c] ss:$16 sps:$4 sm:$0xff]  }
 0x773   :  { %v6534_v2 = vadd.f32 %v6533_v34, %v6493_v6  ;;  %8844 = vmatprep.subr.bf16.mxu0 %v9953_v1  ;;  %v9936_v12 = vld [vmem:[%s14414_s8 + $0x388] ss:$16 sps:$4 sm:$0xff]   ;;  %v9941_v34 = vld [vmem:[%s14414_s8 + $0x36c] ss:$16 sps:$4 sm:$0xff]   ;;  %v9973_v1 = vld [vmem:[%s14416_s10 + $0xe0] sm:$0xff]  }
 0x774   :  { %v6495_v57 = vpop.f32.mrf.mxu0  ;;  %v6535_v18 = vpop.f32.mrf.mxu1  ;;  %v9947_v25 = vld [vmem:[%s14414_s8 + $0x32c] ss:$16 sps:$4 sm:$0xff]  }
 0x775   :  { %v9939_v57 = vld [vmem:[%s14414_s8 + $0x368] ss:$16 sps:$4 sm:$0xff]   ;;  %v9944_v18 = vld [vmem:[%s14414_s8 + $0x34c] ss:$16 sps:$4 sm:$0xff]  }
 0x776   :  { %v6536_v51 = vpop.f32.mrf.mxu1  ;;  %8845 = vmatpush3.bf16.msra.mxu0 %v9954_v38  ;;  %v9972_v35 = vld [vmem:[%s14416_s10 + $0xa8] sm:$0xff]  }
 0x777   :  { %8846 = vmatprep.subr.bf16.mxu0 %v9955_v47  ;;  %v9942_v51 = vld [vmem:[%s14414_s8 + $0x348] ss:$16 sps:$4 sm:$0xff]  }
 0x77a   :  { %8847 = vmatpush3.bf16.msra.mxu0 %v9956_v60  ;;  %v9980_v60 = vld [vmem:[%s14416_s10 + $0x88] sm:$0xff]  }
 0x77b   :  { %8848 = vmatprep.subr.bf16.mxu0 %v9957_v31  ;;  %v9981_v31 = vld [vmem:[%s14416_s10 + $0xc0] sm:$0xff]  }
 0x77e   :  { %8849 = vmatpush3.bf16.msra.mxu0 %v9958_v50 }
 0x77f   :  { %8850 = vmatprep.subr.bf16.mxu0 %v9959_v40 }
 0x782   :  { %8851 = vmatpush3.bf16.msra.mxu0 %v9960_v13 }
 0x783   :  { %8852 = vmatprep.subr.bf16.mxu0 %v9961_v55 }
 0x786   :  { %8853 = vmatpush3.bf16.msra.mxu0 %v9962_v37 }
 0x7ae   :  { %v6572_v17 = vpop.f32.mrf.mxu0 }
 0x7af   :  { %v6573_v22 = vadd.f32 %v6572_v17, %v6532_v10  ;;  %v9945_v10 = vld [vmem:[%s14414_s8 + $0x328] ss:$16 sps:$4 sm:$0xff]  }
 0x7b0   :  { %v6574_v15 = vpop.f32.mrf.mxu0  ;;  %v6613_v30 = vpop.f32.mrf.mxu1 }
 0x7b1   :  { %v6575_v58 = vadd.f32 %v6574_v15, %v6534_v2  ;;  %v6614_v46 = vadd.f32 %v6613_v30, %v6573_v22  ;;  %v9950_v2 = vld [vmem:[%s14414_s8 + $0x30c] ss:$16 sps:$4 sm:$0xff]   ;;  %v9948_v15 = vld [vmem:[%s14414_s8 + $0x308] ss:$16 sps:$4 sm:$0xff]  }
 0x7b2   :  { %v6576_v42 = vpop.f32.mrf.mxu0  ;;  %v6615_v36 = vpop.f32.mrf.mxu1 }
 0x7b3   :  { %v6616_v62 = vadd.f32 %v6615_v36, %v6575_v58  ;;  %v6622_v43 = vmax.f32 %v6614_v46, 0.0  ;;  %v9963_v58 = vld [vmem:[%s14416_s10 + $0x48] sm:$0xff]   ;;  %v9965_v42 = vld [vmem:[%s14416_s10 + $0x40] sm:$0xff]  }
 0x7b4   :  { %v6577_v56 = vpop.f32.mrf.mxu0  ;;  %v6617_v61 = vpop.f32.mrf.mxu1  ;;  %v9964_v46 = vld [vmem:[%s14416_s10 + $0x8] sm:$0xff]   ;;  %8854 = vmatprep.subr.bf16.mxu0 %v9963_v58  ;;  %v9966_v36 = vld [vmem:[%s14416_s10] sm:$0xff]  }
 0x7b5   :  { %v6623_v0 = vmax.f32 %v6616_v62, 0.0  ;;  %v14208_v54 = vpack.c.bf16 %v6622_v43, %v6622_v43  ;;  %8855 = vmatpush3.bf16.msra.mxu0 %v9964_v46  ;;  %v9967_v62 = vld [vmem:[%s14416_s10 + $0xf8] sm:$0xff]   ;;  %v9969_v56 = vld [vmem:[%s14416_s10 + $0xf0] sm:$0xff]  }
 0x7b6   :  { %v6618_v19 = vpop.f32.mrf.mxu1  ;;  %8856 = vmatprep.subr.bf16.mxu0 %v9965_v42  ;;  %v9968_v43 = vld [vmem:[%s14416_s10 + $0xb8] sm:$0xff]   ;;  %v9970_v61 = vld [vmem:[%s14416_s10 + $0xb0] sm:$0xff]  }
 0x7b7   :  { %v6627_v24 = vpack.c.bf16 %v6623_v0, %v6623_v0  ;;  %v9974_v0 = vld [vmem:[%s14416_s10 + $0xa0] sm:$0xff]   ;;  %v9975_v19 = vld [vmem:[%s14416_s10 + $0xd8] sm:$0xff]  }
 0x7b9   :  { %7491 = vmatprep.mubr.bf16.mxu1 %v6627_v24  ;;  %8857 = vmatpush3.bf16.msra.mxu0 %v9966_v36 }
 0x7ba   :  { %7492 = vmatmul.mubr.bf16.vlgmr.msra.gmra.mxu1 %v14208_v54 }
 0x7bb   :  { %7542 = vmatpush1.bf16.msra.mxu1 %v9903_v41  ;;  %7573 = vmatprep.mubr.bf16.mxu1 %v6627_v24  ;;  %v9976_v24 = vld [vmem:[%s14416_s10 + $0x98] sm:$0xff]   ;;  %v9977_v41 = vld [vmem:[%s14416_s10 + $0xd0] sm:$0xff]  }
 0x7bc   :  { %7543 = vmatprep.subr.bf16.mxu1 %v9908_v52 }
 0x7bf   :  { %7544 = vmatpush1.bf16.msra.mxu1 %v9906_v9 }
 0x7c0   :  { %7545 = vmatprep.subr.bf16.mxu1 %v9911_v32  ;;  %v9979_v32 = vld [vmem:[%s14416_s10 + $0xc8] sm:$0xff]  }
 0x7c3   :  { %7546 = vmatpush1.bf16.msra.mxu1 %v9909_v45  ;;  %v9982_v45 = vld [vmem:[%s14416_s10 + $0x80] sm:$0xff]  }
 0x7c4   :  { %7547 = vmatprep.subr.bf16.mxu1 %v9914_v8  ;;  %v6756_v8 = vld [vmem:[%s14415_s9] sm:$0xf] }
 0x7c5   :  { %v6761_v50 = vrot.slane %v6756_v8, %v3386_v14  ;;  %v6765_v40 = vrot.slane %v6756_v8, %v3390_v5  ;;  %v6769_v14 = vrot.slane %v6756_v8, %v3394_v3  ;;  %v6773_v5 = vrot.slane %v6756_v8, %v3398_v28  ;;  %v8634_v28 = vld [vmem:[%s14417_s11] ss:$0 sm:$0xff] }
 0x7c7   :  { %7548 = vmatpush1.bf16.msra.mxu1 %v9912_v49 }
 0x7c8   :  { %7549 = vmatprep.subr.bf16.mxu1 %v9917_v29 }
 0x7cb   :  { %7550 = vmatpush1.bf16.msra.mxu1 %v9915_v23 }
 0x7cc   :  { %7551 = vmatprep.subr.bf16.mxu1 %v9920_v48 }
 0x7cf   :  { %7552 = vmatpush1.bf16.msra.mxu1 %v9918_v33 }
 0x7d0   :  { %7553 = vmatprep.subr.bf16.mxu1 %v9923_v4 }
 0x7d3   :  { %7554 = vmatpush1.bf16.msra.mxu1 %v9921_v7 }
 0x7d4   :  { %7555 = vmatprep.subr.bf16.mxu1 %v9926_v16 }
 0x7d7   :  { %7556 = vmatpush1.bf16.msra.mxu1 %v9924_v11 }
 0x7d8   :  { %7557 = vmatprep.subr.bf16.mxu1 %v9929_v27 }
 0x7db   :  { %7558 = vmatpush2.bf16.msra.mxu1 %v9927_v44 }
 0x7dc   :  { %7559 = vmatprep.subr.bf16.mxu1 %v9932_v63 }
 0x7df   :  { %7560 = vmatpush2.bf16.msra.mxu1 %v9930_v26 }
 0x7e0   :  { %7561 = vmatprep.subr.bf16.mxu1 %v9935_v39 }
 0x7e3   :  { %7562 = vmatpush2.bf16.msra.mxu1 %v9933_v21 }
 0x7e4   :  { %7563 = vmatprep.subr.bf16.mxu1 %v9938_v20 }
 0x7e7   :  { %7564 = vmatpush2.bf16.msra.mxu1 %v9936_v12 }
 0x7e8   :  { %7565 = vmatprep.subr.bf16.mxu1 %v9941_v34 }
 0x7eb   :  { %7566 = vmatpush2.bf16.msra.mxu1 %v9939_v57 }
 0x7ec   :  { %7567 = vmatprep.subr.bf16.mxu1 %v9944_v18 }
 0x7ee   :  { %v7452_v6 = vpop.f32.mrf.mxu0 }
 0x7ef   :  { %7568 = vmatpush2.bf16.msra.mxu1 %v9942_v51  ;;  %v7453_v49 = vadd.f32 %v7452_v6, %v6761_v50 }
 0x7f0   :  { %v7454_v17 = vpop.f32.mrf.mxu0  ;;  %7569 = vmatprep.subr.bf16.mxu1 %v9947_v25 }
 0x7f1   :  { %v7455_v13 = vadd.f32 %v7454_v17, %v6765_v40 }
 0x7f2   :  { %v7456_v22 = vpop.f32.mrf.mxu0 }
 0x7f3   :  { %7570 = vmatpush2.bf16.msra.mxu1 %v9945_v10 }
 0x7f4   :  { %v7457_v30 = vpop.f32.mrf.mxu0  ;;  %7571 = vmatprep.subr.bf16.mxu1 %v9950_v2 }
 0x7f7   :  { %7572 = vmatpush2.bf16.msra.mxu1 %v9948_v15 }
 0x7f8   :  { %8864 = vmatprep.subr.bf16.mxu1 %v9967_v62 }
 0x7fa   :  { %7574 = vmatmul.mubr.bf16.vlgmr.msra.gmra.mxu1 %v14208_v54  ;;  %v9978_v54 = vld [vmem:[%s14416_s10 + $0x90] sm:$0xff]  }
 0x7fb   :  { %8865 = vmatpush3.bf16.msra.mxu1 %v9968_v43 }
 0x7fc   :  { %8866 = vmatprep.subr.bf16.mxu1 %v9969_v56 }
 0x7ff   :  { %8867 = vmatpush3.bf16.msra.mxu1 %v9970_v61 }
 0x800   :  { %8868 = vmatprep.subr.bf16.mxu1 %v9971_v59 }
 0x803   :  { %8869 = vmatpush3.bf16.msra.mxu1 %v9972_v35 }
 0x804   :  { %8870 = vmatprep.subr.bf16.mxu1 %v9973_v1 }
 0x807   :  { %8871 = vmatpush3.bf16.msra.mxu1 %v9974_v0 }
 0x808   :  { %8872 = vmatprep.subr.bf16.mxu1 %v9975_v19 }
 0x80b   :  { %8873 = vmatpush3.bf16.msra.mxu1 %v9976_v24 }
 0x80c   :  { %8874 = vmatprep.subr.bf16.mxu1 %v9977_v41 }
 0x80f   :  { %8875 = vmatpush3.bf16.msra.mxu1 %v9978_v54 }
 0x810   :  { %8876 = vmatprep.subr.bf16.mxu1 %v9979_v32 }
 0x813   :  { %8877 = vmatpush3.bf16.msra.mxu1 %v9980_v60 }
 0x814   :  { %8878 = vmatprep.subr.bf16.mxu1 %v9981_v31 }
 0x817   :  { %8879 = vmatpush3.bf16.msra.mxu1 %v9982_v45 }
 0x82e   :  { %v7534_v52 = vpop.f32.mrf.mxu0 }
 0x82f   :  { %v7535_v27 = vadd.f32 %v7534_v52, %v6769_v14 }
 0x830   :  { %v7536_v38 = vpop.f32.mrf.mxu0 }
 0x831   :  { %v7537_v63 = vadd.f32 %v7536_v38, %v6773_v5 }
 0x832   :  { %v7538_v47 = vpop.f32.mrf.mxu0 }
 0x834   :  { %v7539_v9 = vpop.f32.mrf.mxu0 }
 0x87a   :  { %v7493_v29 = vpop.f32.mrf.mxu1 }
 0x87b   :  { %v7494_v55 = vadd.f32 %v7493_v29, %v7453_v49 }
 0x87c   :  { %v7495_v23 = vpop.f32.mrf.mxu1 }
 0x87d   :  { %v7496_v48 = vadd.f32 %v7495_v23, %v7455_v13  ;;  %v7582_v37 = vmax.f32 %v7494_v55, 0.0 }
 0x87e   :  { %v7497_v33 = vpop.f32.mrf.mxu1 }
 0x87f   :  { %v7583_v4 = vmax.f32 %v7496_v48, 0.0  ;;  %v7586_v11 = vpack.c.bf16 %v7582_v37, %v7582_v37 }
 0x880   :  { %v7498_v7 = vpop.f32.mrf.mxu1 }
 0x881   :  { %v7587_v16 = vpack.c.bf16 %v7583_v4, %v7583_v4 }
 0x883   :  { %7885 = vmatprep.mubr.bf16.mxu0 %v7587_v16 }
 0x884   :  { %7886 = vmatmul.mubr.bf16.vlgmr.msra.gmra.mxu0 %v7586_v11 }
 0x8ba   :  { %v7575_v44 = vpop.f32.mrf.mxu1 }
 0x8bb   :  { %v7576_v26 = vadd.f32 %v7575_v44, %v7535_v27 }
 0x8bc   :  { %v7577_v39 = vpop.f32.mrf.mxu1 }
 0x8bd   :  { %v7578_v21 = vadd.f32 %v7577_v39, %v7537_v63  ;;  %v7584_v20 = vmax.f32 %v7576_v26, 0.0 }
 0x8be   :  { %v7579_v12 = vpop.f32.mrf.mxu1 }
 0x8bf   :  { %v7585_v34 = vmax.f32 %v7578_v21, 0.0  ;;  %v7588_v51 = vpack.c.bf16 %v7584_v20, %v7584_v20 }
 0x8c0   :  { %v7580_v57 = vpop.f32.mrf.mxu1 }
 0x8c1   :  { %v7589_v18 = vpack.c.bf16 %v7585_v34, %v7585_v34 }
 0x8c3   :  { %7925 = vmatprep.mubr.bf16.mxu1 %v7589_v18 }
 0x8c4   :  { %7926 = vmatmul.mubr.bf16.vlgmr.msra.gmra.mxu1 %v7588_v51 }
 0x944   :  { %v8858_v25 = vpop.f32.mrf.mxu0 }
 0x946   :  { %v8859_v6 = vpop.f32.mrf.mxu0 }
 0x947   :  { %v8860_v53 = vadd.f32 %v8859_v6, %v8858_v25 }
 0x948   :  { %v8861_v3 = vpop.f32.mrf.mxu0 }
 0x949   :  { %v7888_v22 = vadd.f32 %v8860_v53, %v8634_v28 }
 0x94a   :  { %v8862_v10 = vpop.f32.mrf.mxu0 }
 0x984   :  { %v8880_v17 = vpop.f32.mrf.mxu1 }
 0x986   :  { %v8881_v2 = vpop.f32.mrf.mxu1 }
 0x987   :  { %v8882_v15 = vadd.f32 %v8881_v2, %v8880_v17 }
 0x988   :  { %v8883_v30 = vpop.f32.mrf.mxu1 }
 0x989   :  { %v7928_v58 = vadd.f32 %v8882_v15, %v7888_v22 }
 0x98a   :  { %v8884_v46 = vpop.f32.mrf.mxu1 }
 0x98b   :  { %7933 = vst [vmem:[#allocation5] sm:$0x3] %v7928_v58 }
 0x98c   :  { %9995 = shalt.err (!%p9992_p4)
}
 0x98d   :  { %7943 = dma.vmem_to_hbm [thread:$0]  %s7941_s18, 32, %s14418_s12, [#allocation6]  }
 0x98e   :  { %10004 = dma.done.wait [#allocation6], 32  }
 0x98f   :  { %10005 = vsyncadd [#allocation6], 4294967264 }
 0x990   :  { %7947 = vsyncpa [#allocation6], 1 }

</bundles_post_ra>
